<compile_context>
chip_gen: v7x
topology: tpu7x:2x2x1
jax: 0.10.0
libtpu: 0.0.40
codegen_flags: <defaults>
</compile_context>

<pallas_src>
import functools

import jax
import jax.numpy as jnp
from jax.experimental import pallas as pl
from jax.experimental.pallas import tpu as pltpu

NEG_SLOPE = 0.2
BN_EPS = 1e-5


# ----------------------------- Pallas kernel --------------------------------

def _conv_bn_lrelu_kernel(x_ref, band_ref, bias_ref, pmat_ref, gamma_ref,
                          beta_ref, rowmask_ref, o_ref, tap_ref, acc_ref, *,
                          n_batch, hp, hv, inv_count, has_bn, has_act,
                          neg_slope, eps):
    """One whole conv layer, single grid step, all operands resident in VMEM.

    x_ref       (N*Hp, Wp*Cin)  bf16  zero-padded NHWC activation, rows = (n, h)
    band_ref    (4, Wp*Cin, L)  bf16  per-row-tap band matrices, L = Wo*Cout
    bias_ref    (1, L)          f32   conv bias tiled to the (wo, co) lane layout
    pmat_ref    (L, L)          f32   1.0 where lanes share a channel (co == co')
    gamma_ref   (1, L)          f32   BN gamma tiled to lanes
    beta_ref    (1, L)          f32   BN beta tiled to lanes
    rowmask_ref (N*Hv, 1)       f32   1.0 on rows that are real conv outputs
    o_ref       (N*Hv, L)             layer output (bf16; f32 for final layer)
    tap_ref     (N*Hp, L)       f32   scratch: one row-tap GEMM result
    acc_ref     (N*Hv, L)       f32   scratch: output-aligned f32 accumulator
    """
    # --- conv as 4 row-tap GEMMs against band matrices (fused im2col) -------
    acc_ref[...] = jnp.zeros_like(acc_ref)
    for ki in range(4):                                   # static unroll over kh
        tap_ref[...] = jnp.dot(x_ref[...], band_ref[ki],
                               preferred_element_type=jnp.float32)
        for n in range(n_batch):                          # align rows per image
            acc_ref[pl.ds(n * hv, hv), :] += tap_ref[pl.ds(n * hp + ki, hv), :]

    y = acc_ref[...] + bias_ref[...]                      # (N*Hv, L) f32

    # --- fused BatchNorm (training-mode batch stats, f32) + affine ----------
    if has_bn:
        ym = y * rowmask_ref[...]                         # drop non-output rows
        grouped1 = jnp.dot(ym, pmat_ref[...],
                           preferred_element_type=jnp.float32)
        grouped2 = jnp.dot(ym * ym, pmat_ref[...],
                           preferred_element_type=jnp.float32)
        mean = jnp.sum(grouped1, axis=0, keepdims=True) * inv_count   # (1, L)
        msq = jnp.sum(grouped2, axis=0, keepdims=True) * inv_count
        var = jnp.maximum(msq - mean * mean, 0.0)         # biased batch variance
        scale = gamma_ref[...] * jax.lax.rsqrt(var + eps)
        shift = beta_ref[...] - mean * scale
        y = y * scale + shift

    # --- fused LeakyReLU -----------------------------------------------------
    if has_act:
        y = jnp.where(y >= 0, y, neg_slope * y)

    o_ref[...] = y.astype(o_ref.dtype)


# ----------------------------- kernel wrapper --------------------------------

def conv_layer(x2, band, bias_lane, pmat, gamma_lane, beta_lane, row_mask, *,
               n_batch, hp, hv, inv_count, has_bn, has_act, out_dtype):
    t, kx = x2.shape
    l = band.shape[-1]
    m2 = n_batch * hv
    kernel = functools.partial(
        _conv_bn_lrelu_kernel, n_batch=n_batch, hp=hp, hv=hv,
        inv_count=inv_count, has_bn=has_bn, has_act=has_act,
        neg_slope=NEG_SLOPE, eps=BN_EPS)
    return pl.pallas_call(
        kernel,
        out_shape=jax.ShapeDtypeStruct((m2, l), out_dtype),
        grid=(1,),
        in_specs=[
            pl.BlockSpec((t, kx), lambda i: (0, 0)),
            pl.BlockSpec((4, kx, l), lambda i: (0, 0, 0)),
            pl.BlockSpec((1, l), lambda i: (0, 0)),
            pl.BlockSpec((l, l), lambda i: (0, 0)),
            pl.BlockSpec((1, l), lambda i: (0, 0)),
            pl.BlockSpec((1, l), lambda i: (0, 0)),
            pl.BlockSpec((m2, 1), lambda i: (0, 0)),
        ],
        out_specs=pl.BlockSpec((m2, l), lambda i: (0, 0)),
        scratch_shapes=[pltpu.VMEM((t, l), jnp.float32),
                        pltpu.VMEM((m2, l), jnp.float32)],
        compiler_params=pltpu.CompilerParams(
            dimension_semantics=("arbitrary",)),
    )(x2, band, bias_lane, pmat, gamma_lane, beta_lane, row_mask)


# ----------------------------- model setup ------------------------------------

def make_layer_configs(input_nc, ndf, n_layers):
    """Mirror the nn.Sequential built in NLayerDiscriminator.__init__ (BatchNorm)."""
    # (cin, cout, stride, has_bias, has_bn)
    cfgs = [(input_nc, ndf, 2, True, False)]          # conv + LeakyReLU
    nf_mult = 1
    for n in range(1, n_layers):
        nf_mult_prev, nf_mult = nf_mult, min(2 ** n, 8)
        cfgs.append((ndf * nf_mult_prev, ndf * nf_mult, 2, False, True))
    nf_mult_prev, nf_mult = nf_mult, min(2 ** n_layers, 8)
    cfgs.append((ndf * nf_mult_prev, ndf * nf_mult, 1, False, True))
    cfgs.append((ndf * nf_mult, 1, 1, True, False))   # final conv, no activation
    return cfgs


def init_params(key, cfgs):
    params = []
    for (cin, cout, stride, has_bias, has_bn) in cfgs:
        key, kw_, kb_, kg_, kbeta_ = jax.random.split(key, 5)
        # weight stored as (kh, kw, cin, cout) == PyTorch (cout,cin,kh,kw) transposed
        w = 0.05 * jax.random.normal(kw_, (4, 4, cin, cout), jnp.float32)
        b = (0.05 * jax.random.normal(kb_, (cout,), jnp.float32)
             if has_bias else jnp.zeros((cout,), jnp.float32))
        gamma = 1.0 + 0.1 * jax.random.normal(kg_, (cout,), jnp.float32)
        beta = 0.1 * jax.random.normal(kbeta_, (cout,), jnp.float32)
        params.append({"w": w, "b": b, "gamma": gamma, "beta": beta})
    return params


def prepare_layer(p, cin, cout, stride, hin, win, n_batch):
    """Precompute (once, outside jit) the band matrices and lane-layout constants."""
    hp, wp = hin + 2, win + 2
    ho = (hp - 4) // stride + 1
    wo = (wp - 4) // stride + 1
    hv = hp - 3                              # rows emitted per image (stride-1 in H)
    l = wo * cout
    # band[ki, (stride*wo+kj)*cin + ci, wo*cout + co] = w[ki, kj, ci, co]
    w = p["w"].astype(jnp.float32)                                # (4, 4, cin, cout)
    wpix = jnp.arange(wp)
    woix = jnp.arange(wo)
    kjix = jnp.arange(4)
    sel = (wpix[None, :, None] ==
           stride * woix[None, None, :] + kjix[:, None, None]).astype(jnp.float32)
    band = jnp.einsum("kjcd,jpo->kpcod", w, sel)                  # (4, wp, cin, wo, cout)
    band = band.reshape(4, wp * cin, wo * cout).astype(jnp.bfloat16)

    bias_lane = jnp.tile(p["b"].astype(jnp.float32), wo).reshape(1, l)
    gamma_lane = jnp.tile(p["gamma"].astype(jnp.float32), wo).reshape(1, l)
    beta_lane = jnp.tile(p["beta"].astype(jnp.float32), wo).reshape(1, l)
    lane = jnp.arange(l)
    pmat = (lane[:, None] % cout == lane[None, :] % cout).astype(jnp.float32)
    hidx = jnp.arange(hv)
    row_mask = jnp.tile((hidx % stride == 0).astype(jnp.float32), n_batch)
    row_mask = row_mask.reshape(n_batch * hv, 1)
    inv_count = 1.0 / float(n_batch * ho * wo)
    return dict(band=band, bias=bias_lane, gamma=gamma_lane, beta=beta_lane,
                pmat=pmat, row_mask=row_mask, hp=hp, wp=wp, ho=ho, wo=wo,
                hv=hv, inv_count=inv_count)


def prepare_all(params, cfgs, n_batch, hin, win):
    consts = []
    h, w = hin, win
    for (cin, cout, stride, _, _), p in zip(cfgs, params):
        lc = prepare_layer(p, cin, cout, stride, h, w, n_batch)
        consts.append(lc)
        h, w = lc["ho"], lc["wo"]
    return consts


# ----------------------------- forward pass -----------------------------------

def nlayer_discriminator_forward(x_nchw, cfgs, layer_consts):
    """Forward of NLayerDiscriminator (norm_layer=BatchNorm2d, use_sigmoid=False).

    BatchNorm uses training-mode (biased) batch statistics, like the original
    PyTorch module in train() mode.
    """
    n = x_nchw.shape[0]
    x = jnp.transpose(x_nchw, (0, 2, 3, 1)).astype(jnp.bfloat16)      # NCHW -> NHWC
    n_total = len(cfgs)
    for idx, ((cin, cout, stride, _, has_bn), lc) in enumerate(zip(cfgs, layer_consts)):
        hp, wp, wo, hv = lc["hp"], lc["wp"], lc["wo"], lc["hv"]
        # zero padding (padw=1) + flatten to the 2-D (N*Hp, Wp*Cin) row layout.
        # TODO(synk): this pad/reshape and the stride-2 row subsample below are
        # ~1x-activation-bytes XLA glue; they could be folded into the producing
        # kernel's store path for a fully HBM-round-trip-free layer chain.
        xp = jnp.pad(x, ((0, 0), (1, 1), (1, 1), (0, 0)))
        x2 = xp.reshape(n * hp, wp * cin)
        is_last = idx == n_total - 1
        y2 = conv_layer(
            x2, lc["band"], lc["bias"], lc["pmat"], lc["gamma"], lc["beta"],
            lc["row_mask"], n_batch=n, hp=hp, hv=hv, inv_count=lc["inv_count"],
            has_bn=has_bn, has_act=not is_last,
            out_dtype=jnp.float32 if is_last else jnp.bfloat16)
        y = y2.reshape(n, hv, wo, cout)
        if stride == 2:
            y = y[:, ::2]                                # keep stride-2 output rows
        x = y
    return jnp.transpose(x, (0, 3, 1, 2))                # NHWC -> NCHW


# ----------------------------- pure-JAX reference ------------------------------

def reference_forward(x_nchw, params, cfgs):
    x = jnp.transpose(x_nchw, (0, 2, 3, 1)).astype(jnp.bfloat16)
    n_total = len(cfgs)
    for idx, ((cin, cout, stride, _, has_bn), p) in enumerate(zip(cfgs, params)):
        y = jax.lax.conv_general_dilated(
            x, p["w"].astype(jnp.bfloat16),
            window_strides=(stride, stride), padding=((1, 1), (1, 1)),
            dimension_numbers=("NHWC", "HWIO", "NHWC"),
            preferred_element_type=jnp.float32)
        y = y + p["b"].astype(jnp.float32)
        if has_bn:
            mean = jnp.mean(y, axis=(0, 1, 2), keepdims=True)
            var = jnp.maximum(
                jnp.mean(jnp.square(y), axis=(0, 1, 2), keepdims=True)
                - mean * mean, 0.0)
            y = (y - mean) * jax.lax.rsqrt(var + BN_EPS) * p["gamma"] + p["beta"]
        if idx != n_total - 1:
            y = jnp.where(y >= 0, y, NEG_SLOPE * y)
            y = y.astype(jnp.bfloat16)
        x = y
    return jnp.transpose(x, (0, 3, 1, 2))


# ----------------------------- demo ------------------------------------------

if __name__ == "__main__":
    input_nc, ndf, n_layers = 4, 8, 3
    N, H, W = 2, 32, 32                       # 32 -> 16 -> 8 -> 4 -> 3 -> 2

    key = jax.random.PRNGKey(0)
    kx, kp = jax.random.split(key)
    x = jax.random.normal(kx, (N, input_nc, H, W), jnp.float32)   # NCHW like PyTorch

    cfgs = make_layer_configs(input_nc, ndf, n_layers)
    params = init_params(kp, cfgs)
    layer_consts = prepare_all(params, cfgs, N, H, W)

    fwd = jax.jit(lambda inp: nlayer_discriminator_forward(inp, cfgs, layer_consts))
    out = fwd(x)
    jax.block_until_ready(out)

    ref = jax.jit(lambda inp: reference_forward(inp, params, cfgs))(x)
    jax.block_until_ready(ref)

    assert out.shape == (N, 1, 2, 2), out.shape
    assert bool(jnp.all(jnp.isfinite(out)))
    max_err = float(jnp.max(jnp.abs(out - ref)))
    assert max_err < 5e-2, f"mismatch vs pure-JAX reference: {max_err}"
    print("KERNEL_OK")
</pallas_src>

<mosaic_0001>
module attributes {stable_mosaic.version = 11 : i64} {
  func.func @_conv_bn_lrelu_kernel(%arg0: i32, %arg1: memref<68x136xbf16, #tpu.memory_space<vmem>>, %arg2: memref<4x136x128xbf16, #tpu.memory_space<vmem>>, %arg3: memref<1x128xf32, #tpu.memory_space<vmem>>, %arg4: memref<128x128xf32, #tpu.memory_space<vmem>>, %arg5: memref<1x128xf32, #tpu.memory_space<vmem>>, %arg6: memref<1x128xf32, #tpu.memory_space<vmem>>, %arg7: memref<62x1xf32, #tpu.memory_space<vmem>>, %arg8: memref<62x128xbf16, #tpu.memory_space<vmem>>, %arg9: memref<68x128xf32, #tpu.memory_space<vmem>>, %arg10: memref<62x128xf32, #tpu.memory_space<vmem>>) attributes {dimension_semantics = [#tpu.dimension_semantics<arbitrary>], iteration_bounds = array<i64: 1>, scalar_prefetch = 0 : i64, scratch_operands = 2 : i64, tpu.core_type = #tpu.core_type<tc>, window_params = [{pipeline_mode = #tpu.pipeline_mode<synchronous>, transform_indices = @transform_0, window_bounds = array<i64: 68, 136>}, {pipeline_mode = #tpu.pipeline_mode<synchronous>, transform_indices = @transform_1, window_bounds = array<i64: 4, 136, 128>}, {pipeline_mode = #tpu.pipeline_mode<synchronous>, transform_indices = @transform_2, window_bounds = array<i64: 1, 128>}, {pipeline_mode = #tpu.pipeline_mode<synchronous>, transform_indices = @transform_3, window_bounds = array<i64: 128, 128>}, {pipeline_mode = #tpu.pipeline_mode<synchronous>, transform_indices = @transform_4, window_bounds = array<i64: 1, 128>}, {pipeline_mode = #tpu.pipeline_mode<synchronous>, transform_indices = @transform_5, window_bounds = array<i64: 1, 128>}, {pipeline_mode = #tpu.pipeline_mode<synchronous>, transform_indices = @transform_6, window_bounds = array<i64: 62, 1>}, {pipeline_mode = #tpu.pipeline_mode<synchronous>, transform_indices = @transform_7, window_bounds = array<i64: 62, 128>}]} {
    %cst = arith.constant 0.000000e+00 : f32
    %0 = vector.broadcast %cst : f32 to vector<62x128xf32>
    %c0 = arith.constant 0 : index
    %c0_0 = arith.constant 0 : index
    %1 = vector.load %arg10[%c0, %c0_0] : memref<62x128xf32, #tpu.memory_space<vmem>>, vector<62x128xf32>
    tpu.vector_store %arg10[%c0, %c0_0], %0 {strides = array<i32>} : memref<62x128xf32, #tpu.memory_space<vmem>>, vector<62x128xf32>,
    %c0_1 = arith.constant 0 : index
    %c0_2 = arith.constant 0 : index
    %2 = vector.load %arg1[%c0_1, %c0_2] : memref<68x136xbf16, #tpu.memory_space<vmem>>, vector<68x136xbf16>
    %c0_3 = arith.constant 0 : index
    %c0_4 = arith.constant 0 : index
    %c0_5 = arith.constant 0 : index
    %3 = vector.load %arg2[%c0_3, %c0_4, %c0_5] : memref<4x136x128xbf16, #tpu.memory_space<vmem>>, vector<1x136x128xbf16>
    %4 = vector.shape_cast %3 : vector<1x136x128xbf16> to vector<136x128xbf16>
    %cst_6 = arith.constant dense<0.000000e+00> : vector<68x128xf32>
    %5 = tpu.matmul %2, %4, %cst_6 {dimension_numbers = #tpu.dot_dimension_numbers<[1], [0], [0], [1], [0, 0, 1, 1], [], []>} : vector<68x136xbf16>, vector<136x128xbf16>, vector<68x128xf32> -> vector<68x128xf32>
    %c0_7 = arith.constant 0 : index
    %c0_8 = arith.constant 0 : index
    %6 = vector.load %arg9[%c0_7, %c0_8] : memref<68x128xf32, #tpu.memory_space<vmem>>, vector<68x128xf32>
    tpu.vector_store %arg9[%c0_7, %c0_8], %5 {strides = array<i32>} : memref<68x128xf32, #tpu.memory_space<vmem>>, vector<68x128xf32>,
    %c0_9 = arith.constant 0 : index
    %c0_10 = arith.constant 0 : index
    %7 = vector.load %arg10[%c0_9, %c0_10] : memref<62x128xf32, #tpu.memory_space<vmem>>, vector<31x128xf32>
    %c0_11 = arith.constant 0 : index
    %c0_12 = arith.constant 0 : index
    %8 = vector.load %arg9[%c0_11, %c0_12] : memref<68x128xf32, #tpu.memory_space<vmem>>, vector<31x128xf32>
    %9 = arith.addf %7, %8 : vector<31x128xf32>
    %c0_13 = arith.constant 0 : index
    %c0_14 = arith.constant 0 : index
    %10 = vector.load %arg10[%c0_13, %c0_14] : memref<62x128xf32, #tpu.memory_space<vmem>>, vector<31x128xf32>
    tpu.vector_store %arg10[%c0_13, %c0_14], %9 {strides = array<i32>} : memref<62x128xf32, #tpu.memory_space<vmem>>, vector<31x128xf32>,
    %c31 = arith.constant 31 : index
    %c0_15 = arith.constant 0 : index
    %11 = vector.load %arg10[%c31, %c0_15] : memref<62x128xf32, #tpu.memory_space<vmem>>, vector<31x128xf32>
    %c34 = arith.constant 34 : index
    %c0_16 = arith.constant 0 : index
    %12 = vector.load %arg9[%c34, %c0_16] : memref<68x128xf32, #tpu.memory_space<vmem>>, vector<31x128xf32>
    %13 = arith.addf %11, %12 : vector<31x128xf32>
    %c31_17 = arith.constant 31 : index
    %c0_18 = arith.constant 0 : index
    %14 = vector.load %arg10[%c31_17, %c0_18] : memref<62x128xf32, #tpu.memory_space<vmem>>, vector<31x128xf32>
    tpu.vector_store %arg10[%c31_17, %c0_18], %13 {strides = array<i32>} : memref<62x128xf32, #tpu.memory_space<vmem>>, vector<31x128xf32>,
    %c0_19 = arith.constant 0 : index
    %c0_20 = arith.constant 0 : index
    %15 = vector.load %arg1[%c0_19, %c0_20] : memref<68x136xbf16, #tpu.memory_space<vmem>>, vector<68x136xbf16>
    %c1 = arith.constant 1 : index
    %c0_21 = arith.constant 0 : index
    %c0_22 = arith.constant 0 : index
    %16 = vector.load %arg2[%c1, %c0_21, %c0_22] : memref<4x136x128xbf16, #tpu.memory_space<vmem>>, vector<1x136x128xbf16>
    %17 = vector.shape_cast %16 : vector<1x136x128xbf16> to vector<136x128xbf16>
    %cst_23 = arith.constant dense<0.000000e+00> : vector<68x128xf32>
    %18 = tpu.matmul %15, %17, %cst_23 {dimension_numbers = #tpu.dot_dimension_numbers<[1], [0], [0], [1], [0, 0, 1, 1], [], []>} : vector<68x136xbf16>, vector<136x128xbf16>, vector<68x128xf32> -> vector<68x128xf32>
    %c0_24 = arith.constant 0 : index
    %c0_25 = arith.constant 0 : index
    %19 = vector.load %arg9[%c0_24, %c0_25] : memref<68x128xf32, #tpu.memory_space<vmem>>, vector<68x128xf32>
    tpu.vector_store %arg9[%c0_24, %c0_25], %18 {strides = array<i32>} : memref<68x128xf32, #tpu.memory_space<vmem>>, vector<68x128xf32>,
    %c0_26 = arith.constant 0 : index
    %c0_27 = arith.constant 0 : index
    %20 = vector.load %arg10[%c0_26, %c0_27] : memref<62x128xf32, #tpu.memory_space<vmem>>, vector<31x128xf32>
    %c1_28 = arith.constant 1 : index
    %c0_29 = arith.constant 0 : index
    %21 = vector.load %arg9[%c1_28, %c0_29] : memref<68x128xf32, #tpu.memory_space<vmem>>, vector<31x128xf32>
    %22 = arith.addf %20, %21 : vector<31x128xf32>
    %c0_30 = arith.constant 0 : index
    %c0_31 = arith.constant 0 : index
    %23 = vector.load %arg10[%c0_30, %c0_31] : memref<62x128xf32, #tpu.memory_space<vmem>>, vector<31x128xf32>
    tpu.vector_store %arg10[%c0_30, %c0_31], %22 {strides = array<i32>} : memref<62x128xf32, #tpu.memory_space<vmem>>, vector<31x128xf32>,
    %c31_32 = arith.constant 31 : index
    %c0_33 = arith.constant 0 : index
    %24 = vector.load %arg10[%c31_32, %c0_33] : memref<62x128xf32, #tpu.memory_space<vmem>>, vector<31x128xf32>
    %c35 = arith.constant 35 : index
    %c0_34 = arith.constant 0 : index
    %25 = vector.load %arg9[%c35, %c0_34] : memref<68x128xf32, #tpu.memory_space<vmem>>, vector<31x128xf32>
    %26 = arith.addf %24, %25 : vector<31x128xf32>
    %c31_35 = arith.constant 31 : index
    %c0_36 = arith.constant 0 : index
    %27 = vector.load %arg10[%c31_35, %c0_36] : memref<62x128xf32, #tpu.memory_space<vmem>>, vector<31x128xf32>
    tpu.vector_store %arg10[%c31_35, %c0_36], %26 {strides = array<i32>} : memref<62x128xf32, #tpu.memory_space<vmem>>, vector<31x128xf32>,
    %c0_37 = arith.constant 0 : index
    %c0_38 = arith.constant 0 : index
    %28 = vector.load %arg1[%c0_37, %c0_38] : memref<68x136xbf16, #tpu.memory_space<vmem>>, vector<68x136xbf16>
    %c2 = arith.constant 2 : index
    %c0_39 = arith.constant 0 : index
    %c0_40 = arith.constant 0 : index
    %29 = vector.load %arg2[%c2, %c0_39, %c0_40] : memref<4x136x128xbf16, #tpu.memory_space<vmem>>, vector<1x136x128xbf16>
    %30 = vector.shape_cast %29 : vector<1x136x128xbf16> to vector<136x128xbf16>
    %cst_41 = arith.constant dense<0.000000e+00> : vector<68x128xf32>
    %31 = tpu.matmul %28, %30, %cst_41 {dimension_numbers = #tpu.dot_dimension_numbers<[1], [0], [0], [1], [0, 0, 1, 1], [], []>} : vector<68x136xbf16>, vector<136x128xbf16>, vector<68x128xf32> -> vector<68x128xf32>
    %c0_42 = arith.constant 0 : index
    %c0_43 = arith.constant 0 : index
    %32 = vector.load %arg9[%c0_42, %c0_43] : memref<68x128xf32, #tpu.memory_space<vmem>>, vector<68x128xf32>
    tpu.vector_store %arg9[%c0_42, %c0_43], %31 {strides = array<i32>} : memref<68x128xf32, #tpu.memory_space<vmem>>, vector<68x128xf32>,
    %c0_44 = arith.constant 0 : index
    %c0_45 = arith.constant 0 : index
    %33 = vector.load %arg10[%c0_44, %c0_45] : memref<62x128xf32, #tpu.memory_space<vmem>>, vector<31x128xf32>
    %c2_46 = arith.constant 2 : index
    %c0_47 = arith.constant 0 : index
    %34 = vector.load %arg9[%c2_46, %c0_47] : memref<68x128xf32, #tpu.memory_space<vmem>>, vector<31x128xf32>
    %35 = arith.addf %33, %34 : vector<31x128xf32>
    %c0_48 = arith.constant 0 : index
    %c0_49 = arith.constant 0 : index
    %36 = vector.load %arg10[%c0_48, %c0_49] : memref<62x128xf32, #tpu.memory_space<vmem>>, vector<31x128xf32>
    tpu.vector_store %arg10[%c0_48, %c0_49], %35 {strides = array<i32>} : memref<62x128xf32, #tpu.memory_space<vmem>>, vector<31x128xf32>,
    %c31_50 = arith.constant 31 : index
    %c0_51 = arith.constant 0 : index
    %37 = vector.load %arg10[%c31_50, %c0_51] : memref<62x128xf32, #tpu.memory_space<vmem>>, vector<31x128xf32>
    %c36 = arith.constant 36 : index
    %c0_52 = arith.constant 0 : index
    %38 = vector.load %arg9[%c36, %c0_52] : memref<68x128xf32, #tpu.memory_space<vmem>>, vector<31x128xf32>
    %39 = arith.addf %37, %38 : vector<31x128xf32>
    %c31_53 = arith.constant 31 : index
    %c0_54 = arith.constant 0 : index
    %40 = vector.load %arg10[%c31_53, %c0_54] : memref<62x128xf32, #tpu.memory_space<vmem>>, vector<31x128xf32>
    tpu.vector_store %arg10[%c31_53, %c0_54], %39 {strides = array<i32>} : memref<62x128xf32, #tpu.memory_space<vmem>>, vector<31x128xf32>,
    %c0_55 = arith.constant 0 : index
    %c0_56 = arith.constant 0 : index
    %41 = vector.load %arg1[%c0_55, %c0_56] : memref<68x136xbf16, #tpu.memory_space<vmem>>, vector<68x136xbf16>
    %c3 = arith.constant 3 : index
    %c0_57 = arith.constant 0 : index
    %c0_58 = arith.constant 0 : index
    %42 = vector.load %arg2[%c3, %c0_57, %c0_58] : memref<4x136x128xbf16, #tpu.memory_space<vmem>>, vector<1x136x128xbf16>
    %43 = vector.shape_cast %42 : vector<1x136x128xbf16> to vector<136x128xbf16>
    %cst_59 = arith.constant dense<0.000000e+00> : vector<68x128xf32>
    %44 = tpu.matmul %41, %43, %cst_59 {dimension_numbers = #tpu.dot_dimension_numbers<[1], [0], [0], [1], [0, 0, 1, 1], [], []>} : vector<68x136xbf16>, vector<136x128xbf16>, vector<68x128xf32> -> vector<68x128xf32>
    %c0_60 = arith.constant 0 : index
    %c0_61 = arith.constant 0 : index
    %45 = vector.load %arg9[%c0_60, %c0_61] : memref<68x128xf32, #tpu.memory_space<vmem>>, vector<68x128xf32>
    tpu.vector_store %arg9[%c0_60, %c0_61], %44 {strides = array<i32>} : memref<68x128xf32, #tpu.memory_space<vmem>>, vector<68x128xf32>,
    %c0_62 = arith.constant 0 : index
    %c0_63 = arith.constant 0 : index
    %46 = vector.load %arg10[%c0_62, %c0_63] : memref<62x128xf32, #tpu.memory_space<vmem>>, vector<31x128xf32>
    %c3_64 = arith.constant 3 : index
    %c0_65 = arith.constant 0 : index
    %47 = vector.load %arg9[%c3_64, %c0_65] : memref<68x128xf32, #tpu.memory_space<vmem>>, vector<31x128xf32>
    %48 = arith.addf %46, %47 : vector<31x128xf32>
    %c0_66 = arith.constant 0 : index
    %c0_67 = arith.constant 0 : index
    %49 = vector.load %arg10[%c0_66, %c0_67] : memref<62x128xf32, #tpu.memory_space<vmem>>, vector<31x128xf32>
    tpu.vector_store %arg10[%c0_66, %c0_67], %48 {strides = array<i32>} : memref<62x128xf32, #tpu.memory_space<vmem>>, vector<31x128xf32>,
    %c31_68 = arith.constant 31 : index
    %c0_69 = arith.constant 0 : index
    %50 = vector.load %arg10[%c31_68, %c0_69] : memref<62x128xf32, #tpu.memory_space<vmem>>, vector<31x128xf32>
    %c37 = arith.constant 37 : index
    %c0_70 = arith.constant 0 : index
    %51 = vector.load %arg9[%c37, %c0_70] : memref<68x128xf32, #tpu.memory_space<vmem>>, vector<31x128xf32>
    %52 = arith.addf %50, %51 : vector<31x128xf32>
    %c31_71 = arith.constant 31 : index
    %c0_72 = arith.constant 0 : index
    %53 = vector.load %arg10[%c31_71, %c0_72] : memref<62x128xf32, #tpu.memory_space<vmem>>, vector<31x128xf32>
    tpu.vector_store %arg10[%c31_71, %c0_72], %52 {strides = array<i32>} : memref<62x128xf32, #tpu.memory_space<vmem>>, vector<31x128xf32>,
    %c0_73 = arith.constant 0 : index
    %c0_74 = arith.constant 0 : index
    %54 = vector.load %arg10[%c0_73, %c0_74] : memref<62x128xf32, #tpu.memory_space<vmem>>, vector<62x128xf32>
    %c0_75 = arith.constant 0 : index
    %c0_76 = arith.constant 0 : index
    %55 = vector.load %arg3[%c0_75, %c0_76] : memref<1x128xf32, #tpu.memory_space<vmem>>, vector<1x128xf32>
    %56 = vector.broadcast %55 : vector<1x128xf32> to vector<62x128xf32>
    %57 = arith.addf %54, %56 : vector<62x128xf32>
    %cst_77 = arith.constant 0.000000e+00 : f32
    %58 = vector.broadcast %cst_77 : f32 to vector<62x128xf32>
    %59 = arith.cmpf oge, %57, %58 : vector<62x128xf32>
    %cst_78 = arith.constant 2.000000e-01 : f32
    %60 = vector.broadcast %cst_78 : f32 to vector<62x128xf32>
    %61 = arith.mulf %60, %57 : vector<62x128xf32>
    %62 = arith.select %59, %57, %61 : vector<62x128xi1>, vector<62x128xf32>
    %63 = arith.truncf %62 : vector<62x128xf32> to vector<62x128xbf16>
    %c0_79 = arith.constant 0 : index
    %c0_80 = arith.constant 0 : index
    %64 = vector.load %arg8[%c0_79, %c0_80] : memref<62x128xbf16, #tpu.memory_space<vmem>>, vector<62x128xbf16>
    tpu.vector_store %arg8[%c0_79, %c0_80], %63 {strides = array<i32>} : memref<62x128xbf16, #tpu.memory_space<vmem>>, vector<62x128xbf16>,
    return
  }
  func.func @transform_0(%arg0: i32) -> (i32, i32) {
    %c0_i32 = arith.constant 0 : i32
    %c0_i32_0 = arith.constant 0 : i32
    %c0_i32_1 = arith.constant 0 : i32
    return %c0_i32, %c0_i32_0 : i32, i32
  }
  func.func @transform_1(%arg0: i32) -> (i32, i32, i32) {
    %c0_i32 = arith.constant 0 : i32
    %c0_i32_0 = arith.constant 0 : i32
    %c0_i32_1 = arith.constant 0 : i32
    %c0_i32_2 = arith.constant 0 : i32
    return %c0_i32, %c0_i32_0, %c0_i32_1 : i32, i32, i32
  }
  func.func @transform_2(%arg0: i32) -> (i32, i32) {
    %c0_i32 = arith.constant 0 : i32
    %c0_i32_0 = arith.constant 0 : i32
    %c0_i32_1 = arith.constant 0 : i32
    return %c0_i32, %c0_i32_0 : i32, i32
  }
  func.func @transform_3(%arg0: i32) -> (i32, i32) {
    %c0_i32 = arith.constant 0 : i32
    %c0_i32_0 = arith.constant 0 : i32
    %c0_i32_1 = arith.constant 0 : i32
    return %c0_i32, %c0_i32_0 : i32, i32
  }
  func.func @transform_4(%arg0: i32) -> (i32, i32) {
    %c0_i32 = arith.constant 0 : i32
    %c0_i32_0 = arith.constant 0 : i32
    %c0_i32_1 = arith.constant 0 : i32
    return %c0_i32, %c0_i32_0 : i32, i32
  }
  func.func @transform_5(%arg0: i32) -> (i32, i32) {
    %c0_i32 = arith.constant 0 : i32
    %c0_i32_0 = arith.constant 0 : i32
    %c0_i32_1 = arith.constant 0 : i32
    return %c0_i32, %c0_i32_0 : i32, i32
  }
  func.func @transform_6(%arg0: i32) -> (i32, i32) {
    %c0_i32 = arith.constant 0 : i32
    %c0_i32_0 = arith.constant 0 : i32
    %c0_i32_1 = arith.constant 0 : i32
    return %c0_i32, %c0_i32_0 : i32, i32
  }
  func.func @transform_7(%arg0: i32) -> (i32, i32) {
    %c0_i32 = arith.constant 0 : i32
    %c0_i32_0 = arith.constant 0 : i32
    %c0_i32_1 = arith.constant 0 : i32
    return %c0_i32, %c0_i32_0 : i32, i32
  }
}

module attributes {stable_mosaic.version = 11 : i64} {
  func.func @_conv_bn_lrelu_kernel(%arg0: i32, %arg1: memref<36x144xbf16, #tpu.memory_space<vmem>>, %arg2: memref<4x144x128xbf16, #tpu.memory_space<vmem>>, %arg3: memref<1x128xf32, #tpu.memory_space<vmem>>, %arg4: memref<128x128xf32, #tpu.memory_space<vmem>>, %arg5: memref<1x128xf32, #tpu.memory_space<vmem>>, %arg6: memref<1x128xf32, #tpu.memory_space<vmem>>, %arg7: memref<30x1xf32, #tpu.memory_space<vmem>>, %arg8: memref<30x128xbf16, #tpu.memory_space<vmem>>, %arg9: memref<36x128xf32, #tpu.memory_space<vmem>>, %arg10: memref<30x128xf32, #tpu.memory_space<vmem>>) attributes {dimension_semantics = [#tpu.dimension_semantics<arbitrary>], iteration_bounds = array<i64: 1>, scalar_prefetch = 0 : i64, scratch_operands = 2 : i64, tpu.core_type = #tpu.core_type<tc>, window_params = [{pipeline_mode = #tpu.pipeline_mode<synchronous>, transform_indices = @transform_0, window_bounds = array<i64: 36, 144>}, {pipeline_mode = #tpu.pipeline_mode<synchronous>, transform_indices = @transform_1, window_bounds = array<i64: 4, 144, 128>}, {pipeline_mode = #tpu.pipeline_mode<synchronous>, transform_indices = @transform_2, window_bounds = array<i64: 1, 128>}, {pipeline_mode = #tpu.pipeline_mode<synchronous>, transform_indices = @transform_3, window_bounds = array<i64: 128, 128>}, {pipeline_mode = #tpu.pipeline_mode<synchronous>, transform_indices = @transform_4, window_bounds = array<i64: 1, 128>}, {pipeline_mode = #tpu.pipeline_mode<synchronous>, transform_indices = @transform_5, window_bounds = array<i64: 1, 128>}, {pipeline_mode = #tpu.pipeline_mode<synchronous>, transform_indices = @transform_6, window_bounds = array<i64: 30, 1>}, {pipeline_mode = #tpu.pipeline_mode<synchronous>, transform_indices = @transform_7, window_bounds = array<i64: 30, 128>}]} {
    %cst = arith.constant 0.000000e+00 : f32
    %0 = vector.broadcast %cst : f32 to vector<30x128xf32>
    %c0 = arith.constant 0 : index
    %c0_0 = arith.constant 0 : index
    %1 = vector.load %arg10[%c0, %c0_0] : memref<30x128xf32, #tpu.memory_space<vmem>>, vector<30x128xf32>
    tpu.vector_store %arg10[%c0, %c0_0], %0 {strides = array<i32>} : memref<30x128xf32, #tpu.memory_space<vmem>>, vector<30x128xf32>,
    %c0_1 = arith.constant 0 : index
    %c0_2 = arith.constant 0 : index
    %2 = vector.load %arg1[%c0_1, %c0_2] : memref<36x144xbf16, #tpu.memory_space<vmem>>, vector<36x144xbf16>
    %c0_3 = arith.constant 0 : index
    %c0_4 = arith.constant 0 : index
    %c0_5 = arith.constant 0 : index
    %3 = vector.load %arg2[%c0_3, %c0_4, %c0_5] : memref<4x144x128xbf16, #tpu.memory_space<vmem>>, vector<1x144x128xbf16>
    %4 = vector.shape_cast %3 : vector<1x144x128xbf16> to vector<144x128xbf16>
    %cst_6 = arith.constant dense<0.000000e+00> : vector<36x128xf32>
    %5 = tpu.matmul %2, %4, %cst_6 {dimension_numbers = #tpu.dot_dimension_numbers<[1], [0], [0], [1], [0, 0, 1, 1], [], []>} : vector<36x144xbf16>, vector<144x128xbf16>, vector<36x128xf32> -> vector<36x128xf32>
    %c0_7 = arith.constant 0 : index
    %c0_8 = arith.constant 0 : index
    %6 = vector.load %arg9[%c0_7, %c0_8] : memref<36x128xf32, #tpu.memory_space<vmem>>, vector<36x128xf32>
    tpu.vector_store %arg9[%c0_7, %c0_8], %5 {strides = array<i32>} : memref<36x128xf32, #tpu.memory_space<vmem>>, vector<36x128xf32>,
    %c0_9 = arith.constant 0 : index
    %c0_10 = arith.constant 0 : index
    %7 = vector.load %arg10[%c0_9, %c0_10] : memref<30x128xf32, #tpu.memory_space<vmem>>, vector<15x128xf32>
    %c0_11 = arith.constant 0 : index
    %c0_12 = arith.constant 0 : index
    %8 = vector.load %arg9[%c0_11, %c0_12] : memref<36x128xf32, #tpu.memory_space<vmem>>, vector<15x128xf32>
    %9 = arith.addf %7, %8 : vector<15x128xf32>
    %c0_13 = arith.constant 0 : index
    %c0_14 = arith.constant 0 : index
    %10 = vector.load %arg10[%c0_13, %c0_14] : memref<30x128xf32, #tpu.memory_space<vmem>>, vector<15x128xf32>
    tpu.vector_store %arg10[%c0_13, %c0_14], %9 {strides = array<i32>} : memref<30x128xf32, #tpu.memory_space<vmem>>, vector<15x128xf32>,
    %c15 = arith.constant 15 : index
    %c0_15 = arith.constant 0 : index
    %11 = vector.load %arg10[%c15, %c0_15] : memref<30x128xf32, #tpu.memory_space<vmem>>, vector<15x128xf32>
    %c18 = arith.constant 18 : index
    %c0_16 = arith.constant 0 : index
    %12 = vector.load %arg9[%c18, %c0_16] : memref<36x128xf32, #tpu.memory_space<vmem>>, vector<15x128xf32>
    %13 = arith.addf %11, %12 : vector<15x128xf32>
    %c15_17 = arith.constant 15 : index
    %c0_18 = arith.constant 0 : index
    %14 = vector.load %arg10[%c15_17, %c0_18] : memref<30x128xf32, #tpu.memory_space<vmem>>, vector<15x128xf32>
    tpu.vector_store %arg10[%c15_17, %c0_18], %13 {strides = array<i32>} : memref<30x128xf32, #tpu.memory_space<vmem>>, vector<15x128xf32>,
    %c0_19 = arith.constant 0 : index
    %c0_20 = arith.constant 0 : index
    %15 = vector.load %arg1[%c0_19, %c0_20] : memref<36x144xbf16, #tpu.memory_space<vmem>>, vector<36x144xbf16>
    %c1 = arith.constant 1 : index
    %c0_21 = arith.constant 0 : index
    %c0_22 = arith.constant 0 : index
    %16 = vector.load %arg2[%c1, %c0_21, %c0_22] : memref<4x144x128xbf16, #tpu.memory_space<vmem>>, vector<1x144x128xbf16>
    %17 = vector.shape_cast %16 : vector<1x144x128xbf16> to vector<144x128xbf16>
    %cst_23 = arith.constant dense<0.000000e+00> : vector<36x128xf32>
    %18 = tpu.matmul %15, %17, %cst_23 {dimension_numbers = #tpu.dot_dimension_numbers<[1], [0], [0], [1], [0, 0, 1, 1], [], []>} : vector<36x144xbf16>, vector<144x128xbf16>, vector<36x128xf32> -> vector<36x128xf32>
    %c0_24 = arith.constant 0 : index
    %c0_25 = arith.constant 0 : index
    %19 = vector.load %arg9[%c0_24, %c0_25] : memref<36x128xf32, #tpu.memory_space<vmem>>, vector<36x128xf32>
    tpu.vector_store %arg9[%c0_24, %c0_25], %18 {strides = array<i32>} : memref<36x128xf32, #tpu.memory_space<vmem>>, vector<36x128xf32>,
    %c0_26 = arith.constant 0 : index
    %c0_27 = arith.constant 0 : index
    %20 = vector.load %arg10[%c0_26, %c0_27] : memref<30x128xf32, #tpu.memory_space<vmem>>, vector<15x128xf32>
    %c1_28 = arith.constant 1 : index
    %c0_29 = arith.constant 0 : index
    %21 = vector.load %arg9[%c1_28, %c0_29] : memref<36x128xf32, #tpu.memory_space<vmem>>, vector<15x128xf32>
    %22 = arith.addf %20, %21 : vector<15x128xf32>
    %c0_30 = arith.constant 0 : index
    %c0_31 = arith.constant 0 : index
    %23 = vector.load %arg10[%c0_30, %c0_31] : memref<30x128xf32, #tpu.memory_space<vmem>>, vector<15x128xf32>
    tpu.vector_store %arg10[%c0_30, %c0_31], %22 {strides = array<i32>} : memref<30x128xf32, #tpu.memory_space<vmem>>, vector<15x128xf32>,
    %c15_32 = arith.constant 15 : index
    %c0_33 = arith.constant 0 : index
    %24 = vector.load %arg10[%c15_32, %c0_33] : memref<30x128xf32, #tpu.memory_space<vmem>>, vector<15x128xf32>
    %c19 = arith.constant 19 : index
    %c0_34 = arith.constant 0 : index
    %25 = vector.load %arg9[%c19, %c0_34] : memref<36x128xf32, #tpu.memory_space<vmem>>, vector<15x128xf32>
    %26 = arith.addf %24, %25 : vector<15x128xf32>
    %c15_35 = arith.constant 15 : index
    %c0_36 = arith.constant 0 : index
    %27 = vector.load %arg10[%c15_35, %c0_36] : memref<30x128xf32, #tpu.memory_space<vmem>>, vector<15x128xf32>
    tpu.vector_store %arg10[%c15_35, %c0_36], %26 {strides = array<i32>} : memref<30x128xf32, #tpu.memory_space<vmem>>, vector<15x128xf32>,
    %c0_37 = arith.constant 0 : index
    %c0_38 = arith.constant 0 : index
    %28 = vector.load %arg1[%c0_37, %c0_38] : memref<36x144xbf16, #tpu.memory_space<vmem>>, vector<36x144xbf16>
    %c2 = arith.constant 2 : index
    %c0_39 = arith.constant 0 : index
    %c0_40 = arith.constant 0 : index
    %29 = vector.load %arg2[%c2, %c0_39, %c0_40] : memref<4x144x128xbf16, #tpu.memory_space<vmem>>, vector<1x144x128xbf16>
    %30 = vector.shape_cast %29 : vector<1x144x128xbf16> to vector<144x128xbf16>
    %cst_41 = arith.constant dense<0.000000e+00> : vector<36x128xf32>
    %31 = tpu.matmul %28, %30, %cst_41 {dimension_numbers = #tpu.dot_dimension_numbers<[1], [0], [0], [1], [0, 0, 1, 1], [], []>} : vector<36x144xbf16>, vector<144x128xbf16>, vector<36x128xf32> -> vector<36x128xf32>
    %c0_42 = arith.constant 0 : index
    %c0_43 = arith.constant 0 : index
    %32 = vector.load %arg9[%c0_42, %c0_43] : memref<36x128xf32, #tpu.memory_space<vmem>>, vector<36x128xf32>
    tpu.vector_store %arg9[%c0_42, %c0_43], %31 {strides = array<i32>} : memref<36x128xf32, #tpu.memory_space<vmem>>, vector<36x128xf32>,
    %c0_44 = arith.constant 0 : index
    %c0_45 = arith.constant 0 : index
    %33 = vector.load %arg10[%c0_44, %c0_45] : memref<30x128xf32, #tpu.memory_space<vmem>>, vector<15x128xf32>
    %c2_46 = arith.constant 2 : index
    %c0_47 = arith.constant 0 : index
    %34 = vector.load %arg9[%c2_46, %c0_47] : memref<36x128xf32, #tpu.memory_space<vmem>>, vector<15x128xf32>
    %35 = arith.addf %33, %34 : vector<15x128xf32>
    %c0_48 = arith.constant 0 : index
    %c0_49 = arith.constant 0 : index
    %36 = vector.load %arg10[%c0_48, %c0_49] : memref<30x128xf32, #tpu.memory_space<vmem>>, vector<15x128xf32>
    tpu.vector_store %arg10[%c0_48, %c0_49], %35 {strides = array<i32>} : memref<30x128xf32, #tpu.memory_space<vmem>>, vector<15x128xf32>,
    %c15_50 = arith.constant 15 : index
    %c0_51 = arith.constant 0 : index
    %37 = vector.load %arg10[%c15_50, %c0_51] : memref<30x128xf32, #tpu.memory_space<vmem>>, vector<15x128xf32>
    %c20 = arith.constant 20 : index
    %c0_52 = arith.constant 0 : index
    %38 = vector.load %arg9[%c20, %c0_52] : memref<36x128xf32, #tpu.memory_space<vmem>>, vector<15x128xf32>
    %39 = arith.addf %37, %38 : vector<15x128xf32>
    %c15_53 = arith.constant 15 : index
    %c0_54 = arith.constant 0 : index
    %40 = vector.load %arg10[%c15_53, %c0_54] : memref<30x128xf32, #tpu.memory_space<vmem>>, vector<15x128xf32>
    tpu.vector_store %arg10[%c15_53, %c0_54], %39 {strides = array<i32>} : memref<30x128xf32, #tpu.memory_space<vmem>>, vector<15x128xf32>,
    %c0_55 = arith.constant 0 : index
    %c0_56 = arith.constant 0 : index
    %41 = vector.load %arg1[%c0_55, %c0_56] : memref<36x144xbf16, #tpu.memory_space<vmem>>, vector<36x144xbf16>
    %c3 = arith.constant 3 : index
    %c0_57 = arith.constant 0 : index
    %c0_58 = arith.constant 0 : index
    %42 = vector.load %arg2[%c3, %c0_57, %c0_58] : memref<4x144x128xbf16, #tpu.memory_space<vmem>>, vector<1x144x128xbf16>
    %43 = vector.shape_cast %42 : vector<1x144x128xbf16> to vector<144x128xbf16>
    %cst_59 = arith.constant dense<0.000000e+00> : vector<36x128xf32>
    %44 = tpu.matmul %41, %43, %cst_59 {dimension_numbers = #tpu.dot_dimension_numbers<[1], [0], [0], [1], [0, 0, 1, 1], [], []>} : vector<36x144xbf16>, vector<144x128xbf16>, vector<36x128xf32> -> vector<36x128xf32>
    %c0_60 = arith.constant 0 : index
    %c0_61 = arith.constant 0 : index
    %45 = vector.load %arg9[%c0_60, %c0_61] : memref<36x128xf32, #tpu.memory_space<vmem>>, vector<36x128xf32>
    tpu.vector_store %arg9[%c0_60, %c0_61], %44 {strides = array<i32>} : memref<36x128xf32, #tpu.memory_space<vmem>>, vector<36x128xf32>,
    %c0_62 = arith.constant 0 : index
    %c0_63 = arith.constant 0 : index
    %46 = vector.load %arg10[%c0_62, %c0_63] : memref<30x128xf32, #tpu.memory_space<vmem>>, vector<15x128xf32>
    %c3_64 = arith.constant 3 : index
    %c0_65 = arith.constant 0 : index
    %47 = vector.load %arg9[%c3_64, %c0_65] : memref<36x128xf32, #tpu.memory_space<vmem>>, vector<15x128xf32>
    %48 = arith.addf %46, %47 : vector<15x128xf32>
    %c0_66 = arith.constant 0 : index
    %c0_67 = arith.constant 0 : index
    %49 = vector.load %arg10[%c0_66, %c0_67] : memref<30x128xf32, #tpu.memory_space<vmem>>, vector<15x128xf32>
    tpu.vector_store %arg10[%c0_66, %c0_67], %48 {strides = array<i32>} : memref<30x128xf32, #tpu.memory_space<vmem>>, vector<15x128xf32>,
    %c15_68 = arith.constant 15 : index
    %c0_69 = arith.constant 0 : index
    %50 = vector.load %arg10[%c15_68, %c0_69] : memref<30x128xf32, #tpu.memory_space<vmem>>, vector<15x128xf32>
    %c21 = arith.constant 21 : index
    %c0_70 = arith.constant 0 : index
    %51 = vector.load %arg9[%c21, %c0_70] : memref<36x128xf32, #tpu.memory_space<vmem>>, vector<15x128xf32>
    %52 = arith.addf %50, %51 : vector<15x128xf32>
    %c15_71 = arith.constant 15 : index
    %c0_72 = arith.constant 0 : index
    %53 = vector.load %arg10[%c15_71, %c0_72] : memref<30x128xf32, #tpu.memory_space<vmem>>, vector<15x128xf32>
    tpu.vector_store %arg10[%c15_71, %c0_72], %52 {strides = array<i32>} : memref<30x128xf32, #tpu.memory_space<vmem>>, vector<15x128xf32>,
    %c0_73 = arith.constant 0 : index
    %c0_74 = arith.constant 0 : index
    %54 = vector.load %arg10[%c0_73, %c0_74] : memref<30x128xf32, #tpu.memory_space<vmem>>, vector<30x128xf32>
    %c0_75 = arith.constant 0 : index
    %c0_76 = arith.constant 0 : index
    %55 = vector.load %arg3[%c0_75, %c0_76] : memref<1x128xf32, #tpu.memory_space<vmem>>, vector<1x128xf32>
    %56 = vector.broadcast %55 : vector<1x128xf32> to vector<30x128xf32>
    %57 = arith.addf %54, %56 : vector<30x128xf32>
    %c0_77 = arith.constant 0 : index
    %c0_78 = arith.constant 0 : index
    %58 = vector.load %arg7[%c0_77, %c0_78] : memref<30x1xf32, #tpu.memory_space<vmem>>, vector<30x1xf32>
    %59 = vector.broadcast %58 : vector<30x1xf32> to vector<30x128xf32>
    %60 = arith.mulf %57, %59 : vector<30x128xf32>
    %c0_79 = arith.constant 0 : index
    %c0_80 = arith.constant 0 : index
    %61 = vector.load %arg4[%c0_79, %c0_80] : memref<128x128xf32, #tpu.memory_space<vmem>>, vector<128x128xf32>
    %cst_81 = arith.constant dense<0.000000e+00> : vector<30x128xf32>
    %62 = tpu.matmul %60, %61, %cst_81 {dimension_numbers = #tpu.dot_dimension_numbers<[1], [0], [0], [1], [0, 0, 1, 1], [], []>} : vector<30x128xf32>, vector<128x128xf32>, vector<30x128xf32> -> vector<30x128xf32>
    %63 = arith.mulf %60, %60 : vector<30x128xf32>
    %c0_82 = arith.constant 0 : index
    %c0_83 = arith.constant 0 : index
    %64 = vector.load %arg4[%c0_82, %c0_83] : memref<128x128xf32, #tpu.memory_space<vmem>>, vector<128x128xf32>
    %cst_84 = arith.constant dense<0.000000e+00> : vector<30x128xf32>
    %65 = tpu.matmul %63, %64, %cst_84 {dimension_numbers = #tpu.dot_dimension_numbers<[1], [0], [0], [1], [0, 0, 1, 1], [], []>} : vector<30x128xf32>, vector<128x128xf32>, vector<30x128xf32> -> vector<30x128xf32>
    %cst_85 = arith.constant dense<0.000000e+00> : vector<128xf32>
    %66 = vector.multi_reduction <add>, %62, %cst_85 [0] : vector<30x128xf32> to vector<128xf32>
    %67 = vector.shape_cast %66 : vector<128xf32> to vector<1x128xf32>
    %cst_86 = arith.constant 7.812500e-03 : f32
    %68 = vector.broadcast %cst_86 : f32 to vector<1x128xf32>
    %69 = arith.mulf %67, %68 : vector<1x128xf32>
    %cst_87 = arith.constant dense<0.000000e+00> : vector<128xf32>
    %70 = vector.multi_reduction <add>, %65, %cst_87 [0] : vector<30x128xf32> to vector<128xf32>
    %71 = vector.shape_cast %70 : vector<128xf32> to vector<1x128xf32>
    %cst_88 = arith.constant 7.812500e-03 : f32
    %72 = vector.broadcast %cst_88 : f32 to vector<1x128xf32>
    %73 = arith.mulf %71, %72 : vector<1x128xf32>
    %74 = arith.mulf %69, %69 : vector<1x128xf32>
    %75 = arith.subf %73, %74 : vector<1x128xf32>
    %cst_89 = arith.constant 0.000000e+00 : f32
    %76 = vector.broadcast %cst_89 : f32 to vector<1x128xf32>
    %77 = arith.maximumf %75, %76 : vector<1x128xf32>
    %c0_90 = arith.constant 0 : index
    %c0_91 = arith.constant 0 : index
    %78 = vector.load %arg5[%c0_90, %c0_91] : memref<1x128xf32, #tpu.memory_space<vmem>>, vector<1x128xf32>
    %cst_92 = arith.constant 9.99999974E-6 : f32
    %79 = vector.broadcast %cst_92 : f32 to vector<1x128xf32>
    %80 = arith.addf %77, %79 : vector<1x128xf32>
    %81 = math.rsqrt %80 : vector<1x128xf32>
    %82 = arith.mulf %78, %81 : vector<1x128xf32>
    %c0_93 = arith.constant 0 : index
    %c0_94 = arith.constant 0 : index
    %83 = vector.load %arg6[%c0_93, %c0_94] : memref<1x128xf32, #tpu.memory_space<vmem>>, vector<1x128xf32>
    %84 = arith.mulf %69, %82 : vector<1x128xf32>
    %85 = arith.subf %83, %84 : vector<1x128xf32>
    %86 = vector.broadcast %82 : vector<1x128xf32> to vector<30x128xf32>
    %87 = arith.mulf %57, %86 : vector<30x128xf32>
    %88 = vector.broadcast %85 : vector<1x128xf32> to vector<30x128xf32>
    %89 = arith.addf %87, %88 : vector<30x128xf32>
    %cst_95 = arith.constant 0.000000e+00 : f32
    %90 = vector.broadcast %cst_95 : f32 to vector<30x128xf32>
    %91 = arith.cmpf oge, %89, %90 : vector<30x128xf32>
    %cst_96 = arith.constant 2.000000e-01 : f32
    %92 = vector.broadcast %cst_96 : f32 to vector<30x128xf32>
    %93 = arith.mulf %92, %89 : vector<30x128xf32>
    %94 = arith.select %91, %89, %93 : vector<30x128xi1>, vector<30x128xf32>
    %95 = arith.truncf %94 : vector<30x128xf32> to vector<30x128xbf16>
    %c0_97 = arith.constant 0 : index
    %c0_98 = arith.constant 0 : index
    %96 = vector.load %arg8[%c0_97, %c0_98] : memref<30x128xbf16, #tpu.memory_space<vmem>>, vector<30x128xbf16>
    tpu.vector_store %arg8[%c0_97, %c0_98], %95 {strides = array<i32>} : memref<30x128xbf16, #tpu.memory_space<vmem>>, vector<30x128xbf16>,
    return
  }
  func.func @transform_0(%arg0: i32) -> (i32, i32) {
    %c0_i32 = arith.constant 0 : i32
    %c0_i32_0 = arith.constant 0 : i32
    %c0_i32_1 = arith.constant 0 : i32
    return %c0_i32, %c0_i32_0 : i32, i32
  }
  func.func @transform_1(%arg0: i32) -> (i32, i32, i32) {
    %c0_i32 = arith.constant 0 : i32
    %c0_i32_0 = arith.constant 0 : i32
    %c0_i32_1 = arith.constant 0 : i32
    %c0_i32_2 = arith.constant 0 : i32
    return %c0_i32, %c0_i32_0, %c0_i32_1 : i32, i32, i32
  }
  func.func @transform_2(%arg0: i32) -> (i32, i32) {
    %c0_i32 = arith.constant 0 : i32
    %c0_i32_0 = arith.constant 0 : i32
    %c0_i32_1 = arith.constant 0 : i32
    return %c0_i32, %c0_i32_0 : i32, i32
  }
  func.func @transform_3(%arg0: i32) -> (i32, i32) {
    %c0_i32 = arith.constant 0 : i32
    %c0_i32_0 = arith.constant 0 : i32
    %c0_i32_1 = arith.constant 0 : i32
    return %c0_i32, %c0_i32_0 : i32, i32
  }
  func.func @transform_4(%arg0: i32) -> (i32, i32) {
    %c0_i32 = arith.constant 0 : i32
    %c0_i32_0 = arith.constant 0 : i32
    %c0_i32_1 = arith.constant 0 : i32
    return %c0_i32, %c0_i32_0 : i32, i32
  }
  func.func @transform_5(%arg0: i32) -> (i32, i32) {
    %c0_i32 = arith.constant 0 : i32
    %c0_i32_0 = arith.constant 0 : i32
    %c0_i32_1 = arith.constant 0 : i32
    return %c0_i32, %c0_i32_0 : i32, i32
  }
  func.func @transform_6(%arg0: i32) -> (i32, i32) {
    %c0_i32 = arith.constant 0 : i32
    %c0_i32_0 = arith.constant 0 : i32
    %c0_i32_1 = arith.constant 0 : i32
    return %c0_i32, %c0_i32_0 : i32, i32
  }
  func.func @transform_7(%arg0: i32) -> (i32, i32) {
    %c0_i32 = arith.constant 0 : i32
    %c0_i32_0 = arith.constant 0 : i32
    %c0_i32_1 = arith.constant 0 : i32
    return %c0_i32, %c0_i32_0 : i32, i32
  }
}

module attributes {stable_mosaic.version = 11 : i64} {
  func.func @_conv_bn_lrelu_kernel(%arg0: i32, %arg1: memref<20x160xbf16, #tpu.memory_space<vmem>>, %arg2: memref<4x160x128xbf16, #tpu.memory_space<vmem>>, %arg3: memref<1x128xf32, #tpu.memory_space<vmem>>, %arg4: memref<128x128xf32, #tpu.memory_space<vmem>>, %arg5: memref<1x128xf32, #tpu.memory_space<vmem>>, %arg6: memref<1x128xf32, #tpu.memory_space<vmem>>, %arg7: memref<14x1xf32, #tpu.memory_space<vmem>>, %arg8: memref<14x128xbf16, #tpu.memory_space<vmem>>, %arg9: memref<20x128xf32, #tpu.memory_space<vmem>>, %arg10: memref<14x128xf32, #tpu.memory_space<vmem>>) attributes {dimension_semantics = [#tpu.dimension_semantics<arbitrary>], iteration_bounds = array<i64: 1>, scalar_prefetch = 0 : i64, scratch_operands = 2 : i64, tpu.core_type = #tpu.core_type<tc>, window_params = [{pipeline_mode = #tpu.pipeline_mode<synchronous>, transform_indices = @transform_0, window_bounds = array<i64: 20, 160>}, {pipeline_mode = #tpu.pipeline_mode<synchronous>, transform_indices = @transform_1, window_bounds = array<i64: 4, 160, 128>}, {pipeline_mode = #tpu.pipeline_mode<synchronous>, transform_indices = @transform_2, window_bounds = array<i64: 1, 128>}, {pipeline_mode = #tpu.pipeline_mode<synchronous>, transform_indices = @transform_3, window_bounds = array<i64: 128, 128>}, {pipeline_mode = #tpu.pipeline_mode<synchronous>, transform_indices = @transform_4, window_bounds = array<i64: 1, 128>}, {pipeline_mode = #tpu.pipeline_mode<synchronous>, transform_indices = @transform_5, window_bounds = array<i64: 1, 128>}, {pipeline_mode = #tpu.pipeline_mode<synchronous>, transform_indices = @transform_6, window_bounds = array<i64: 14, 1>}, {pipeline_mode = #tpu.pipeline_mode<synchronous>, transform_indices = @transform_7, window_bounds = array<i64: 14, 128>}]} {
    %cst = arith.constant 0.000000e+00 : f32
    %0 = vector.broadcast %cst : f32 to vector<14x128xf32>
    %c0 = arith.constant 0 : index
    %c0_0 = arith.constant 0 : index
    %1 = vector.load %arg10[%c0, %c0_0] : memref<14x128xf32, #tpu.memory_space<vmem>>, vector<14x128xf32>
    tpu.vector_store %arg10[%c0, %c0_0], %0 {strides = array<i32>} : memref<14x128xf32, #tpu.memory_space<vmem>>, vector<14x128xf32>,
    %c0_1 = arith.constant 0 : index
    %c0_2 = arith.constant 0 : index
    %2 = vector.load %arg1[%c0_1, %c0_2] : memref<20x160xbf16, #tpu.memory_space<vmem>>, vector<20x160xbf16>
    %c0_3 = arith.constant 0 : index
    %c0_4 = arith.constant 0 : index
    %c0_5 = arith.constant 0 : index
    %3 = vector.load %arg2[%c0_3, %c0_4, %c0_5] : memref<4x160x128xbf16, #tpu.memory_space<vmem>>, vector<1x160x128xbf16>
    %4 = vector.shape_cast %3 : vector<1x160x128xbf16> to vector<160x128xbf16>
    %cst_6 = arith.constant dense<0.000000e+00> : vector<20x128xf32>
    %5 = tpu.matmul %2, %4, %cst_6 {dimension_numbers = #tpu.dot_dimension_numbers<[1], [0], [0], [1], [0, 0, 1, 1], [], []>} : vector<20x160xbf16>, vector<160x128xbf16>, vector<20x128xf32> -> vector<20x128xf32>
    %c0_7 = arith.constant 0 : index
    %c0_8 = arith.constant 0 : index
    %6 = vector.load %arg9[%c0_7, %c0_8] : memref<20x128xf32, #tpu.memory_space<vmem>>, vector<20x128xf32>
    tpu.vector_store %arg9[%c0_7, %c0_8], %5 {strides = array<i32>} : memref<20x128xf32, #tpu.memory_space<vmem>>, vector<20x128xf32>,
    %c0_9 = arith.constant 0 : index
    %c0_10 = arith.constant 0 : index
    %7 = vector.load %arg10[%c0_9, %c0_10] : memref<14x128xf32, #tpu.memory_space<vmem>>, vector<7x128xf32>
    %c0_11 = arith.constant 0 : index
    %c0_12 = arith.constant 0 : index
    %8 = vector.load %arg9[%c0_11, %c0_12] : memref<20x128xf32, #tpu.memory_space<vmem>>, vector<7x128xf32>
    %9 = arith.addf %7, %8 : vector<7x128xf32>
    %c0_13 = arith.constant 0 : index
    %c0_14 = arith.constant 0 : index
    %10 = vector.load %arg10[%c0_13, %c0_14] : memref<14x128xf32, #tpu.memory_space<vmem>>, vector<7x128xf32>
    tpu.vector_store %arg10[%c0_13, %c0_14], %9 {strides = array<i32>} : memref<14x128xf32, #tpu.memory_space<vmem>>, vector<7x128xf32>,
    %c7 = arith.constant 7 : index
    %c0_15 = arith.constant 0 : index
    %11 = vector.load %arg10[%c7, %c0_15] : memref<14x128xf32, #tpu.memory_space<vmem>>, vector<7x128xf32>
    %c10 = arith.constant 10 : index
    %c0_16 = arith.constant 0 : index
    %12 = vector.load %arg9[%c10, %c0_16] : memref<20x128xf32, #tpu.memory_space<vmem>>, vector<7x128xf32>
    %13 = arith.addf %11, %12 : vector<7x128xf32>
    %c7_17 = arith.constant 7 : index
    %c0_18 = arith.constant 0 : index
    %14 = vector.load %arg10[%c7_17, %c0_18] : memref<14x128xf32, #tpu.memory_space<vmem>>, vector<7x128xf32>
    tpu.vector_store %arg10[%c7_17, %c0_18], %13 {strides = array<i32>} : memref<14x128xf32, #tpu.memory_space<vmem>>, vector<7x128xf32>,
    %c0_19 = arith.constant 0 : index
    %c0_20 = arith.constant 0 : index
    %15 = vector.load %arg1[%c0_19, %c0_20] : memref<20x160xbf16, #tpu.memory_space<vmem>>, vector<20x160xbf16>
    %c1 = arith.constant 1 : index
    %c0_21 = arith.constant 0 : index
    %c0_22 = arith.constant 0 : index
    %16 = vector.load %arg2[%c1, %c0_21, %c0_22] : memref<4x160x128xbf16, #tpu.memory_space<vmem>>, vector<1x160x128xbf16>
    %17 = vector.shape_cast %16 : vector<1x160x128xbf16> to vector<160x128xbf16>
    %cst_23 = arith.constant dense<0.000000e+00> : vector<20x128xf32>
    %18 = tpu.matmul %15, %17, %cst_23 {dimension_numbers = #tpu.dot_dimension_numbers<[1], [0], [0], [1], [0, 0, 1, 1], [], []>} : vector<20x160xbf16>, vector<160x128xbf16>, vector<20x128xf32> -> vector<20x128xf32>
    %c0_24 = arith.constant 0 : index
    %c0_25 = arith.constant 0 : index
    %19 = vector.load %arg9[%c0_24, %c0_25] : memref<20x128xf32, #tpu.memory_space<vmem>>, vector<20x128xf32>
    tpu.vector_store %arg9[%c0_24, %c0_25], %18 {strides = array<i32>} : memref<20x128xf32, #tpu.memory_space<vmem>>, vector<20x128xf32>,
    %c0_26 = arith.constant 0 : index
    %c0_27 = arith.constant 0 : index
    %20 = vector.load %arg10[%c0_26, %c0_27] : memref<14x128xf32, #tpu.memory_space<vmem>>, vector<7x128xf32>
    %c1_28 = arith.constant 1 : index
    %c0_29 = arith.constant 0 : index
    %21 = vector.load %arg9[%c1_28, %c0_29] : memref<20x128xf32, #tpu.memory_space<vmem>>, vector<7x128xf32>
    %22 = arith.addf %20, %21 : vector<7x128xf32>
    %c0_30 = arith.constant 0 : index
    %c0_31 = arith.constant 0 : index
    %23 = vector.load %arg10[%c0_30, %c0_31] : memref<14x128xf32, #tpu.memory_space<vmem>>, vector<7x128xf32>
    tpu.vector_store %arg10[%c0_30, %c0_31], %22 {strides = array<i32>} : memref<14x128xf32, #tpu.memory_space<vmem>>, vector<7x128xf32>,
    %c7_32 = arith.constant 7 : index
    %c0_33 = arith.constant 0 : index
    %24 = vector.load %arg10[%c7_32, %c0_33] : memref<14x128xf32, #tpu.memory_space<vmem>>, vector<7x128xf32>
    %c11 = arith.constant 11 : index
    %c0_34 = arith.constant 0 : index
    %25 = vector.load %arg9[%c11, %c0_34] : memref<20x128xf32, #tpu.memory_space<vmem>>, vector<7x128xf32>
    %26 = arith.addf %24, %25 : vector<7x128xf32>
    %c7_35 = arith.constant 7 : index
    %c0_36 = arith.constant 0 : index
    %27 = vector.load %arg10[%c7_35, %c0_36] : memref<14x128xf32, #tpu.memory_space<vmem>>, vector<7x128xf32>
    tpu.vector_store %arg10[%c7_35, %c0_36], %26 {strides = array<i32>} : memref<14x128xf32, #tpu.memory_space<vmem>>, vector<7x128xf32>,
    %c0_37 = arith.constant 0 : index
    %c0_38 = arith.constant 0 : index
    %28 = vector.load %arg1[%c0_37, %c0_38] : memref<20x160xbf16, #tpu.memory_space<vmem>>, vector<20x160xbf16>
    %c2 = arith.constant 2 : index
    %c0_39 = arith.constant 0 : index
    %c0_40 = arith.constant 0 : index
    %29 = vector.load %arg2[%c2, %c0_39, %c0_40] : memref<4x160x128xbf16, #tpu.memory_space<vmem>>, vector<1x160x128xbf16>
    %30 = vector.shape_cast %29 : vector<1x160x128xbf16> to vector<160x128xbf16>
    %cst_41 = arith.constant dense<0.000000e+00> : vector<20x128xf32>
    %31 = tpu.matmul %28, %30, %cst_41 {dimension_numbers = #tpu.dot_dimension_numbers<[1], [0], [0], [1], [0, 0, 1, 1], [], []>} : vector<20x160xbf16>, vector<160x128xbf16>, vector<20x128xf32> -> vector<20x128xf32>
    %c0_42 = arith.constant 0 : index
    %c0_43 = arith.constant 0 : index
    %32 = vector.load %arg9[%c0_42, %c0_43] : memref<20x128xf32, #tpu.memory_space<vmem>>, vector<20x128xf32>
    tpu.vector_store %arg9[%c0_42, %c0_43], %31 {strides = array<i32>} : memref<20x128xf32, #tpu.memory_space<vmem>>, vector<20x128xf32>,
    %c0_44 = arith.constant 0 : index
    %c0_45 = arith.constant 0 : index
    %33 = vector.load %arg10[%c0_44, %c0_45] : memref<14x128xf32, #tpu.memory_space<vmem>>, vector<7x128xf32>
    %c2_46 = arith.constant 2 : index
    %c0_47 = arith.constant 0 : index
    %34 = vector.load %arg9[%c2_46, %c0_47] : memref<20x128xf32, #tpu.memory_space<vmem>>, vector<7x128xf32>
    %35 = arith.addf %33, %34 : vector<7x128xf32>
    %c0_48 = arith.constant 0 : index
    %c0_49 = arith.constant 0 : index
    %36 = vector.load %arg10[%c0_48, %c0_49] : memref<14x128xf32, #tpu.memory_space<vmem>>, vector<7x128xf32>
    tpu.vector_store %arg10[%c0_48, %c0_49], %35 {strides = array<i32>} : memref<14x128xf32, #tpu.memory_space<vmem>>, vector<7x128xf32>,
    %c7_50 = arith.constant 7 : index
    %c0_51 = arith.constant 0 : index
    %37 = vector.load %arg10[%c7_50, %c0_51] : memref<14x128xf32, #tpu.memory_space<vmem>>, vector<7x128xf32>
    %c12 = arith.constant 12 : index
    %c0_52 = arith.constant 0 : index
    %38 = vector.load %arg9[%c12, %c0_52] : memref<20x128xf32, #tpu.memory_space<vmem>>, vector<7x128xf32>
    %39 = arith.addf %37, %38 : vector<7x128xf32>
    %c7_53 = arith.constant 7 : index
    %c0_54 = arith.constant 0 : index
    %40 = vector.load %arg10[%c7_53, %c0_54] : memref<14x128xf32, #tpu.memory_space<vmem>>, vector<7x128xf32>
    tpu.vector_store %arg10[%c7_53, %c0_54], %39 {strides = array<i32>} : memref<14x128xf32, #tpu.memory_space<vmem>>, vector<7x128xf32>,
    %c0_55 = arith.constant 0 : index
    %c0_56 = arith.constant 0 : index
    %41 = vector.load %arg1[%c0_55, %c0_56] : memref<20x160xbf16, #tpu.memory_space<vmem>>, vector<20x160xbf16>
    %c3 = arith.constant 3 : index
    %c0_57 = arith.constant 0 : index
    %c0_58 = arith.constant 0 : index
    %42 = vector.load %arg2[%c3, %c0_57, %c0_58] : memref<4x160x128xbf16, #tpu.memory_space<vmem>>, vector<1x160x128xbf16>
    %43 = vector.shape_cast %42 : vector<1x160x128xbf16> to vector<160x128xbf16>
    %cst_59 = arith.constant dense<0.000000e+00> : vector<20x128xf32>
    %44 = tpu.matmul %41, %43, %cst_59 {dimension_numbers = #tpu.dot_dimension_numbers<[1], [0], [0], [1], [0, 0, 1, 1], [], []>} : vector<20x160xbf16>, vector<160x128xbf16>, vector<20x128xf32> -> vector<20x128xf32>
    %c0_60 = arith.constant 0 : index
    %c0_61 = arith.constant 0 : index
    %45 = vector.load %arg9[%c0_60, %c0_61] : memref<20x128xf32, #tpu.memory_space<vmem>>, vector<20x128xf32>
    tpu.vector_store %arg9[%c0_60, %c0_61], %44 {strides = array<i32>} : memref<20x128xf32, #tpu.memory_space<vmem>>, vector<20x128xf32>,
    %c0_62 = arith.constant 0 : index
    %c0_63 = arith.constant 0 : index
    %46 = vector.load %arg10[%c0_62, %c0_63] : memref<14x128xf32, #tpu.memory_space<vmem>>, vector<7x128xf32>
    %c3_64 = arith.constant 3 : index
    %c0_65 = arith.constant 0 : index
    %47 = vector.load %arg9[%c3_64, %c0_65] : memref<20x128xf32, #tpu.memory_space<vmem>>, vector<7x128xf32>
    %48 = arith.addf %46, %47 : vector<7x128xf32>
    %c0_66 = arith.constant 0 : index
    %c0_67 = arith.constant 0 : index
    %49 = vector.load %arg10[%c0_66, %c0_67] : memref<14x128xf32, #tpu.memory_space<vmem>>, vector<7x128xf32>
    tpu.vector_store %arg10[%c0_66, %c0_67], %48 {strides = array<i32>} : memref<14x128xf32, #tpu.memory_space<vmem>>, vector<7x128xf32>,
    %c7_68 = arith.constant 7 : index
    %c0_69 = arith.constant 0 : index
    %50 = vector.load %arg10[%c7_68, %c0_69] : memref<14x128xf32, #tpu.memory_space<vmem>>, vector<7x128xf32>
    %c13 = arith.constant 13 : index
    %c0_70 = arith.constant 0 : index
    %51 = vector.load %arg9[%c13, %c0_70] : memref<20x128xf32, #tpu.memory_space<vmem>>, vector<7x128xf32>
    %52 = arith.addf %50, %51 : vector<7x128xf32>
    %c7_71 = arith.constant 7 : index
    %c0_72 = arith.constant 0 : index
    %53 = vector.load %arg10[%c7_71, %c0_72] : memref<14x128xf32, #tpu.memory_space<vmem>>, vector<7x128xf32>
    tpu.vector_store %arg10[%c7_71, %c0_72], %52 {strides = array<i32>} : memref<14x128xf32, #tpu.memory_space<vmem>>, vector<7x128xf32>,
    %c0_73 = arith.constant 0 : index
    %c0_74 = arith.constant 0 : index
    %54 = vector.load %arg10[%c0_73, %c0_74] : memref<14x128xf32, #tpu.memory_space<vmem>>, vector<14x128xf32>
    %c0_75 = arith.constant 0 : index
    %c0_76 = arith.constant 0 : index
    %55 = vector.load %arg3[%c0_75, %c0_76] : memref<1x128xf32, #tpu.memory_space<vmem>>, vector<1x128xf32>
    %56 = vector.broadcast %55 : vector<1x128xf32> to vector<14x128xf32>
    %57 = arith.addf %54, %56 : vector<14x128xf32>
    %c0_77 = arith.constant 0 : index
    %c0_78 = arith.constant 0 : index
    %58 = vector.load %arg7[%c0_77, %c0_78] : memref<14x1xf32, #tpu.memory_space<vmem>>, vector<14x1xf32>
    %59 = vector.broadcast %58 : vector<14x1xf32> to vector<14x128xf32>
    %60 = arith.mulf %57, %59 : vector<14x128xf32>
    %c0_79 = arith.constant 0 : index
    %c0_80 = arith.constant 0 : index
    %61 = vector.load %arg4[%c0_79, %c0_80] : memref<128x128xf32, #tpu.memory_space<vmem>>, vector<128x128xf32>
    %cst_81 = arith.constant dense<0.000000e+00> : vector<14x128xf32>
    %62 = tpu.matmul %60, %61, %cst_81 {dimension_numbers = #tpu.dot_dimension_numbers<[1], [0], [0], [1], [0, 0, 1, 1], [], []>} : vector<14x128xf32>, vector<128x128xf32>, vector<14x128xf32> -> vector<14x128xf32>
    %63 = arith.mulf %60, %60 : vector<14x128xf32>
    %c0_82 = arith.constant 0 : index
    %c0_83 = arith.constant 0 : index
    %64 = vector.load %arg4[%c0_82, %c0_83] : memref<128x128xf32, #tpu.memory_space<vmem>>, vector<128x128xf32>
    %cst_84 = arith.constant dense<0.000000e+00> : vector<14x128xf32>
    %65 = tpu.matmul %63, %64, %cst_84 {dimension_numbers = #tpu.dot_dimension_numbers<[1], [0], [0], [1], [0, 0, 1, 1], [], []>} : vector<14x128xf32>, vector<128x128xf32>, vector<14x128xf32> -> vector<14x128xf32>
    %cst_85 = arith.constant dense<0.000000e+00> : vector<128xf32>
    %66 = vector.multi_reduction <add>, %62, %cst_85 [0] : vector<14x128xf32> to vector<128xf32>
    %67 = vector.shape_cast %66 : vector<128xf32> to vector<1x128xf32>
    %cst_86 = arith.constant 3.125000e-02 : f32
    %68 = vector.broadcast %cst_86 : f32 to vector<1x128xf32>
    %69 = arith.mulf %67, %68 : vector<1x128xf32>
    %cst_87 = arith.constant dense<0.000000e+00> : vector<128xf32>
    %70 = vector.multi_reduction <add>, %65, %cst_87 [0] : vector<14x128xf32> to vector<128xf32>
    %71 = vector.shape_cast %70 : vector<128xf32> to vector<1x128xf32>
    %cst_88 = arith.constant 3.125000e-02 : f32
    %72 = vector.broadcast %cst_88 : f32 to vector<1x128xf32>
    %73 = arith.mulf %71, %72 : vector<1x128xf32>
    %74 = arith.mulf %69, %69 : vector<1x128xf32>
    %75 = arith.subf %73, %74 : vector<1x128xf32>
    %cst_89 = arith.constant 0.000000e+00 : f32
    %76 = vector.broadcast %cst_89 : f32 to vector<1x128xf32>
    %77 = arith.maximumf %75, %76 : vector<1x128xf32>
    %c0_90 = arith.constant 0 : index
    %c0_91 = arith.constant 0 : index
    %78 = vector.load %arg5[%c0_90, %c0_91] : memref<1x128xf32, #tpu.memory_space<vmem>>, vector<1x128xf32>
    %cst_92 = arith.constant 9.99999974E-6 : f32
    %79 = vector.broadcast %cst_92 : f32 to vector<1x128xf32>
    %80 = arith.addf %77, %79 : vector<1x128xf32>
    %81 = math.rsqrt %80 : vector<1x128xf32>
    %82 = arith.mulf %78, %81 : vector<1x128xf32>
    %c0_93 = arith.constant 0 : index
    %c0_94 = arith.constant 0 : index
    %83 = vector.load %arg6[%c0_93, %c0_94] : memref<1x128xf32, #tpu.memory_space<vmem>>, vector<1x128xf32>
    %84 = arith.mulf %69, %82 : vector<1x128xf32>
    %85 = arith.subf %83, %84 : vector<1x128xf32>
    %86 = vector.broadcast %82 : vector<1x128xf32> to vector<14x128xf32>
    %87 = arith.mulf %57, %86 : vector<14x128xf32>
    %88 = vector.broadcast %85 : vector<1x128xf32> to vector<14x128xf32>
    %89 = arith.addf %87, %88 : vector<14x128xf32>
    %cst_95 = arith.constant 0.000000e+00 : f32
    %90 = vector.broadcast %cst_95 : f32 to vector<14x128xf32>
    %91 = arith.cmpf oge, %89, %90 : vector<14x128xf32>
    %cst_96 = arith.constant 2.000000e-01 : f32
    %92 = vector.broadcast %cst_96 : f32 to vector<14x128xf32>
    %93 = arith.mulf %92, %89 : vector<14x128xf32>
    %94 = arith.select %91, %89, %93 : vector<14x128xi1>, vector<14x128xf32>
    %95 = arith.truncf %94 : vector<14x128xf32> to vector<14x128xbf16>
    %c0_97 = arith.constant 0 : index
    %c0_98 = arith.constant 0 : index
    %96 = vector.load %arg8[%c0_97, %c0_98] : memref<14x128xbf16, #tpu.memory_space<vmem>>, vector<14x128xbf16>
    tpu.vector_store %arg8[%c0_97, %c0_98], %95 {strides = array<i32>} : memref<14x128xbf16, #tpu.memory_space<vmem>>, vector<14x128xbf16>,
    return
  }
  func.func @transform_0(%arg0: i32) -> (i32, i32) {
    %c0_i32 = arith.constant 0 : i32
    %c0_i32_0 = arith.constant 0 : i32
    %c0_i32_1 = arith.constant 0 : i32
    return %c0_i32, %c0_i32_0 : i32, i32
  }
  func.func @transform_1(%arg0: i32) -> (i32, i32, i32) {
    %c0_i32 = arith.constant 0 : i32
    %c0_i32_0 = arith.constant 0 : i32
    %c0_i32_1 = arith.constant 0 : i32
    %c0_i32_2 = arith.constant 0 : i32
    return %c0_i32, %c0_i32_0, %c0_i32_1 : i32, i32, i32
  }
  func.func @transform_2(%arg0: i32) -> (i32, i32) {
    %c0_i32 = arith.constant 0 : i32
    %c0_i32_0 = arith.constant 0 : i32
    %c0_i32_1 = arith.constant 0 : i32
    return %c0_i32, %c0_i32_0 : i32, i32
  }
  func.func @transform_3(%arg0: i32) -> (i32, i32) {
    %c0_i32 = arith.constant 0 : i32
    %c0_i32_0 = arith.constant 0 : i32
    %c0_i32_1 = arith.constant 0 : i32
    return %c0_i32, %c0_i32_0 : i32, i32
  }
  func.func @transform_4(%arg0: i32) -> (i32, i32) {
    %c0_i32 = arith.constant 0 : i32
    %c0_i32_0 = arith.constant 0 : i32
    %c0_i32_1 = arith.constant 0 : i32
    return %c0_i32, %c0_i32_0 : i32, i32
  }
  func.func @transform_5(%arg0: i32) -> (i32, i32) {
    %c0_i32 = arith.constant 0 : i32
    %c0_i32_0 = arith.constant 0 : i32
    %c0_i32_1 = arith.constant 0 : i32
    return %c0_i32, %c0_i32_0 : i32, i32
  }
  func.func @transform_6(%arg0: i32) -> (i32, i32) {
    %c0_i32 = arith.constant 0 : i32
    %c0_i32_0 = arith.constant 0 : i32
    %c0_i32_1 = arith.constant 0 : i32
    return %c0_i32, %c0_i32_0 : i32, i32
  }
  func.func @transform_7(%arg0: i32) -> (i32, i32) {
    %c0_i32 = arith.constant 0 : i32
    %c0_i32_0 = arith.constant 0 : i32
    %c0_i32_1 = arith.constant 0 : i32
    return %c0_i32, %c0_i32_0 : i32, i32
  }
}

module attributes {stable_mosaic.version = 11 : i64} {
  func.func @_conv_bn_lrelu_kernel(%arg0: i32, %arg1: memref<12x192xbf16, #tpu.memory_space<vmem>>, %arg2: memref<4x192x192xbf16, #tpu.memory_space<vmem>>, %arg3: memref<1x192xf32, #tpu.memory_space<vmem>>, %arg4: memref<192x192xf32, #tpu.memory_space<vmem>>, %arg5: memref<1x192xf32, #tpu.memory_space<vmem>>, %arg6: memref<1x192xf32, #tpu.memory_space<vmem>>, %arg7: memref<6x1xf32, #tpu.memory_space<vmem>>, %arg8: memref<6x192xbf16, #tpu.memory_space<vmem>>, %arg9: memref<12x192xf32, #tpu.memory_space<vmem>>, %arg10: memref<6x192xf32, #tpu.memory_space<vmem>>) attributes {dimension_semantics = [#tpu.dimension_semantics<arbitrary>], iteration_bounds = array<i64: 1>, scalar_prefetch = 0 : i64, scratch_operands = 2 : i64, tpu.core_type = #tpu.core_type<tc>, window_params = [{pipeline_mode = #tpu.pipeline_mode<synchronous>, transform_indices = @transform_0, window_bounds = array<i64: 12, 192>}, {pipeline_mode = #tpu.pipeline_mode<synchronous>, transform_indices = @transform_1, window_bounds = array<i64: 4, 192, 192>}, {pipeline_mode = #tpu.pipeline_mode<synchronous>, transform_indices = @transform_2, window_bounds = array<i64: 1, 192>}, {pipeline_mode = #tpu.pipeline_mode<synchronous>, transform_indices = @transform_3, window_bounds = array<i64: 192, 192>}, {pipeline_mode = #tpu.pipeline_mode<synchronous>, transform_indices = @transform_4, window_bounds = array<i64: 1, 192>}, {pipeline_mode = #tpu.pipeline_mode<synchronous>, transform_indices = @transform_5, window_bounds = array<i64: 1, 192>}, {pipeline_mode = #tpu.pipeline_mode<synchronous>, transform_indices = @transform_6, window_bounds = array<i64: 6, 1>}, {pipeline_mode = #tpu.pipeline_mode<synchronous>, transform_indices = @transform_7, window_bounds = array<i64: 6, 192>}]} {
    %cst = arith.constant 0.000000e+00 : f32
    %0 = vector.broadcast %cst : f32 to vector<6x192xf32>
    %c0 = arith.constant 0 : index
    %c0_0 = arith.constant 0 : index
    %1 = vector.load %arg10[%c0, %c0_0] : memref<6x192xf32, #tpu.memory_space<vmem>>, vector<6x192xf32>
    tpu.vector_store %arg10[%c0, %c0_0], %0 {strides = array<i32>} : memref<6x192xf32, #tpu.memory_space<vmem>>, vector<6x192xf32>,
    %c0_1 = arith.constant 0 : index
    %c0_2 = arith.constant 0 : index
    %2 = vector.load %arg1[%c0_1, %c0_2] : memref<12x192xbf16, #tpu.memory_space<vmem>>, vector<12x192xbf16>
    %c0_3 = arith.constant 0 : index
    %c0_4 = arith.constant 0 : index
    %c0_5 = arith.constant 0 : index
    %3 = vector.load %arg2[%c0_3, %c0_4, %c0_5] : memref<4x192x192xbf16, #tpu.memory_space<vmem>>, vector<1x192x192xbf16>
    %4 = vector.shape_cast %3 : vector<1x192x192xbf16> to vector<192x192xbf16>
    %cst_6 = arith.constant dense<0.000000e+00> : vector<12x192xf32>
    %5 = tpu.matmul %2, %4, %cst_6 {dimension_numbers = #tpu.dot_dimension_numbers<[1], [0], [0], [1], [0, 0, 1, 1], [], []>} : vector<12x192xbf16>, vector<192x192xbf16>, vector<12x192xf32> -> vector<12x192xf32>
    %c0_7 = arith.constant 0 : index
    %c0_8 = arith.constant 0 : index
    %6 = vector.load %arg9[%c0_7, %c0_8] : memref<12x192xf32, #tpu.memory_space<vmem>>, vector<12x192xf32>
    tpu.vector_store %arg9[%c0_7, %c0_8], %5 {strides = array<i32>} : memref<12x192xf32, #tpu.memory_space<vmem>>, vector<12x192xf32>,
    %c0_9 = arith.constant 0 : index
    %c0_10 = arith.constant 0 : index
    %7 = vector.load %arg10[%c0_9, %c0_10] : memref<6x192xf32, #tpu.memory_space<vmem>>, vector<3x192xf32>
    %c0_11 = arith.constant 0 : index
    %c0_12 = arith.constant 0 : index
    %8 = vector.load %arg9[%c0_11, %c0_12] : memref<12x192xf32, #tpu.memory_space<vmem>>, vector<3x192xf32>
    %9 = arith.addf %7, %8 : vector<3x192xf32>
    %c0_13 = arith.constant 0 : index
    %c0_14 = arith.constant 0 : index
    %10 = vector.load %arg10[%c0_13, %c0_14] : memref<6x192xf32, #tpu.memory_space<vmem>>, vector<3x192xf32>
    tpu.vector_store %arg10[%c0_13, %c0_14], %9 {strides = array<i32>} : memref<6x192xf32, #tpu.memory_space<vmem>>, vector<3x192xf32>,
    %c3 = arith.constant 3 : index
    %c0_15 = arith.constant 0 : index
    %11 = vector.load %arg10[%c3, %c0_15] : memref<6x192xf32, #tpu.memory_space<vmem>>, vector<3x192xf32>
    %c6 = arith.constant 6 : index
    %c0_16 = arith.constant 0 : index
    %12 = vector.load %arg9[%c6, %c0_16] : memref<12x192xf32, #tpu.memory_space<vmem>>, vector<3x192xf32>
    %13 = arith.addf %11, %12 : vector<3x192xf32>
    %c3_17 = arith.constant 3 : index
    %c0_18 = arith.constant 0 : index
    %14 = vector.load %arg10[%c3_17, %c0_18] : memref<6x192xf32, #tpu.memory_space<vmem>>, vector<3x192xf32>
    tpu.vector_store %arg10[%c3_17, %c0_18], %13 {strides = array<i32>} : memref<6x192xf32, #tpu.memory_space<vmem>>, vector<3x192xf32>,
    %c0_19 = arith.constant 0 : index
    %c0_20 = arith.constant 0 : index
    %15 = vector.load %arg1[%c0_19, %c0_20] : memref<12x192xbf16, #tpu.memory_space<vmem>>, vector<12x192xbf16>
    %c1 = arith.constant 1 : index
    %c0_21 = arith.constant 0 : index
    %c0_22 = arith.constant 0 : index
    %16 = vector.load %arg2[%c1, %c0_21, %c0_22] : memref<4x192x192xbf16, #tpu.memory_space<vmem>>, vector<1x192x192xbf16>
    %17 = vector.shape_cast %16 : vector<1x192x192xbf16> to vector<192x192xbf16>
    %cst_23 = arith.constant dense<0.000000e+00> : vector<12x192xf32>
    %18 = tpu.matmul %15, %17, %cst_23 {dimension_numbers = #tpu.dot_dimension_numbers<[1], [0], [0], [1], [0, 0, 1, 1], [], []>} : vector<12x192xbf16>, vector<192x192xbf16>, vector<12x192xf32> -> vector<12x192xf32>
    %c0_24 = arith.constant 0 : index
    %c0_25 = arith.constant 0 : index
    %19 = vector.load %arg9[%c0_24, %c0_25] : memref<12x192xf32, #tpu.memory_space<vmem>>, vector<12x192xf32>
    tpu.vector_store %arg9[%c0_24, %c0_25], %18 {strides = array<i32>} : memref<12x192xf32, #tpu.memory_space<vmem>>, vector<12x192xf32>,
    %c0_26 = arith.constant 0 : index
    %c0_27 = arith.constant 0 : index
    %20 = vector.load %arg10[%c0_26, %c0_27] : memref<6x192xf32, #tpu.memory_space<vmem>>, vector<3x192xf32>
    %c1_28 = arith.constant 1 : index
    %c0_29 = arith.constant 0 : index
    %21 = vector.load %arg9[%c1_28, %c0_29] : memref<12x192xf32, #tpu.memory_space<vmem>>, vector<3x192xf32>
    %22 = arith.addf %20, %21 : vector<3x192xf32>
    %c0_30 = arith.constant 0 : index
    %c0_31 = arith.constant 0 : index
    %23 = vector.load %arg10[%c0_30, %c0_31] : memref<6x192xf32, #tpu.memory_space<vmem>>, vector<3x192xf32>
    tpu.vector_store %arg10[%c0_30, %c0_31], %22 {strides = array<i32>} : memref<6x192xf32, #tpu.memory_space<vmem>>, vector<3x192xf32>,
    %c3_32 = arith.constant 3 : index
    %c0_33 = arith.constant 0 : index
    %24 = vector.load %arg10[%c3_32, %c0_33] : memref<6x192xf32, #tpu.memory_space<vmem>>, vector<3x192xf32>
    %c7 = arith.constant 7 : index
    %c0_34 = arith.constant 0 : index
    %25 = vector.load %arg9[%c7, %c0_34] : memref<12x192xf32, #tpu.memory_space<vmem>>, vector<3x192xf32>
    %26 = arith.addf %24, %25 : vector<3x192xf32>
    %c3_35 = arith.constant 3 : index
    %c0_36 = arith.constant 0 : index
    %27 = vector.load %arg10[%c3_35, %c0_36] : memref<6x192xf32, #tpu.memory_space<vmem>>, vector<3x192xf32>
    tpu.vector_store %arg10[%c3_35, %c0_36], %26 {strides = array<i32>} : memref<6x192xf32, #tpu.memory_space<vmem>>, vector<3x192xf32>,
    %c0_37 = arith.constant 0 : index
    %c0_38 = arith.constant 0 : index
    %28 = vector.load %arg1[%c0_37, %c0_38] : memref<12x192xbf16, #tpu.memory_space<vmem>>, vector<12x192xbf16>
    %c2 = arith.constant 2 : index
    %c0_39 = arith.constant 0 : index
    %c0_40 = arith.constant 0 : index
    %29 = vector.load %arg2[%c2, %c0_39, %c0_40] : memref<4x192x192xbf16, #tpu.memory_space<vmem>>, vector<1x192x192xbf16>
    %30 = vector.shape_cast %29 : vector<1x192x192xbf16> to vector<192x192xbf16>
    %cst_41 = arith.constant dense<0.000000e+00> : vector<12x192xf32>
    %31 = tpu.matmul %28, %30, %cst_41 {dimension_numbers = #tpu.dot_dimension_numbers<[1], [0], [0], [1], [0, 0, 1, 1], [], []>} : vector<12x192xbf16>, vector<192x192xbf16>, vector<12x192xf32> -> vector<12x192xf32>
    %c0_42 = arith.constant 0 : index
    %c0_43 = arith.constant 0 : index
    %32 = vector.load %arg9[%c0_42, %c0_43] : memref<12x192xf32, #tpu.memory_space<vmem>>, vector<12x192xf32>
    tpu.vector_store %arg9[%c0_42, %c0_43], %31 {strides = array<i32>} : memref<12x192xf32, #tpu.memory_space<vmem>>, vector<12x192xf32>,
    %c0_44 = arith.constant 0 : index
    %c0_45 = arith.constant 0 : index
    %33 = vector.load %arg10[%c0_44, %c0_45] : memref<6x192xf32, #tpu.memory_space<vmem>>, vector<3x192xf32>
    %c2_46 = arith.constant 2 : index
    %c0_47 = arith.constant 0 : index
    %34 = vector.load %arg9[%c2_46, %c0_47] : memref<12x192xf32, #tpu.memory_space<vmem>>, vector<3x192xf32>
    %35 = arith.addf %33, %34 : vector<3x192xf32>
    %c0_48 = arith.constant 0 : index
    %c0_49 = arith.constant 0 : index
    %36 = vector.load %arg10[%c0_48, %c0_49] : memref<6x192xf32, #tpu.memory_space<vmem>>, vector<3x192xf32>
    tpu.vector_store %arg10[%c0_48, %c0_49], %35 {strides = array<i32>} : memref<6x192xf32, #tpu.memory_space<vmem>>, vector<3x192xf32>,
    %c3_50 = arith.constant 3 : index
    %c0_51 = arith.constant 0 : index
    %37 = vector.load %arg10[%c3_50, %c0_51] : memref<6x192xf32, #tpu.memory_space<vmem>>, vector<3x192xf32>
    %c8 = arith.constant 8 : index
    %c0_52 = arith.constant 0 : index
    %38 = vector.load %arg9[%c8, %c0_52] : memref<12x192xf32, #tpu.memory_space<vmem>>, vector<3x192xf32>
    %39 = arith.addf %37, %38 : vector<3x192xf32>
    %c3_53 = arith.constant 3 : index
    %c0_54 = arith.constant 0 : index
    %40 = vector.load %arg10[%c3_53, %c0_54] : memref<6x192xf32, #tpu.memory_space<vmem>>, vector<3x192xf32>
    tpu.vector_store %arg10[%c3_53, %c0_54], %39 {strides = array<i32>} : memref<6x192xf32, #tpu.memory_space<vmem>>, vector<3x192xf32>,
    %c0_55 = arith.constant 0 : index
    %c0_56 = arith.constant 0 : index
    %41 = vector.load %arg1[%c0_55, %c0_56] : memref<12x192xbf16, #tpu.memory_space<vmem>>, vector<12x192xbf16>
    %c3_57 = arith.constant 3 : index
    %c0_58 = arith.constant 0 : index
    %c0_59 = arith.constant 0 : index
    %42 = vector.load %arg2[%c3_57, %c0_58, %c0_59] : memref<4x192x192xbf16, #tpu.memory_space<vmem>>, vector<1x192x192xbf16>
    %43 = vector.shape_cast %42 : vector<1x192x192xbf16> to vector<192x192xbf16>
    %cst_60 = arith.constant dense<0.000000e+00> : vector<12x192xf32>
    %44 = tpu.matmul %41, %43, %cst_60 {dimension_numbers = #tpu.dot_dimension_numbers<[1], [0], [0], [1], [0, 0, 1, 1], [], []>} : vector<12x192xbf16>, vector<192x192xbf16>, vector<12x192xf32> -> vector<12x192xf32>
    %c0_61 = arith.constant 0 : index
    %c0_62 = arith.constant 0 : index
    %45 = vector.load %arg9[%c0_61, %c0_62] : memref<12x192xf32, #tpu.memory_space<vmem>>, vector<12x192xf32>
    tpu.vector_store %arg9[%c0_61, %c0_62], %44 {strides = array<i32>} : memref<12x192xf32, #tpu.memory_space<vmem>>, vector<12x192xf32>,
    %c0_63 = arith.constant 0 : index
    %c0_64 = arith.constant 0 : index
    %46 = vector.load %arg10[%c0_63, %c0_64] : memref<6x192xf32, #tpu.memory_space<vmem>>, vector<3x192xf32>
    %c3_65 = arith.constant 3 : index
    %c0_66 = arith.constant 0 : index
    %47 = vector.load %arg9[%c3_65, %c0_66] : memref<12x192xf32, #tpu.memory_space<vmem>>, vector<3x192xf32>
    %48 = arith.addf %46, %47 : vector<3x192xf32>
    %c0_67 = arith.constant 0 : index
    %c0_68 = arith.constant 0 : index
    %49 = vector.load %arg10[%c0_67, %c0_68] : memref<6x192xf32, #tpu.memory_space<vmem>>, vector<3x192xf32>
    tpu.vector_store %arg10[%c0_67, %c0_68], %48 {strides = array<i32>} : memref<6x192xf32, #tpu.memory_space<vmem>>, vector<3x192xf32>,
    %c3_69 = arith.constant 3 : index
    %c0_70 = arith.constant 0 : index
    %50 = vector.load %arg10[%c3_69, %c0_70] : memref<6x192xf32, #tpu.memory_space<vmem>>, vector<3x192xf32>
    %c9 = arith.constant 9 : index
    %c0_71 = arith.constant 0 : index
    %51 = vector.load %arg9[%c9, %c0_71] : memref<12x192xf32, #tpu.memory_space<vmem>>, vector<3x192xf32>
    %52 = arith.addf %50, %51 : vector<3x192xf32>
    %c3_72 = arith.constant 3 : index
    %c0_73 = arith.constant 0 : index
    %53 = vector.load %arg10[%c3_72, %c0_73] : memref<6x192xf32, #tpu.memory_space<vmem>>, vector<3x192xf32>
    tpu.vector_store %arg10[%c3_72, %c0_73], %52 {strides = array<i32>} : memref<6x192xf32, #tpu.memory_space<vmem>>, vector<3x192xf32>,
    %c0_74 = arith.constant 0 : index
    %c0_75 = arith.constant 0 : index
    %54 = vector.load %arg10[%c0_74, %c0_75] : memref<6x192xf32, #tpu.memory_space<vmem>>, vector<6x192xf32>
    %c0_76 = arith.constant 0 : index
    %c0_77 = arith.constant 0 : index
    %55 = vector.load %arg3[%c0_76, %c0_77] : memref<1x192xf32, #tpu.memory_space<vmem>>, vector<1x192xf32>
    %56 = vector.broadcast %55 : vector<1x192xf32> to vector<6x192xf32>
    %57 = arith.addf %54, %56 : vector<6x192xf32>
    %c0_78 = arith.constant 0 : index
    %c0_79 = arith.constant 0 : index
    %58 = vector.load %arg7[%c0_78, %c0_79] : memref<6x1xf32, #tpu.memory_space<vmem>>, vector<6x1xf32>
    %59 = vector.broadcast %58 : vector<6x1xf32> to vector<6x192xf32>
    %60 = arith.mulf %57, %59 : vector<6x192xf32>
    %c0_80 = arith.constant 0 : index
    %c0_81 = arith.constant 0 : index
    %61 = vector.load %arg4[%c0_80, %c0_81] : memref<192x192xf32, #tpu.memory_space<vmem>>, vector<192x192xf32>
    %cst_82 = arith.constant dense<0.000000e+00> : vector<6x192xf32>
    %62 = tpu.matmul %60, %61, %cst_82 {dimension_numbers = #tpu.dot_dimension_numbers<[1], [0], [0], [1], [0, 0, 1, 1], [], []>} : vector<6x192xf32>, vector<192x192xf32>, vector<6x192xf32> -> vector<6x192xf32>
    %63 = arith.mulf %60, %60 : vector<6x192xf32>
    %c0_83 = arith.constant 0 : index
    %c0_84 = arith.constant 0 : index
    %64 = vector.load %arg4[%c0_83, %c0_84] : memref<192x192xf32, #tpu.memory_space<vmem>>, vector<192x192xf32>
    %cst_85 = arith.constant dense<0.000000e+00> : vector<6x192xf32>
    %65 = tpu.matmul %63, %64, %cst_85 {dimension_numbers = #tpu.dot_dimension_numbers<[1], [0], [0], [1], [0, 0, 1, 1], [], []>} : vector<6x192xf32>, vector<192x192xf32>, vector<6x192xf32> -> vector<6x192xf32>
    %cst_86 = arith.constant dense<0.000000e+00> : vector<192xf32>
    %66 = vector.multi_reduction <add>, %62, %cst_86 [0] : vector<6x192xf32> to vector<192xf32>
    %67 = vector.shape_cast %66 : vector<192xf32> to vector<1x192xf32>
    %cst_87 = arith.constant 0.055555556 : f32
    %68 = vector.broadcast %cst_87 : f32 to vector<1x192xf32>
    %69 = arith.mulf %67, %68 : vector<1x192xf32>
    %cst_88 = arith.constant dense<0.000000e+00> : vector<192xf32>
    %70 = vector.multi_reduction <add>, %65, %cst_88 [0] : vector<6x192xf32> to vector<192xf32>
    %71 = vector.shape_cast %70 : vector<192xf32> to vector<1x192xf32>
    %cst_89 = arith.constant 0.055555556 : f32
    %72 = vector.broadcast %cst_89 : f32 to vector<1x192xf32>
    %73 = arith.mulf %71, %72 : vector<1x192xf32>
    %74 = arith.mulf %69, %69 : vector<1x192xf32>
    %75 = arith.subf %73, %74 : vector<1x192xf32>
    %cst_90 = arith.constant 0.000000e+00 : f32
    %76 = vector.broadcast %cst_90 : f32 to vector<1x192xf32>
    %77 = arith.maximumf %75, %76 : vector<1x192xf32>
    %c0_91 = arith.constant 0 : index
    %c0_92 = arith.constant 0 : index
    %78 = vector.load %arg5[%c0_91, %c0_92] : memref<1x192xf32, #tpu.memory_space<vmem>>, vector<1x192xf32>
    %cst_93 = arith.constant 9.99999974E-6 : f32
    %79 = vector.broadcast %cst_93 : f32 to vector<1x192xf32>
    %80 = arith.addf %77, %79 : vector<1x192xf32>
    %81 = math.rsqrt %80 : vector<1x192xf32>
    %82 = arith.mulf %78, %81 : vector<1x192xf32>
    %c0_94 = arith.constant 0 : index
    %c0_95 = arith.constant 0 : index
    %83 = vector.load %arg6[%c0_94, %c0_95] : memref<1x192xf32, #tpu.memory_space<vmem>>, vector<1x192xf32>
    %84 = arith.mulf %69, %82 : vector<1x192xf32>
    %85 = arith.subf %83, %84 : vector<1x192xf32>
    %86 = vector.broadcast %82 : vector<1x192xf32> to vector<6x192xf32>
    %87 = arith.mulf %57, %86 : vector<6x192xf32>
    %88 = vector.broadcast %85 : vector<1x192xf32> to vector<6x192xf32>
    %89 = arith.addf %87, %88 : vector<6x192xf32>
    %cst_96 = arith.constant 0.000000e+00 : f32
    %90 = vector.broadcast %cst_96 : f32 to vector<6x192xf32>
    %91 = arith.cmpf oge, %89, %90 : vector<6x192xf32>
    %cst_97 = arith.constant 2.000000e-01 : f32
    %92 = vector.broadcast %cst_97 : f32 to vector<6x192xf32>
    %93 = arith.mulf %92, %89 : vector<6x192xf32>
    %94 = arith.select %91, %89, %93 : vector<6x192xi1>, vector<6x192xf32>
    %95 = arith.truncf %94 : vector<6x192xf32> to vector<6x192xbf16>
    %c0_98 = arith.constant 0 : index
    %c0_99 = arith.constant 0 : index
    %96 = vector.load %arg8[%c0_98, %c0_99] : memref<6x192xbf16, #tpu.memory_space<vmem>>, vector<6x192xbf16>
    tpu.vector_store %arg8[%c0_98, %c0_99], %95 {strides = array<i32>} : memref<6x192xbf16, #tpu.memory_space<vmem>>, vector<6x192xbf16>,
    return
  }
  func.func @transform_0(%arg0: i32) -> (i32, i32) {
    %c0_i32 = arith.constant 0 : i32
    %c0_i32_0 = arith.constant 0 : i32
    %c0_i32_1 = arith.constant 0 : i32
    return %c0_i32, %c0_i32_0 : i32, i32
  }
  func.func @transform_1(%arg0: i32) -> (i32, i32, i32) {
    %c0_i32 = arith.constant 0 : i32
    %c0_i32_0 = arith.constant 0 : i32
    %c0_i32_1 = arith.constant 0 : i32
    %c0_i32_2 = arith.constant 0 : i32
    return %c0_i32, %c0_i32_0, %c0_i32_1 : i32, i32, i32
  }
  func.func @transform_2(%arg0: i32) -> (i32, i32) {
    %c0_i32 = arith.constant 0 : i32
    %c0_i32_0 = arith.constant 0 : i32
    %c0_i32_1 = arith.constant 0 : i32
    return %c0_i32, %c0_i32_0 : i32, i32
  }
  func.func @transform_3(%arg0: i32) -> (i32, i32) {
    %c0_i32 = arith.constant 0 : i32
    %c0_i32_0 = arith.constant 0 : i32
    %c0_i32_1 = arith.constant 0 : i32
    return %c0_i32, %c0_i32_0 : i32, i32
  }
  func.func @transform_4(%arg0: i32) -> (i32, i32) {
    %c0_i32 = arith.constant 0 : i32
    %c0_i32_0 = arith.constant 0 : i32
    %c0_i32_1 = arith.constant 0 : i32
    return %c0_i32, %c0_i32_0 : i32, i32
  }
  func.func @transform_5(%arg0: i32) -> (i32, i32) {
    %c0_i32 = arith.constant 0 : i32
    %c0_i32_0 = arith.constant 0 : i32
    %c0_i32_1 = arith.constant 0 : i32
    return %c0_i32, %c0_i32_0 : i32, i32
  }
  func.func @transform_6(%arg0: i32) -> (i32, i32) {
    %c0_i32 = arith.constant 0 : i32
    %c0_i32_0 = arith.constant 0 : i32
    %c0_i32_1 = arith.constant 0 : i32
    return %c0_i32, %c0_i32_0 : i32, i32
  }
  func.func @transform_7(%arg0: i32) -> (i32, i32) {
    %c0_i32 = arith.constant 0 : i32
    %c0_i32_0 = arith.constant 0 : i32
    %c0_i32_1 = arith.constant 0 : i32
    return %c0_i32, %c0_i32_0 : i32, i32
  }
}

module attributes {stable_mosaic.version = 11 : i64} {
  func.func @_conv_bn_lrelu_kernel(%arg0: i32, %arg1: memref<10x320xbf16, #tpu.memory_space<vmem>>, %arg2: memref<4x320x2xbf16, #tpu.memory_space<vmem>>, %arg3: memref<1x2xf32, #tpu.memory_space<vmem>>, %arg4: memref<2x2xf32, #tpu.memory_space<vmem>>, %arg5: memref<1x2xf32, #tpu.memory_space<vmem>>, %arg6: memref<1x2xf32, #tpu.memory_space<vmem>>, %arg7: memref<4x1xf32, #tpu.memory_space<vmem>>, %arg8: memref<4x2xf32, #tpu.memory_space<vmem>>, %arg9: memref<10x2xf32, #tpu.memory_space<vmem>>, %arg10: memref<4x2xf32, #tpu.memory_space<vmem>>) attributes {dimension_semantics = [#tpu.dimension_semantics<arbitrary>], iteration_bounds = array<i64: 1>, scalar_prefetch = 0 : i64, scratch_operands = 2 : i64, tpu.core_type = #tpu.core_type<tc>, window_params = [{pipeline_mode = #tpu.pipeline_mode<synchronous>, transform_indices = @transform_0, window_bounds = array<i64: 10, 320>}, {pipeline_mode = #tpu.pipeline_mode<synchronous>, transform_indices = @transform_1, window_bounds = array<i64: 4, 320, 2>}, {pipeline_mode = #tpu.pipeline_mode<synchronous>, transform_indices = @transform_2, window_bounds = array<i64: 1, 2>}, {pipeline_mode = #tpu.pipeline_mode<synchronous>, transform_indices = @transform_3, window_bounds = array<i64: 2, 2>}, {pipeline_mode = #tpu.pipeline_mode<synchronous>, transform_indices = @transform_4, window_bounds = array<i64: 1, 2>}, {pipeline_mode = #tpu.pipeline_mode<synchronous>, transform_indices = @transform_5, window_bounds = array<i64: 1, 2>}, {pipeline_mode = #tpu.pipeline_mode<synchronous>, transform_indices = @transform_6, window_bounds = array<i64: 4, 1>}, {pipeline_mode = #tpu.pipeline_mode<synchronous>, transform_indices = @transform_7, window_bounds = array<i64: 4, 2>}]} {
    %cst = arith.constant 0.000000e+00 : f32
    %0 = vector.broadcast %cst : f32 to vector<4x2xf32>
    %c0 = arith.constant 0 : index
    %c0_0 = arith.constant 0 : index
    %1 = vector.load %arg10[%c0, %c0_0] : memref<4x2xf32, #tpu.memory_space<vmem>>, vector<4x2xf32>
    tpu.vector_store %arg10[%c0, %c0_0], %0 {strides = array<i32>} : memref<4x2xf32, #tpu.memory_space<vmem>>, vector<4x2xf32>,
    %c0_1 = arith.constant 0 : index
    %c0_2 = arith.constant 0 : index
    %2 = vector.load %arg1[%c0_1, %c0_2] : memref<10x320xbf16, #tpu.memory_space<vmem>>, vector<10x320xbf16>
    %c0_3 = arith.constant 0 : index
    %c0_4 = arith.constant 0 : index
    %c0_5 = arith.constant 0 : index
    %3 = vector.load %arg2[%c0_3, %c0_4, %c0_5] : memref<4x320x2xbf16, #tpu.memory_space<vmem>>, vector<1x320x2xbf16>
    %4 = vector.shape_cast %3 : vector<1x320x2xbf16> to vector<320x2xbf16>
    %cst_6 = arith.constant dense<0.000000e+00> : vector<10x2xf32>
    %5 = tpu.matmul %2, %4, %cst_6 {dimension_numbers = #tpu.dot_dimension_numbers<[1], [0], [0], [1], [0, 0, 1, 1], [], []>} : vector<10x320xbf16>, vector<320x2xbf16>, vector<10x2xf32> -> vector<10x2xf32>
    %c0_7 = arith.constant 0 : index
    %c0_8 = arith.constant 0 : index
    %6 = vector.load %arg9[%c0_7, %c0_8] : memref<10x2xf32, #tpu.memory_space<vmem>>, vector<10x2xf32>
    tpu.vector_store %arg9[%c0_7, %c0_8], %5 {strides = array<i32>} : memref<10x2xf32, #tpu.memory_space<vmem>>, vector<10x2xf32>,
    %c0_9 = arith.constant 0 : index
    %c0_10 = arith.constant 0 : index
    %7 = vector.load %arg10[%c0_9, %c0_10] : memref<4x2xf32, #tpu.memory_space<vmem>>, vector<2x2xf32>
    %c0_11 = arith.constant 0 : index
    %c0_12 = arith.constant 0 : index
    %8 = vector.load %arg9[%c0_11, %c0_12] : memref<10x2xf32, #tpu.memory_space<vmem>>, vector<2x2xf32>
    %9 = arith.addf %7, %8 : vector<2x2xf32>
    %c0_13 = arith.constant 0 : index
    %c0_14 = arith.constant 0 : index
    %10 = vector.load %arg10[%c0_13, %c0_14] : memref<4x2xf32, #tpu.memory_space<vmem>>, vector<2x2xf32>
    tpu.vector_store %arg10[%c0_13, %c0_14], %9 {strides = array<i32>} : memref<4x2xf32, #tpu.memory_space<vmem>>, vector<2x2xf32>,
    %c2 = arith.constant 2 : index
    %c0_15 = arith.constant 0 : index
    %11 = vector.load %arg10[%c2, %c0_15] : memref<4x2xf32, #tpu.memory_space<vmem>>, vector<2x2xf32>
    %c5 = arith.constant 5 : index
    %c0_16 = arith.constant 0 : index
    %12 = vector.load %arg9[%c5, %c0_16] : memref<10x2xf32, #tpu.memory_space<vmem>>, vector<2x2xf32>
    %13 = arith.addf %11, %12 : vector<2x2xf32>
    %c2_17 = arith.constant 2 : index
    %c0_18 = arith.constant 0 : index
    %14 = vector.load %arg10[%c2_17, %c0_18] : memref<4x2xf32, #tpu.memory_space<vmem>>, vector<2x2xf32>
    tpu.vector_store %arg10[%c2_17, %c0_18], %13 {strides = array<i32>} : memref<4x2xf32, #tpu.memory_space<vmem>>, vector<2x2xf32>,
    %c0_19 = arith.constant 0 : index
    %c0_20 = arith.constant 0 : index
    %15 = vector.load %arg1[%c0_19, %c0_20] : memref<10x320xbf16, #tpu.memory_space<vmem>>, vector<10x320xbf16>
    %c1 = arith.constant 1 : index
    %c0_21 = arith.constant 0 : index
    %c0_22 = arith.constant 0 : index
    %16 = vector.load %arg2[%c1, %c0_21, %c0_22] : memref<4x320x2xbf16, #tpu.memory_space<vmem>>, vector<1x320x2xbf16>
    %17 = vector.shape_cast %16 : vector<1x320x2xbf16> to vector<320x2xbf16>
    %cst_23 = arith.constant dense<0.000000e+00> : vector<10x2xf32>
    %18 = tpu.matmul %15, %17, %cst_23 {dimension_numbers = #tpu.dot_dimension_numbers<[1], [0], [0], [1], [0, 0, 1, 1], [], []>} : vector<10x320xbf16>, vector<320x2xbf16>, vector<10x2xf32> -> vector<10x2xf32>
    %c0_24 = arith.constant 0 : index
    %c0_25 = arith.constant 0 : index
    %19 = vector.load %arg9[%c0_24, %c0_25] : memref<10x2xf32, #tpu.memory_space<vmem>>, vector<10x2xf32>
    tpu.vector_store %arg9[%c0_24, %c0_25], %18 {strides = array<i32>} : memref<10x2xf32, #tpu.memory_space<vmem>>, vector<10x2xf32>,
    %c0_26 = arith.constant 0 : index
    %c0_27 = arith.constant 0 : index
    %20 = vector.load %arg10[%c0_26, %c0_27] : memref<4x2xf32, #tpu.memory_space<vmem>>, vector<2x2xf32>
    %c1_28 = arith.constant 1 : index
    %c0_29 = arith.constant 0 : index
    %21 = vector.load %arg9[%c1_28, %c0_29] : memref<10x2xf32, #tpu.memory_space<vmem>>, vector<2x2xf32>
    %22 = arith.addf %20, %21 : vector<2x2xf32>
    %c0_30 = arith.constant 0 : index
    %c0_31 = arith.constant 0 : index
    %23 = vector.load %arg10[%c0_30, %c0_31] : memref<4x2xf32, #tpu.memory_space<vmem>>, vector<2x2xf32>
    tpu.vector_store %arg10[%c0_30, %c0_31], %22 {strides = array<i32>} : memref<4x2xf32, #tpu.memory_space<vmem>>, vector<2x2xf32>,
    %c2_32 = arith.constant 2 : index
    %c0_33 = arith.constant 0 : index
    %24 = vector.load %arg10[%c2_32, %c0_33] : memref<4x2xf32, #tpu.memory_space<vmem>>, vector<2x2xf32>
    %c6 = arith.constant 6 : index
    %c0_34 = arith.constant 0 : index
    %25 = vector.load %arg9[%c6, %c0_34] : memref<10x2xf32, #tpu.memory_space<vmem>>, vector<2x2xf32>
    %26 = arith.addf %24, %25 : vector<2x2xf32>
    %c2_35 = arith.constant 2 : index
    %c0_36 = arith.constant 0 : index
    %27 = vector.load %arg10[%c2_35, %c0_36] : memref<4x2xf32, #tpu.memory_space<vmem>>, vector<2x2xf32>
    tpu.vector_store %arg10[%c2_35, %c0_36], %26 {strides = array<i32>} : memref<4x2xf32, #tpu.memory_space<vmem>>, vector<2x2xf32>,
    %c0_37 = arith.constant 0 : index
    %c0_38 = arith.constant 0 : index
    %28 = vector.load %arg1[%c0_37, %c0_38] : memref<10x320xbf16, #tpu.memory_space<vmem>>, vector<10x320xbf16>
    %c2_39 = arith.constant 2 : index
    %c0_40 = arith.constant 0 : index
    %c0_41 = arith.constant 0 : index
    %29 = vector.load %arg2[%c2_39, %c0_40, %c0_41] : memref<4x320x2xbf16, #tpu.memory_space<vmem>>, vector<1x320x2xbf16>
    %30 = vector.shape_cast %29 : vector<1x320x2xbf16> to vector<320x2xbf16>
    %cst_42 = arith.constant dense<0.000000e+00> : vector<10x2xf32>
    %31 = tpu.matmul %28, %30, %cst_42 {dimension_numbers = #tpu.dot_dimension_numbers<[1], [0], [0], [1], [0, 0, 1, 1], [], []>} : vector<10x320xbf16>, vector<320x2xbf16>, vector<10x2xf32> -> vector<10x2xf32>
    %c0_43 = arith.constant 0 : index
    %c0_44 = arith.constant 0 : index
    %32 = vector.load %arg9[%c0_43, %c0_44] : memref<10x2xf32, #tpu.memory_space<vmem>>, vector<10x2xf32>
    tpu.vector_store %arg9[%c0_43, %c0_44], %31 {strides = array<i32>} : memref<10x2xf32, #tpu.memory_space<vmem>>, vector<10x2xf32>,
    %c0_45 = arith.constant 0 : index
    %c0_46 = arith.constant 0 : index
    %33 = vector.load %arg10[%c0_45, %c0_46] : memref<4x2xf32, #tpu.memory_space<vmem>>, vector<2x2xf32>
    %c2_47 = arith.constant 2 : index
    %c0_48 = arith.constant 0 : index
    %34 = vector.load %arg9[%c2_47, %c0_48] : memref<10x2xf32, #tpu.memory_space<vmem>>, vector<2x2xf32>
    %35 = arith.addf %33, %34 : vector<2x2xf32>
    %c0_49 = arith.constant 0 : index
    %c0_50 = arith.constant 0 : index
    %36 = vector.load %arg10[%c0_49, %c0_50] : memref<4x2xf32, #tpu.memory_space<vmem>>, vector<2x2xf32>
    tpu.vector_store %arg10[%c0_49, %c0_50], %35 {strides = array<i32>} : memref<4x2xf32, #tpu.memory_space<vmem>>, vector<2x2xf32>,
    %c2_51 = arith.constant 2 : index
    %c0_52 = arith.constant 0 : index
    %37 = vector.load %arg10[%c2_51, %c0_52] : memref<4x2xf32, #tpu.memory_space<vmem>>, vector<2x2xf32>
    %c7 = arith.constant 7 : index
    %c0_53 = arith.constant 0 : index
    %38 = vector.load %arg9[%c7, %c0_53] : memref<10x2xf32, #tpu.memory_space<vmem>>, vector<2x2xf32>
    %39 = arith.addf %37, %38 : vector<2x2xf32>
    %c2_54 = arith.constant 2 : index
    %c0_55 = arith.constant 0 : index
    %40 = vector.load %arg10[%c2_54, %c0_55] : memref<4x2xf32, #tpu.memory_space<vmem>>, vector<2x2xf32>
    tpu.vector_store %arg10[%c2_54, %c0_55], %39 {strides = array<i32>} : memref<4x2xf32, #tpu.memory_space<vmem>>, vector<2x2xf32>,
    %c0_56 = arith.constant 0 : index
    %c0_57 = arith.constant 0 : index
    %41 = vector.load %arg1[%c0_56, %c0_57] : memref<10x320xbf16, #tpu.memory_space<vmem>>, vector<10x320xbf16>
    %c3 = arith.constant 3 : index
    %c0_58 = arith.constant 0 : index
    %c0_59 = arith.constant 0 : index
    %42 = vector.load %arg2[%c3, %c0_58, %c0_59] : memref<4x320x2xbf16, #tpu.memory_space<vmem>>, vector<1x320x2xbf16>
    %43 = vector.shape_cast %42 : vector<1x320x2xbf16> to vector<320x2xbf16>
    %cst_60 = arith.constant dense<0.000000e+00> : vector<10x2xf32>
    %44 = tpu.matmul %41, %43, %cst_60 {dimension_numbers = #tpu.dot_dimension_numbers<[1], [0], [0], [1], [0, 0, 1, 1], [], []>} : vector<10x320xbf16>, vector<320x2xbf16>, vector<10x2xf32> -> vector<10x2xf32>
    %c0_61 = arith.constant 0 : index
    %c0_62 = arith.constant 0 : index
    %45 = vector.load %arg9[%c0_61, %c0_62] : memref<10x2xf32, #tpu.memory_space<vmem>>, vector<10x2xf32>
    tpu.vector_store %arg9[%c0_61, %c0_62], %44 {strides = array<i32>} : memref<10x2xf32, #tpu.memory_space<vmem>>, vector<10x2xf32>,
    %c0_63 = arith.constant 0 : index
    %c0_64 = arith.constant 0 : index
    %46 = vector.load %arg10[%c0_63, %c0_64] : memref<4x2xf32, #tpu.memory_space<vmem>>, vector<2x2xf32>
    %c3_65 = arith.constant 3 : index
    %c0_66 = arith.constant 0 : index
    %47 = vector.load %arg9[%c3_65, %c0_66] : memref<10x2xf32, #tpu.memory_space<vmem>>, vector<2x2xf32>
    %48 = arith.addf %46, %47 : vector<2x2xf32>
    %c0_67 = arith.constant 0 : index
    %c0_68 = arith.constant 0 : index
    %49 = vector.load %arg10[%c0_67, %c0_68] : memref<4x2xf32, #tpu.memory_space<vmem>>, vector<2x2xf32>
    tpu.vector_store %arg10[%c0_67, %c0_68], %48 {strides = array<i32>} : memref<4x2xf32, #tpu.memory_space<vmem>>, vector<2x2xf32>,
    %c2_69 = arith.constant 2 : index
    %c0_70 = arith.constant 0 : index
    %50 = vector.load %arg10[%c2_69, %c0_70] : memref<4x2xf32, #tpu.memory_space<vmem>>, vector<2x2xf32>
    %c8 = arith.constant 8 : index
    %c0_71 = arith.constant 0 : index
    %51 = vector.load %arg9[%c8, %c0_71] : memref<10x2xf32, #tpu.memory_space<vmem>>, vector<2x2xf32>
    %52 = arith.addf %50, %51 : vector<2x2xf32>
    %c2_72 = arith.constant 2 : index
    %c0_73 = arith.constant 0 : index
    %53 = vector.load %arg10[%c2_72, %c0_73] : memref<4x2xf32, #tpu.memory_space<vmem>>, vector<2x2xf32>
    tpu.vector_store %arg10[%c2_72, %c0_73], %52 {strides = array<i32>} : memref<4x2xf32, #tpu.memory_space<vmem>>, vector<2x2xf32>,
    %c0_74 = arith.constant 0 : index
    %c0_75 = arith.constant 0 : index
    %54 = vector.load %arg10[%c0_74, %c0_75] : memref<4x2xf32, #tpu.memory_space<vmem>>, vector<4x2xf32>
    %c0_76 = arith.constant 0 : index
    %c0_77 = arith.constant 0 : index
    %55 = vector.load %arg3[%c0_76, %c0_77] : memref<1x2xf32, #tpu.memory_space<vmem>>, vector<1x2xf32>
    %56 = vector.broadcast %55 : vector<1x2xf32> to vector<4x2xf32>
    %57 = arith.addf %54, %56 : vector<4x2xf32>
    %c0_78 = arith.constant 0 : index
    %c0_79 = arith.constant 0 : index
    %58 = vector.load %arg8[%c0_78, %c0_79] : memref<4x2xf32, #tpu.memory_space<vmem>>, vector<4x2xf32>
    tpu.vector_store %arg8[%c0_78, %c0_79], %57 {strides = array<i32>} : memref<4x2xf32, #tpu.memory_space<vmem>>, vector<4x2xf32>,
    return
  }
  func.func @transform_0(%arg0: i32) -> (i32, i32) {
    %c0_i32 = arith.constant 0 : i32
    %c0_i32_0 = arith.constant 0 : i32
    %c0_i32_1 = arith.constant 0 : i32
    return %c0_i32, %c0_i32_0 : i32, i32
  }
  func.func @transform_1(%arg0: i32) -> (i32, i32, i32) {
    %c0_i32 = arith.constant 0 : i32
    %c0_i32_0 = arith.constant 0 : i32
    %c0_i32_1 = arith.constant 0 : i32
    %c0_i32_2 = arith.constant 0 : i32
    return %c0_i32, %c0_i32_0, %c0_i32_1 : i32, i32, i32
  }
  func.func @transform_2(%arg0: i32) -> (i32, i32) {
    %c0_i32 = arith.constant 0 : i32
    %c0_i32_0 = arith.constant 0 : i32
    %c0_i32_1 = arith.constant 0 : i32
    return %c0_i32, %c0_i32_0 : i32, i32
  }
  func.func @transform_3(%arg0: i32) -> (i32, i32) {
    %c0_i32 = arith.constant 0 : i32
    %c0_i32_0 = arith.constant 0 : i32
    %c0_i32_1 = arith.constant 0 : i32
    return %c0_i32, %c0_i32_0 : i32, i32
  }
  func.func @transform_4(%arg0: i32) -> (i32, i32) {
    %c0_i32 = arith.constant 0 : i32
    %c0_i32_0 = arith.constant 0 : i32
    %c0_i32_1 = arith.constant 0 : i32
    return %c0_i32, %c0_i32_0 : i32, i32
  }
  func.func @transform_5(%arg0: i32) -> (i32, i32) {
    %c0_i32 = arith.constant 0 : i32
    %c0_i32_0 = arith.constant 0 : i32
    %c0_i32_1 = arith.constant 0 : i32
    return %c0_i32, %c0_i32_0 : i32, i32
  }
  func.func @transform_6(%arg0: i32) -> (i32, i32) {
    %c0_i32 = arith.constant 0 : i32
    %c0_i32_0 = arith.constant 0 : i32
    %c0_i32_1 = arith.constant 0 : i32
    return %c0_i32, %c0_i32_0 : i32, i32
  }
  func.func @transform_7(%arg0: i32) -> (i32, i32) {
    %c0_i32 = arith.constant 0 : i32
    %c0_i32_0 = arith.constant 0 : i32
    %c0_i32_1 = arith.constant 0 : i32
    return %c0_i32, %c0_i32_0 : i32, i32
  }
}

</mosaic_0001>

<bundles_post_ra>
// kernel: _lambda_.5
= control target key start
LH: loop header
LB: loop body
LE: loop exit
PB: predicated region body
PF: predicated region fallthrough
CT: control target
= control target key end

     0   :  { %v1370_v0 = vmov 0   ;;  %vm154_vm0 = vcmask 64512   ;;  %vm170_vm1 = vcmask 1043456   ;;  %v1371_v61 = vmov 0.0   ;;  %s1713_s3 = inlined_call_operand.vmem [shape: f32[128,128], index: 3, kind: input, shape index: {}]   ;;  %s1714_s4 = inlined_call_operand.vmem [shape: f32[1,128], index: 4, kind: input, shape index: {}]   ;;  %s1715_s5 = inlined_call_operand.vmem [shape: f32[1,128], index: 5, kind: input, shape index: {}]   ;;  %s1716_s6 = inlined_call_operand.vmem [shape: f32[62,1], index: 6, kind: input, shape index: {}]   ;;  %s1717_s1 = inlined_call_operand.vmem [shape: bf16[4,136,128], index: 1, kind: input, shape index: {}]   ;;  %s1718_s0 = inlined_call_operand.vmem [shape: bf16[68,136], index: 0, kind: input, shape index: {}]   ;;  %s1719_s2 = inlined_call_operand.vmem [shape: f32[1,128], index: 2, kind: input, shape index: {}]   ;;  %s1720_s7 = inlined_call_operand.vmem [shape: bf16[62,128], index: 7, kind: output, shape index: {}]  }
   0x1   :  { %174 = vmatprep.subr.bf16.mxu0 %v1370_v0  ;;  %v1314_v1 = vld [vmem:[%s1717_s1] sm:$0xff]   ;;  %425 = vmatprep.subr.bf16.mxu1 %v1370_v0  ;;  %v1315_v2 = vld [vmem:[%s1717_s1 + $0x8] sm:$0xff]   ;;  %v1316_v5 = vld [vmem:[%s1717_s1 + $0x10] sm:$0xff]   ;;  %32 = vst [vmem:[#allocation3 + $0x28] sm:$0xff] %v1371_v61 }
   0x2   :  { %175 = vmatpush1.bf16.msra.mxu0 %v1314_v1  ;;  %v1317_v3 = vld [vmem:[%s1717_s1 + $0x44] sm:$0xff]   ;;  %v1319_v4 = vld [vmem:[%s1717_s1 + $0x4c] sm:$0xff]   ;;  %v1321_v6 = vld [vmem:[%s1717_s1 + $0x54] sm:$0xff]   ;;  %33 = vst [vmem:[#allocation3 + $0x30] sm:$0xff] %v1371_v61 }
   0x3   :  { %176 = vmatprep.subr.bf16.mxu0 %v1370_v0  ;;  %426 = vmatpush1.bf16.msra.mxu1 %v1317_v3  ;;  %v1318_v7 = vld [vmem:[%s1717_s1 + $0x18] sm:$0xff]   ;;  %v1320_v9 = vld [vmem:[%s1717_s1 + $0x20] sm:$0xff]   ;;  %v1322_v12 = vld [vmem:[%s1717_s1 + $0x28] sm:$0xff]   ;;  %30 = vst [vmem:[#allocation3 + $0x18] sm:$0xff] %v1371_v61 }
   0x4   :  { %427 = vmatprep.subr.bf16.mxu1 %v1370_v0  ;;  %v1323_v8 = vld [vmem:[%s1717_s1 + $0x5c] sm:$0xff]   ;;  %v1451_v10 = vld [vmem:[%s1718_s0 + $0x4] ss:$8 sps:$4 sm:$0xff]   ;;  %v1324_v14 = vld [vmem:[%s1717_s1 + $0x30] sm:$0xff]   ;;  %31 = vst [vmem:[#allocation3 + $0x20] sm:$0xff] %v1371_v61 }
   0x5   :  { %v1325_v11 = vld [vmem:[%s1717_s1 + $0x64] sm:$0xff]   ;;  %1150 = vmatprep.mubr.msk.bf16.mxu0 %vm154_vm0, %v1451_v10  ;;  %1191 = vmatprep.mubr.msk.bf16.mxu1 %vm154_vm0, %v1451_v10  ;;  %v1327_v13 = vld [vmem:[%s1717_s1 + $0x6c] sm:$0xff]   ;;  %v1329_v15 = vld [vmem:[%s1717_s1 + $0x74] sm:$0xff]   ;;  %34 = vst [vmem:[#allocation3 + $0x38] sm:$0x3f] %v1371_v61 }
   0x6   :  { %177 = vmatpush1.bf16.msra.mxu0 %v1315_v2  ;;  %v1326_v16 = vld [vmem:[%s1717_s1 + $0x38] sm:$0xff]   ;;  %v1328_v17 = vld [vmem:[%s1717_s1 + $0x40] ss:$0 sps:$4 sm:$0xff]   ;;  %v1335_v19 = vld [vmem:[%s1717_s1 + $0x84] ss:$0 sps:$4 sm:$0xff]  }
   0x7   :  { %178 = vmatprep.subr.bf16.mxu0 %v1370_v0  ;;  %428 = vmatpush1.bf16.msra.mxu1 %v1319_v4  ;;  %v1333_v18 = vld [vmem:[%s1717_s1 + $0x7c] sm:$0xff]   ;;  %v172_v20 = vsel %vm170_vm1, %v1328_v17, 0  ;;  %v1334_v22 = vld [vmem:[%s1717_s1 + $0x88] sm:$0xff]   ;;  %v423_v23 = vsel %vm170_vm1, %v1335_v19, 0  ;;  %v1336_v26 = vld [vmem:[%s1717_s1 + $0x90] sm:$0xff]  }
   0x8   :  { %429 = vmatprep.subr.bf16.mxu1 %v1370_v0  ;;  %v1496_v21 = vld [vmem:[%s1718_s0] ss:$8 sps:$4 sm:$0xff]   ;;  %v1506_v24 = vld [vmem:[%s1718_s0 + $0x14] ss:$8 sps:$4 sm:$0xff]   ;;  %v1341_v25 = vld [vmem:[%s1717_s1 + $0xcc] sm:$0xff]  }
   0x9   :  { %v1524_v27 = vld [vmem:[%s1718_s0 + $0x10] ss:$8 sps:$4 sm:$0xff]   ;;  %v1537_v30 = vld [vmem:[%s1718_s0 + $0x24] ss:$8 sps:$4 sm:$0xff]   ;;  %v1348_v31 = vld [vmem:[%s1717_s1 + $0xdc] sm:$0xff]  }
   0xa   :  { %179 = vmatpush1.bf16.msra.mxu0 %v1316_v5  ;;  %v1346_v28 = vld [vmem:[%s1717_s1 + $0xd4] sm:$0xff]   ;;  %v1344_v32 = vld [vmem:[%s1717_s1 + $0xa0] sm:$0xff]   ;;  %v1347_v35 = vld [vmem:[%s1717_s1 + $0xa8] sm:$0xff]  }
   0xb   :  { %180 = vmatprep.subr.bf16.mxu0 %v1370_v0  ;;  %430 = vmatpush1.bf16.msra.mxu1 %v1321_v6  ;;  %v1340_v29 = vld [vmem:[%s1717_s1 + $0x98] sm:$0xff]   ;;  %v1556_v33 = vld [vmem:[%s1718_s0 + $0x20] ss:$8 sps:$4 sm:$0xff]   ;;  %v1355_v37 = vld [vmem:[%s1717_s1 + $0xec] sm:$0xff]  }
   0xc   :  { %431 = vmatprep.subr.bf16.mxu1 %v1370_v0  ;;  %v1353_v34 = vld [vmem:[%s1717_s1 + $0xe4] sm:$0xff]   ;;  %v1569_v36 = vld [vmem:[%s1718_s0 + $0x34] ss:$8 sps:$4 sm:$0xff]   ;;  %v1351_v40 = vld [vmem:[%s1718_s0 + $0x30] ss:$8 sps:$4 sm:$0xff]  }
   0xd   :  { %v1352_v38 = vld [vmem:[%s1717_s1 + $0xb0] sm:$0xff]   ;;  %v43_v39 = vld [vmem:[%s1718_s0 + $0x40] sm:$0x33]  ;;  %v1354_v42 = vld [vmem:[%s1717_s1 + $0xb8] sm:$0xff]  }
   0xe   :  { %181 = vmatpush1.bf16.msra.mxu0 %v1318_v7  ;;  %v1359_v41 = vld [vmem:[%s1717_s1 + $0xf4] sm:$0xff]   ;;  %v1140_v43 = vcombine.high %v43_v39, %v43_v39  ;;  %v295_v44 = vld [vmem:[%s1718_s0 + $0x40] sm:$0x33]  ;;  %v1360_v48 = vld [vmem:[%s1717_s1 + $0xc8] ss:$0 sps:$4 sm:$0xff]   ;;  %v1139_v49 = vcombine.low %v43_v39, %v43_v39 }
   0xf   :  { %182 = vmatprep.subr.bf16.mxu0 %v1370_v0  ;;  %432 = vmatpush1.bf16.msra.mxu1 %v1323_v8  ;;  %v1361_v45 = vld [vmem:[%s1717_s1 + $0xfc] sm:$0xff]   ;;  %v1181_v46 = vcombine.high %v295_v44, %v295_v44  ;;  %v1364_v50 = vld [vmem:[%s1717_s1 + $0x104] sm:$0xff]   ;;  %v1365_v51 = vld [vmem:[%s1717_s1 + $0x10c] ss:$0 sps:$4 sm:$0xff]   ;;  %v674_v52 = vsel %vm170_vm1, %v1360_v48, 0  ;;  %v1180_v53 = vcombine.low %v295_v44, %v295_v44 }
  0x10   :  { %433 = vmatprep.subr.bf16.mxu1 %v1370_v0  ;;  %v1358_v47 = vld [vmem:[%s1717_s1 + $0xc0] sm:$0xff]   ;;  %v925_v54 = vsel %vm170_vm1, %v1365_v51, 0 }
  0x11   :  { %v546_v55 = vld [vmem:[%s1718_s0 + $0x40] sm:$0x33] }
  0x12   :  { %183 = vmatpush1.bf16.msra.mxu0 %v1320_v9  ;;  %v1222_v56 = vcombine.high %v546_v55, %v546_v55  ;;  %v797_v57 = vld [vmem:[%s1718_s0 + $0x40] sm:$0x33]  ;;  %v1221_v59 = vcombine.low %v546_v55, %v546_v55 }
  0x13   :  { %184 = vmatprep.subr.bf16.mxu0 %v1370_v0  ;;  %434 = vmatpush1.bf16.msra.mxu1 %v1325_v11  ;;  %v1263_v58 = vcombine.high %v797_v57, %v797_v57  ;;  %v1262_v60 = vcombine.low %v797_v57, %v797_v57 }
  0x14   :  { %435 = vmatprep.subr.bf16.mxu1 %v1370_v0 }
  0x16   :  { %185 = vmatpush1.bf16.msra.mxu0 %v1322_v12 }
  0x17   :  { %186 = vmatprep.subr.bf16.mxu0 %v1370_v0  ;;  %436 = vmatpush1.bf16.msra.mxu1 %v1327_v13 }
  0x18   :  { %437 = vmatprep.subr.bf16.mxu1 %v1370_v0 }
  0x1a   :  { %187 = vmatpush1.bf16.msra.mxu0 %v1324_v14 }
  0x1b   :  { %188 = vmatprep.subr.bf16.mxu0 %v1370_v0  ;;  %438 = vmatpush1.bf16.msra.mxu1 %v1329_v15  ;;  %v258_v15 = vld [vmem:[#allocation3 + $0x18] sm:$0x7f] }
  0x1c   :  { %439 = vmatprep.subr.bf16.mxu1 %v1370_v0 }
  0x1e   :  { %189 = vmatpush1.bf16.msra.mxu0 %v1326_v16 }
  0x1f   :  { %190 = vmatprep.subr.bf16.mxu0 %v1370_v0  ;;  %440 = vmatpush1.bf16.msra.mxu1 %v1333_v18 }
  0x20   :  { %441 = vmatprep.subr.bf16.mxu1 %v1370_v0 }
  0x22   :  { %191 = vmatpush1.bf16.msra.mxu0 %v172_v20 }
  0x23   :  { %676 = vmatprep.subr.bf16.mxu0 %v1370_v0  ;;  %442 = vmatpush1.bf16.msra.mxu1 %v423_v23 }
  0x24   :  { %927 = vmatprep.subr.bf16.mxu1 %v1370_v0 }
  0x25   :  { %207 = vmatmul.mubr.bf16.vlgmr.msra.gmra.mrb[0].mxu0 %v1496_v21 }
  0x26   :  { %677 = vmatpush1.bf16.msra.mxu0 %v1334_v22  ;;  %1151 = vmatprep.mubr.msk.bf16.mxu0 %vm154_vm0, %v1506_v24 }
  0x27   :  { %678 = vmatprep.subr.bf16.mxu0 %v1370_v0  ;;  %458 = vmatmul.mubr.bf16.vlgmr.msra.gmra.mrb[0].mxu1 %v1496_v21 }
  0x28   :  { %928 = vmatpush1.bf16.msra.mxu1 %v1341_v25  ;;  %1192 = vmatprep.mubr.msk.bf16.mxu1 %vm154_vm0, %v1506_v24 }
  0x29   :  { %929 = vmatprep.subr.bf16.mxu1 %v1370_v0 }
  0x2a   :  { %679 = vmatpush1.bf16.msra.mxu0 %v1336_v26 }
  0x2b   :  { %680 = vmatprep.subr.bf16.mxu0 %v1370_v0 }
  0x2c   :  { %930 = vmatpush1.bf16.msra.mxu1 %v1346_v28 }
  0x2d   :  { %215 = vmatmul.mubr.bf16.gmra.mrb[4].mxu0 %v1524_v27  ;;  %931 = vmatprep.subr.bf16.mxu1 %v1370_v0 }
  0x2e   :  { %681 = vmatpush1.bf16.msra.mxu0 %v1340_v29  ;;  %1152 = vmatprep.mubr.msk.bf16.mxu0 %vm154_vm0, %v1537_v30 }
  0x2f   :  { %682 = vmatprep.subr.bf16.mxu0 %v1370_v0  ;;  %466 = vmatmul.mubr.bf16.gmra.mrb[4].mxu1 %v1524_v27 }
  0x30   :  { %932 = vmatpush1.bf16.msra.mxu1 %v1348_v31  ;;  %1193 = vmatprep.mubr.msk.bf16.mxu1 %vm154_vm0, %v1537_v30 }
  0x31   :  { %933 = vmatprep.subr.bf16.mxu1 %v1370_v0 }
  0x32   :  { %683 = vmatpush1.bf16.msra.mxu0 %v1344_v32 }
  0x33   :  { %684 = vmatprep.subr.bf16.mxu0 %v1370_v0 }
  0x34   :  { %934 = vmatpush1.bf16.msra.mxu1 %v1353_v34 }
  0x35   :  { %223 = vmatmul.mubr.bf16.gmra.mrb[8].mxu0 %v1556_v33  ;;  %935 = vmatprep.subr.bf16.mxu1 %v1370_v0 }
  0x36   :  { %685 = vmatpush1.bf16.msra.mxu0 %v1347_v35  ;;  %1153 = vmatprep.mubr.msk.bf16.mxu0 %vm154_vm0, %v1569_v36 }
  0x37   :  { %686 = vmatprep.subr.bf16.mxu0 %v1370_v0  ;;  %474 = vmatmul.mubr.bf16.gmra.mrb[8].mxu1 %v1556_v33 }
  0x38   :  { %936 = vmatpush1.bf16.msra.mxu1 %v1355_v37  ;;  %1194 = vmatprep.mubr.msk.bf16.mxu1 %vm154_vm0, %v1569_v36 }
  0x39   :  { %937 = vmatprep.subr.bf16.mxu1 %v1370_v0 }
  0x3a   :  { %687 = vmatpush1.bf16.msra.mxu0 %v1352_v38 }
  0x3b   :  { %688 = vmatprep.subr.bf16.mxu0 %v1370_v0 }
  0x3c   :  { %938 = vmatpush1.bf16.msra.mxu1 %v1359_v41 }
  0x3d   :  { %231 = vmatmul.mubr.bf16.gmra.mrb[12].mxu0 %v1351_v40  ;;  %939 = vmatprep.subr.bf16.mxu1 %v1370_v0 }
  0x3e   :  { %689 = vmatpush1.bf16.msra.mxu0 %v1354_v42  ;;  %1154 = vmatprep.mubr.msk.bf16.mxu0 %vm154_vm0, %v1140_v43 }
  0x3f   :  { %690 = vmatprep.subr.bf16.mxu0 %v1370_v0  ;;  %482 = vmatmul.mubr.bf16.gmra.mrb[12].mxu1 %v1351_v40 }
  0x40   :  { %940 = vmatpush1.bf16.msra.mxu1 %v1361_v45  ;;  %1195 = vmatprep.mubr.msk.bf16.mxu1 %vm154_vm0, %v1181_v46  ;;  %v274_v46 = vld [vmem:[#allocation3 + $0x37] sm:$0x7f] }
  0x41   :  { %941 = vmatprep.subr.bf16.mxu1 %v1370_v0 }
  0x42   :  { %691 = vmatpush1.bf16.msra.mxu0 %v1358_v47 }
  0x43   :  { %692 = vmatprep.subr.bf16.mxu0 %v1370_v0 }
  0x44   :  { %942 = vmatpush1.bf16.msra.mxu1 %v1364_v50 }
  0x45   :  { %239 = vmatmul.mubr.bf16.gmra.mrb[16].mxu0 %v1139_v49  ;;  %943 = vmatprep.subr.bf16.mxu1 %v1370_v0 }
  0x46   :  { %693 = vmatpush1.bf16.msra.mxu0 %v674_v52  ;;  %1232 = vmatprep.mubr.msk.bf16.mxu0 %vm154_vm0, %v1451_v10 }
  0x47   :  { %490 = vmatmul.mubr.bf16.gmra.mrb[16].mxu1 %v1180_v53 }
  0x48   :  { %944 = vmatpush1.bf16.msra.mxu1 %v925_v54  ;;  %1273 = vmatprep.mubr.msk.bf16.mxu1 %vm154_vm0, %v1451_v10 }
  0x4d   :  { %709 = vmatmul.mubr.bf16.vlgmr.msra.gmra.mrb[20].mxu0 %v1496_v21 }
  0x4e   :  { %1233 = vmatprep.mubr.msk.bf16.mxu0 %vm154_vm0, %v1506_v24 }
  0x4f   :  { %960 = vmatmul.mubr.bf16.vlgmr.msra.gmra.mrb[20].mxu1 %v1496_v21 }
  0x50   :  { %1274 = vmatprep.mubr.msk.bf16.mxu1 %vm154_vm0, %v1506_v24 }
  0x55   :  { %717 = vmatmul.mubr.bf16.gmra.mrb[24].mxu0 %v1524_v27 }
  0x56   :  { %1234 = vmatprep.mubr.msk.bf16.mxu0 %vm154_vm0, %v1537_v30 }
  0x57   :  { %968 = vmatmul.mubr.bf16.gmra.mrb[24].mxu1 %v1524_v27 }
  0x58   :  { %1275 = vmatprep.mubr.msk.bf16.mxu1 %vm154_vm0, %v1537_v30 }
  0x5d   :  { %725 = vmatmul.mubr.bf16.gmra.mrb[28].mxu0 %v1556_v33 }
  0x5e   :  { %1235 = vmatprep.mubr.msk.bf16.mxu0 %vm154_vm0, %v1569_v36 }
  0x5f   :  { %976 = vmatmul.mubr.bf16.gmra.mrb[28].mxu1 %v1556_v33 }
  0x60   :  { %1276 = vmatprep.mubr.msk.bf16.mxu1 %vm154_vm0, %v1569_v36 }
  0x65   :  { %733 = vmatmul.mubr.bf16.gmra.mrb[32].mxu0 %v1351_v40 }
  0x66   :  { %1236 = vmatprep.mubr.msk.bf16.mxu0 %vm154_vm0, %v1222_v56 }
  0x67   :  { %984 = vmatmul.mubr.bf16.gmra.mrb[32].mxu1 %v1351_v40 }
  0x68   :  { %1277 = vmatprep.mubr.msk.bf16.mxu1 %vm154_vm0, %v1263_v58 }
  0x6d   :  { %741 = vmatmul.mubr.bf16.gmra.mrb[36].mxu0 %v1221_v59 }
  0x6f   :  { %992 = vmatmul.mubr.bf16.gmra.mrb[36].mxu1 %v1262_v60 }
  0xf8   :  { %v1658_v62 = vpop.f32.mrb[0].mxu0 }
  0xf9   :  { %v210_v63 = vpop.f32.mrb[1].mxu0 }
  0xfa   :  { %v1660_v0 = vpop.f32.mrb[2].mxu0  ;;  %v459_v2 = vpop.f32.mrb[0].mxu1 }
  0xfb   :  { %v213_v1 = vpop.f32.mrb[3].mxu0  ;;  %497 = vst [vmem:[#allocation2] sm:$0xff] %v459_v2  ;;  %v461_v3 = vpop.f32.mrb[1].mxu1 }
  0xfc   :  { %v462_v4 = vpop.f32.mrb[2].mxu1 }
  0xfd   :  { %498 = vst [vmem:[#allocation2 + $0x8] sm:$0xff] %v462_v4  ;;  %v464_v5 = vpop.f32.mrb[3].mxu1 }
 0x100   :  { %v1662_v6 = vpop.f32.mrb[4].mxu0 }
 0x101   :  { %v218_v7 = vpop.f32.mrb[5].mxu0 }
 0x102   :  { %v219_v8 = vpop.f32.mrb[6].mxu0  ;;  %v467_v10 = vpop.f32.mrb[4].mxu1 }
 0x103   :  { %249 = vst [vmem:[#allocation2 + $0x18] sm:$0xff] %v219_v8  ;;  %v221_v9 = vpop.f32.mrb[7].mxu0  ;;  %499 = vst [vmem:[#allocation2 + $0x10] sm:$0xff] %v467_v10  ;;  %v469_v11 = vpop.f32.mrb[5].mxu1 }
 0x104   :  { %v470_v12 = vpop.f32.mrb[6].mxu1  ;;  %v510_v49 = vld [vmem:[#allocation2 + $0x1] sm:$0xff] }
 0x105   :  { %v472_v13 = vpop.f32.mrb[7].mxu1 }
 0x108   :  { %v224_v14 = vpop.f32.mrb[8].mxu0 }
 0x109   :  { %250 = vst [vmem:[#allocation2 + $0x20] sm:$0xff] %v224_v14  ;;  %v226_v16 = vpop.f32.mrb[9].mxu0 }
 0x10a   :  { %v227_v17 = vpop.f32.mrb[10].mxu0  ;;  %v262_v18 = vld [vmem:[#allocation2 + $0x18] sm:$0x7f]  ;;  %v475_v21 = vpop.f32.mrb[8].mxu1  ;;  %v511_v53 = vld [vmem:[#allocation2 + $0x9] sm:$0xff] }
 0x10b   :  { %251 = vst [vmem:[#allocation2 + $0x28] sm:$0xff] %v227_v17  ;;  %v266_v19 = vadd.f32 %v262_v18, %v258_v15  ;;  %500 = vst [vmem:[#allocation2 + $0x18] sm:$0xff] %v470_v12  ;;  %v229_v20 = vpop.f32.mrb[11].mxu0  ;;  %v477_v22 = vpop.f32.mrb[9].mxu1 }
 0x10c   :  { %v478_v23 = vpop.f32.mrb[10].mxu1  ;;  %v514_v22 = vadd.f32 %v510_v49, %v1658_v62 }
 0x10d   :  { %270 = vst [vmem:[#allocation3 + $0x18] sm:$0x7f] %v266_v19  ;;  %v480_v24 = vpop.f32.mrb[11].mxu1 }
 0x110   :  { %v232_v25 = vpop.f32.mrb[12].mxu0 }
 0x111   :  { %252 = vst [vmem:[#allocation2 + $0x30] sm:$0xff] %v232_v25  ;;  %v234_v26 = vpop.f32.mrb[13].mxu0  ;;  %v515_v25 = vadd.f32 %v511_v53, %v1660_v0  ;;  %v271_v53 = vld [vmem:[#allocation3 + $0x1f] sm:$0xff] }
 0x112   :  { %v1664_v27 = vld [vmem:[#allocation2 + $0x22] sm:$0xff]  ;;  %v235_v28 = vpop.f32.mrb[14].mxu0  ;;  %v483_v30 = vpop.f32.mrb[12].mxu1  ;;  %v513_v33 = vld [vmem:[#allocation2 + $0x19] sm:$0x7f]  ;;  %v512_v60 = vld [vmem:[#allocation2 + $0x11] sm:$0xff] }
 0x113   :  { %501 = vst [vmem:[#allocation2 + $0x20] sm:$0xff] %v475_v21  ;;  %253 = vst [vmem:[#allocation2 + $0x38] sm:$0xff] %v235_v28  ;;  %v237_v29 = vpop.f32.mrb[15].mxu0  ;;  %v485_v31 = vpop.f32.mrb[13].mxu1 }
 0x114   :  { %v509_v32 = vld [vmem:[#allocation3 + $0x18] sm:$0x7f]  ;;  %v486_v34 = vpop.f32.mrb[14].mxu1 }
 0x115   :  { %v517_v35 = vadd.f32 %v513_v33, %v509_v32  ;;  %v488_v36 = vpop.f32.mrb[15].mxu1  ;;  %v1679_v29 = vld [vmem:[%s1719_s2] ss:$0 sm:$0xff] }
 0x117   :  { %521 = vst [vmem:[#allocation3 + $0x18] sm:$0x7f] %v517_v35 }
 0x118   :  { %v1666_v37 = vld [vmem:[#allocation2 + $0x2a] sm:$0xff]  ;;  %v240_v38 = vpop.f32.mrb[16].mxu0 }
 0x119   :  { %502 = vst [vmem:[#allocation2 + $0x28] sm:$0xff] %v478_v23  ;;  %254 = vst [vmem:[#allocation2 + $0x40] sm:$0xf] %v240_v38  ;;  %v242_v39 = vpop.f32.mrb[17].mxu0 }
 0x11a   :  { %v1668_v40 = vld [vmem:[#allocation2 + $0x32] sm:$0xff]  ;;  %v243_v41 = vpop.f32.mrb[18].mxu0  ;;  %v491_v43 = vpop.f32.mrb[16].mxu1 }
 0x11b   :  { %503 = vst [vmem:[#allocation2 + $0x30] sm:$0xff] %v483_v30  ;;  %v244_v42 = vpop.f32.mrb[19].mxu0  ;;  %v493_v44 = vpop.f32.mrb[17].mxu1 }
 0x11c   :  { %v494_v45 = vpop.f32.mrb[18].mxu1 }
 0x11d   :  { %v495_v47 = vpop.f32.mrb[19].mxu1 }
 0x11e   :  { %v760_v28 = vld [vmem:[#allocation3 + $0x18] sm:$0x7f] }
 0x120   :  { %v278_v48 = vld [vmem:[#allocation2 + $0x3a] sm:$0x7f]  ;;  %v710_v50 = vpop.f32.mrb[20].mxu0  ;;  %v1670_v13 = vld [vmem:[#allocation2 + $0x23] sm:$0xff] }
 0x121   :  { %v282_v51 = vadd.f32 %v278_v48, %v274_v46  ;;  %504 = vst [vmem:[#allocation2 + $0x38] sm:$0xff] %v486_v34  ;;  %505 = vst [vmem:[#allocation2 + $0x40] sm:$0xf] %v491_v43  ;;  %v712_v52 = vpop.f32.mrb[21].mxu0  ;;  %v516_v46 = vadd.f32 %v512_v60, %v1662_v6 }
 0x122   :  { %748 = vst [vmem:[#allocation2] sm:$0xff] %v710_v50  ;;  %v713_v54 = vpop.f32.mrb[22].mxu0  ;;  %v961_v56 = vpop.f32.mrb[20].mxu1  ;;  %v1672_v17 = vld [vmem:[#allocation2 + $0x2b] sm:$0xff] }
 0x123   :  { %286 = vst [vmem:[#allocation3 + $0x37] sm:$0x7f] %v282_v51  ;;  %749 = vst [vmem:[#allocation2 + $0x8] sm:$0xff] %v713_v54  ;;  %v715_v55 = vpop.f32.mrb[23].mxu0  ;;  %v963_v57 = vpop.f32.mrb[21].mxu1 }
 0x124   :  { %v964_v58 = vpop.f32.mrb[22].mxu1  ;;  %v272_v57 = vld [vmem:[#allocation3 + $0x27] sm:$0xff] }
 0x125   :  { %v966_v59 = vpop.f32.mrb[23].mxu1 }
 0x128   :  { %v718_v61 = vpop.f32.mrb[24].mxu0  ;;  %v529_v4 = vld [vmem:[#allocation2 + $0x3b] sm:$0x7f]  ;;  %v1681_v32 = vld [vmem:[#allocation2 + $0x33] sm:$0xff] }
 0x129   :  { %750 = vst [vmem:[#allocation2 + $0x10] sm:$0xff] %v718_v61  ;;  %v720_v63 = vpop.f32.mrb[25].mxu0 }
 0x12a   :  { %v761_v1 = vld [vmem:[#allocation2 + $0x2] sm:$0xff]  ;;  %v721_v2 = vpop.f32.mrb[26].mxu0  ;;  %v969_v7 = vpop.f32.mrb[24].mxu1 }
 0x12b   :  { %v525_v3 = vld [vmem:[#allocation3 + $0x37] sm:$0x7f]  ;;  %999 = vst [vmem:[#allocation2] sm:$0xff] %v961_v56  ;;  %751 = vst [vmem:[#allocation2 + $0x18] sm:$0xff] %v721_v2  ;;  %v723_v5 = vpop.f32.mrb[27].mxu0  ;;  %v971_v9 = vpop.f32.mrb[25].mxu1  ;;  %v765_v26 = vadd.f32 %v761_v1, %v514_v22 }
 0x12c   :  { %v533_v8 = vadd.f32 %v529_v4, %v525_v3  ;;  %v972_v10 = vpop.f32.mrb[26].mxu1  ;;  %v279_v4 = vadd.f32 %v1664_v27, %v271_v53 }
 0x12d   :  { %v974_v11 = vpop.f32.mrb[27].mxu1 }
 0x12e   :  { %537 = vst [vmem:[#allocation3 + $0x37] sm:$0x7f] %v533_v8  ;;  %v530_v11 = vadd.f32 %v1670_v13, %v279_v4 }
 0x130   :  { %v762_v12 = vld [vmem:[#allocation2 + $0xa] sm:$0xff]  ;;  %v726_v14 = vpop.f32.mrb[28].mxu0 }
 0x131   :  { %1000 = vst [vmem:[#allocation2 + $0x8] sm:$0xff] %v964_v58  ;;  %752 = vst [vmem:[#allocation2 + $0x20] sm:$0xff] %v726_v14  ;;  %v728_v15 = vpop.f32.mrb[29].mxu0  ;;  %v766_v34 = vadd.f32 %v762_v12, %v515_v25 }
 0x132   :  { %v763_v16 = vld [vmem:[#allocation2 + $0x12] sm:$0xff]  ;;  %v729_v18 = vpop.f32.mrb[30].mxu0  ;;  %v977_v20 = vpop.f32.mrb[28].mxu1 }
 0x133   :  { %1001 = vst [vmem:[#allocation2 + $0x10] sm:$0xff] %v969_v7  ;;  %753 = vst [vmem:[#allocation2 + $0x28] sm:$0xff] %v729_v18  ;;  %v731_v19 = vpop.f32.mrb[31].mxu0  ;;  %v979_v21 = vpop.f32.mrb[29].mxu1  ;;  %v767_v51 = vadd.f32 %v763_v16, %v516_v46  ;;  %v273_v15 = vld [vmem:[#allocation3 + $0x2f] sm:$0xff] }
 0x134   :  { %v980_v23 = vpop.f32.mrb[30].mxu1 }
 0x135   :  { %v982_v24 = vpop.f32.mrb[31].mxu1  ;;  %v776_v19 = vld [vmem:[#allocation3 + $0x37] sm:$0x7f] }
 0x138   :  { %v1012_v30 = vld [vmem:[#allocation2 + $0x3] sm:$0xff]  ;;  %v764_v31 = vld [vmem:[#allocation2 + $0x1a] sm:$0x7f]  ;;  %v734_v33 = vpop.f32.mrb[32].mxu0 }
 0x139   :  { %v1016_v35 = vadd.f32 %v1012_v30, %v765_v26  ;;  %v768_v36 = vadd.f32 %v764_v31, %v760_v28  ;;  %1002 = vst [vmem:[#allocation2 + $0x18] sm:$0xff] %v972_v10  ;;  %754 = vst [vmem:[#allocation2 + $0x30] sm:$0xff] %v734_v33  ;;  %v736_v62 = vpop.f32.mrb[33].mxu0  ;;  %v280_v10 = vadd.f32 %v1666_v37, %v272_v57 }
 0x13a   :  { %v1013_v38 = vld [vmem:[#allocation2 + $0xb] sm:$0xff]  ;;  %v737_v39 = vpop.f32.mrb[34].mxu0  ;;  %v985_v43 = vpop.f32.mrb[32].mxu1  ;;  %v281_v37 = vadd.f32 %v1668_v40, %v273_v15 }
 0x13b   :  { %v777_v0 = vld [vmem:[#allocation2 + $0x24] sm:$0xff]  ;;  %v1017_v41 = vadd.f32 %v1013_v38, %v766_v34  ;;  %772 = vst [vmem:[#allocation3 + $0x18] sm:$0x7f] %v768_v36  ;;  %755 = vst [vmem:[#allocation2 + $0x38] sm:$0xff] %v737_v39  ;;  %v739_v42 = vpop.f32.mrb[35].mxu0  ;;  %v1055_v44 = vadd.f32 %v1679_v29, %v1016_v35  ;;  %v987_v45 = vpop.f32.mrb[33].mxu1  ;;  %v531_v16 = vadd.f32 %v1672_v17, %v280_v10 }
 0x13c   :  { %1003 = vst [vmem:[#allocation2 + $0x20] sm:$0xff] %v977_v20  ;;  %v988_v47 = vpop.f32.mrb[34].mxu1  ;;  %v781_v27 = vadd.f32 %v777_v0, %v530_v11  ;;  %v532_v25 = vadd.f32 %v1681_v32, %v281_v37 }
 0x13d   :  { %v1056_v48 = vadd.f32 %v1679_v29, %v1017_v41  ;;  %v1071_v49 = vmul.f32 0.2, %v1055_v44  ;;  %v990_v50 = vpop.f32.mrb[35].mxu1  ;;  %vm1063_vm2 = vcmp.ge.f32.partialorder %v1055_v44, 0.0 }
 0x13f   :  { %vm1064_vm3 = vcmp.ge.f32.partialorder %v1056_v48, 0.0  ;;  %v1072_v52 = vmul.f32 0.2, %v1056_v48  ;;  %v1079_v61 = vsel %vm1063_vm2, %v1055_v44, %v1071_v49 }
 0x140   :  { %v1014_v54 = vld [vmem:[#allocation2 + $0x13] sm:$0xff]  ;;  %v742_v56 = vpop.f32.mrb[36].mxu0 }
 0x141   :  { %v778_v55 = vld [vmem:[#allocation2 + $0x2c] sm:$0xff]  ;;  %v1018_v58 = vadd.f32 %v1014_v54, %v767_v51  ;;  %756 = vst [vmem:[#allocation2 + $0x40] sm:$0xf] %v742_v56  ;;  %v744_v59 = vpop.f32.mrb[37].mxu0  ;;  %v1080_v6 = vsel %vm1064_vm3, %v1056_v48, %v1072_v52 }
 0x142   :  { %1004 = vst [vmem:[#allocation2 + $0x28] sm:$0xff] %v980_v23  ;;  %v1011_v60 = vld [vmem:[#allocation3 + $0x18] sm:$0x7f]  ;;  %v779_v1 = vld [vmem:[#allocation2 + $0x34] sm:$0xff]  ;;  %v745_v2 = vpop.f32.mrb[38].mxu0  ;;  %v1298_v3 = vpack.c.bf16 %v1080_v6, %v1079_v61  ;;  %v993_v8 = vpop.f32.mrb[36].mxu1  ;;  %v782_v21 = vadd.f32 %v778_v55, %v531_v16 }
 0x143   :  { %v1015_v63 = vld [vmem:[#allocation2 + $0x1b] sm:$0x7f]  ;;  %1005 = vst [vmem:[#allocation2 + $0x30] sm:$0xff] %v985_v43  ;;  %v746_v7 = vpop.f32.mrb[39].mxu0  ;;  %v995_v9 = vpop.f32.mrb[37].mxu1  ;;  %v783_v26 = vadd.f32 %v779_v1, %v532_v25  ;;  %v1057_v17 = vadd.f32 %v1679_v29, %v1018_v58 }
 0x144   :  { %v1019_v5 = vadd.f32 %v1015_v63, %v1011_v60  ;;  %1299 = vst [vmem:[%s1720_s7] sm:$0xff] %v1298_v3   ;;  %v996_v12 = vpop.f32.mrb[38].mxu1 }
 0x145   :  { %v997_v14 = vpop.f32.mrb[39].mxu1  ;;  %v1073_v62 = vmul.f32 0.2, %v1057_v17  ;;  %vm1065_vm4 = vcmp.ge.f32.partialorder %v1057_v17, 0.0 }
 0x146   :  { %1023 = vst [vmem:[#allocation3 + $0x18] sm:$0x7f] %v1019_v5 }
 0x147   :  { %v1081_v32 = vsel %vm1065_vm4, %v1057_v17, %v1073_v62 }
 0x148   :  { %v780_v20 = vld [vmem:[#allocation2 + $0x3c] sm:$0x7f] }
 0x149   :  { %v1028_v18 = vld [vmem:[#allocation2 + $0x25] sm:$0xff]  ;;  %v784_v23 = vadd.f32 %v780_v20, %v776_v19  ;;  %1006 = vst [vmem:[#allocation2 + $0x38] sm:$0xff] %v988_v47  ;;  %1007 = vst [vmem:[#allocation2 + $0x40] sm:$0xf] %v993_v8 }
 0x14a   :  { %v1032_v22 = vadd.f32 %v1028_v18, %v781_v27  ;;  %v1029_v24 = vld [vmem:[#allocation2 + $0x2d] sm:$0xff] }
 0x14b   :  { %v1033_v13 = vadd.f32 %v1029_v24, %v782_v21  ;;  %788 = vst [vmem:[#allocation3 + $0x37] sm:$0x7f] %v784_v23 }
 0x14c   :  { %1036 = vst [vmem:[#allocation3 + $0x1f] sm:$0xff] %v1032_v22 }
 0x14d   :  { %1037 = vst [vmem:[#allocation3 + $0x27] sm:$0xff] %v1033_v13 }
 0x150   :  { %v1030_v28 = vld [vmem:[#allocation2 + $0x35] sm:$0xff]  ;;  %v1031_v34 = vld [vmem:[#allocation2 + $0x3d] sm:$0x7f] }
 0x151   :  { %v1034_v30 = vadd.f32 %v1030_v28, %v783_v26 }
 0x152   :  { %v1027_v33 = vld [vmem:[#allocation3 + $0x37] sm:$0x7f] }
 0x153   :  { %v1043_v31 = vld [vmem:[#allocation3 + $0x18] sm:$0xff]  ;;  %v1035_v35 = vadd.f32 %v1031_v34, %v1027_v33  ;;  %1038 = vst [vmem:[#allocation3 + $0x2f] sm:$0xff] %v1034_v30 }
 0x154   :  { %v1058_v36 = vadd.f32 %v1679_v29, %v1043_v31  ;;  %v1044_v40 = vld [vmem:[#allocation3 + $0x20] sm:$0xff] }
 0x155   :  { %1039 = vst [vmem:[#allocation3 + $0x37] sm:$0x7f] %v1035_v35  ;;  %v1059_v39 = vadd.f32 %v1679_v29, %v1044_v40 }
 0x156   :  { %vm1066_vm5 = vcmp.ge.f32.partialorder %v1058_v36, 0.0  ;;  %v1074_v38 = vmul.f32 0.2, %v1058_v36 }
 0x157   :  { %vm1067_vm6 = vcmp.ge.f32.partialorder %v1059_v39, 0.0  ;;  %v1075_v46 = vmul.f32 0.2, %v1059_v39 }
 0x158   :  { %v1082_v0 = vsel %vm1066_vm5, %v1058_v36, %v1074_v38 }
 0x159   :  { %v1303_v41 = vpack.c.bf16 %v1082_v0, %v1081_v32  ;;  %v1083_v52 = vsel %vm1067_vm6, %v1059_v39, %v1075_v46 }
 0x15a   :  { %v1045_v42 = vld [vmem:[#allocation3 + $0x28] sm:$0xff] }
 0x15b   :  { %1310 = vst [vmem:[%s1720_s7 + $0x8] sm:$0xff] %v1303_v41   ;;  %v1060_v43 = vadd.f32 %v1679_v29, %v1045_v42 }
 0x15c   :  { %v1046_v44 = vld [vmem:[#allocation3 + $0x30] sm:$0xff]  ;;  %v1047_v45 = vld [vmem:[#allocation3 + $0x38] sm:$0x3f] }
 0x15d   :  { %v1061_v47 = vadd.f32 %v1679_v29, %v1046_v44  ;;  %v1062_v48 = vadd.f32 %v1679_v29, %v1047_v45  ;;  %vm1068_vm7 = vcmp.ge.f32.partialorder %v1060_v43, 0.0  ;;  %v1076_v49 = vmul.f32 0.2, %v1060_v43 }
 0x15f   :  { %vm1069_vm8 = vcmp.ge.f32.partialorder %v1061_v47, 0.0  ;;  %vm1070_vm9 = vcmp.ge.f32.partialorder %v1062_v48, 0.0  ;;  %v1077_v50 = vmul.f32 0.2, %v1061_v47  ;;  %v1078_v51 = vmul.f32 0.2, %v1062_v48 }
 0x160   :  { %v1084_v53 = vsel %vm1068_vm7, %v1060_v43, %v1076_v49 }
 0x161   :  { %v1085_v54 = vsel %vm1069_vm8, %v1061_v47, %v1077_v50  ;;  %v1086_v55 = vsel %vm1070_vm9, %v1062_v48, %v1078_v51  ;;  %v1308_v56 = vpack.c.bf16 %v1084_v53, %v1083_v52 }
 0x162   :  { %v1293_v57 = vpack.c.bf16 %v1085_v54, %v1085_v54  ;;  %v1294_v58 = vpack.c.bf16 %v1086_v55, %v1086_v55 }
 0x163   :  { %1311 = vst [vmem:[%s1720_s7 + $0x10] sm:$0xff] %v1308_v56  }
 0x164   :  { %1125 = vst [vmem:[%s1720_s7 + $0x18] sm:$0xf] %v1293_v57  ;;  %1126 = vst [vmem:[%s1720_s7 + $0x1c] sm:$0x7] %v1294_v58 }

// kernel: _lambda_.6
= control target key start
LH: loop header
LB: loop body
LE: loop exit
PB: predicated region body
PF: predicated region fallthrough
CT: control target
= control target key end

     0   :  { %v1481_v0 = vmov 0   ;;  %vm132_vm0 = vcmask 130048   ;;  %v1482_v57 = vmov 0.0   ;;  %vm1018_vm1 = vcmask 1045504   ;;  %s1829_s1 = inlined_call_operand.vmem [shape: bf16[4,144,128], index: 1, kind: input, shape index: {}]   ;;  %s1830_s0 = inlined_call_operand.vmem [shape: bf16[36,144], index: 0, kind: input, shape index: {}]   ;;  %s1831_s6 = inlined_call_operand.vmem [shape: f32[30,1], index: 6, kind: input, shape index: {}]   ;;  %s1832_s3 = inlined_call_operand.vmem [shape: f32[128,128], index: 3, kind: input, shape index: {}]   ;;  %s1833_s2 = inlined_call_operand.vmem [shape: f32[1,128], index: 2, kind: input, shape index: {}]   ;;  %s1834_s4 = inlined_call_operand.vmem [shape: f32[1,128], index: 4, kind: input, shape index: {}]   ;;  %s1835_s5 = inlined_call_operand.vmem [shape: f32[1,128], index: 5, kind: input, shape index: {}]   ;;  %s1836_s7 = inlined_call_operand.vmem [shape: bf16[30,128], index: 7, kind: output, shape index: {}]  }
   0x1   :  { %142 = vmatprep.subr.bf16.mxu0 %v1481_v0  ;;  %v1429_v1 = vld [vmem:[%s1829_s1] sm:$0xff]   ;;  %330 = vmatprep.subr.bf16.mxu1 %v1481_v0  ;;  %v1430_v2 = vld [vmem:[%s1829_s1 + $0x8] sm:$0xff]   ;;  %v1434_v4 = vld [vmem:[%s1829_s1 + $0x50] sm:$0xff]   ;;  %29 = vst [vmem:[#allocation3 + $0x10] sm:$0xff] %v1482_v57 }
   0x2   :  { %1427 = vset.pattern.permute.xlu0 %v1481_v0  ;;  %1428 = vset.pattern.permute.xlu1 %v1481_v0  ;;  %v1432_v3 = vld [vmem:[%s1829_s1 + $0x48] sm:$0xff]   ;;  %v1431_v5 = vld [vmem:[%s1829_s1 + $0x10] sm:$0xff]   ;;  %v1436_v6 = vld [vmem:[%s1829_s1 + $0x58] sm:$0xff]   ;;  %30 = vst [vmem:[#allocation3 + $0x18] sm:$0x3f] %v1482_v57 }
   0x3   :  { %143 = vmatpush1.bf16.msra.mxu0 %v1429_v1  ;;  %331 = vmatpush1.bf16.msra.mxu1 %v1432_v3  ;;  %v1433_v7 = vld [vmem:[%s1829_s1 + $0x18] sm:$0xff]   ;;  %v1438_v8 = vld [vmem:[%s1829_s1 + $0x60] sm:$0xff]   ;;  %v1440_v10 = vld [vmem:[%s1829_s1 + $0x68] sm:$0xff]   ;;  %28 = vst [vmem:[#allocation3 + $0x8] sm:$0xff] %v1482_v57 }
   0x4   :  { %144 = vmatprep.subr.bf16.mxu0 %v1481_v0  ;;  %332 = vmatprep.subr.bf16.mxu1 %v1481_v0  ;;  %v1435_v9 = vld [vmem:[%s1829_s1 + $0x20] sm:$0xff]   ;;  %v1437_v12 = vld [vmem:[%s1829_s1 + $0x28] sm:$0xff]   ;;  %v1442_v13 = vld [vmem:[%s1829_s1 + $0x70] sm:$0xff]  }
   0x5   :  { %v1567_v11 = vld [vmem:[%s1830_s0 + $0x4] ss:$8 sps:$4 sm:$0xff]   ;;  %v1439_v14 = vld [vmem:[%s1829_s1 + $0x30] sm:$0xff]   ;;  %v1444_v15 = vld [vmem:[%s1829_s1 + $0x78] sm:$0xff]  }
   0x6   :  { %1120 = vmatprep.mubr.msk.bf16.mxu0 %vm132_vm0, %v1567_v11  ;;  %1156 = vmatprep.mubr.msk.bf16.mxu1 %vm132_vm0, %v1567_v11  ;;  %v1441_v16 = vld [vmem:[%s1829_s1 + $0x38] sm:$0xff]   ;;  %v1448_v17 = vld [vmem:[%s1829_s1 + $0x80] sm:$0xff]   ;;  %v1450_v20 = vld [vmem:[%s1829_s1 + $0x88] sm:$0xff]  }
   0x7   :  { %145 = vmatpush1.bf16.msra.mxu0 %v1430_v2  ;;  %333 = vmatpush1.bf16.msra.mxu1 %v1434_v4  ;;  %v1443_v18 = vld [vmem:[%s1829_s1 + $0x40] sm:$0xff]   ;;  %v1449_v21 = vld [vmem:[%s1829_s1 + $0x90] sm:$0xff]   ;;  %v1453_v23 = vld [vmem:[%s1829_s1 + $0xd8] sm:$0xff]  }
   0x8   :  { %146 = vmatprep.subr.bf16.mxu0 %v1481_v0  ;;  %334 = vmatprep.subr.bf16.mxu1 %v1481_v0  ;;  %v1605_v19 = vld [vmem:[%s1830_s0] ss:$8 sps:$4 sm:$0xff]   ;;  %v1618_v22 = vld [vmem:[%s1830_s0 + $0x14] ss:$8 sps:$4 sm:$0xff]   ;;  %v1641_v27 = vld [vmem:[%s1830_s0 + $0x10] ss:$8 sps:$4 sm:$0xff]  }
   0x9   :  { %v1451_v24 = vld [vmem:[%s1829_s1 + $0x98] sm:$0xff]   ;;  %v35_v25 = vld [vmem:[%s1830_s0 + $0x20] sm:$0x33]  ;;  %v800_v29 = vld [vmem:[%s1831_s6 + $0x10] sm:$0xff] }
   0xa   :  { %v798_v26 = vld [vmem:[%s1831_s6] sm:$0xff]  ;;  %v1110_v32 = vcombine.high %v35_v25, %v35_v25  ;;  %814 = vperm.xlu1 %1428, %v800_v29   ;;  %v1460_v33 = vld [vmem:[%s1829_s1 + $0xe8] sm:$0xff]   ;;  %v801_v37 = vld [vmem:[%s1831_s6 + $0x18] sm:$0x3f]  ;;  %v1109_v38 = vcombine.low %v35_v25, %v35_v25 }
   0xb   :  { %147 = vmatpush1.bf16.msra.mxu0 %v1431_v5  ;;  %335 = vmatpush1.bf16.msra.mxu1 %v1436_v6  ;;  %v1458_v28 = vld [vmem:[%s1829_s1 + $0xe0] sm:$0xff]   ;;  %v799_v35 = vld [vmem:[%s1831_s6 + $0x8] sm:$0xff]  ;;  %v1464_v39 = vld [vmem:[%s1829_s1 + $0xf0] sm:$0xff]  }
   0xc   :  { %148 = vmatprep.subr.bf16.mxu0 %v1481_v0  ;;  %336 = vmatprep.subr.bf16.mxu1 %v1481_v0  ;;  %v1452_v30 = vld [vmem:[%s1829_s1 + $0xa0] sm:$0xff]   ;;  %v1457_v36 = vld [vmem:[%s1829_s1 + $0xa8] sm:$0xff]   ;;  %v1459_v40 = vld [vmem:[%s1829_s1 + $0xb0] sm:$0xff]  }
   0xd   :  { %v223_v31 = vld [vmem:[%s1830_s0 + $0x20] sm:$0x33]  ;;  %804 = vperm.xlu0 %1427, %v798_v26   ;;  %v1466_v42 = vld [vmem:[%s1829_s1 + $0xf8] sm:$0xff]   ;;  %v1472_v46 = vld [vmem:[%s1829_s1 + $0x108] sm:$0xff]  }
   0xe   :  { %v1146_v34 = vcombine.high %v223_v31, %v223_v31  ;;  %819 = vperm.xlu1 %1428, %v801_v37   ;;  %v1145_v41 = vcombine.low %v223_v31, %v223_v31  ;;  %v1463_v43 = vld [vmem:[%s1829_s1 + $0xb8] sm:$0xff]   ;;  %v1469_v44 = vld [vmem:[%s1829_s1 + $0x100] sm:$0xff]   ;;  %v1468_v47 = vld [vmem:[%s1829_s1 + $0xc8] sm:$0xff]  }
   0xf   :  { %149 = vmatpush1.bf16.msra.mxu0 %v1433_v7  ;;  %337 = vmatpush1.bf16.msra.mxu1 %v1438_v8  ;;  %v1465_v45 = vld [vmem:[%s1829_s1 + $0xc0] sm:$0xff]   ;;  %v1473_v48 = vld [vmem:[%s1829_s1 + $0x110] sm:$0xff]   ;;  %v1474_v50 = vld [vmem:[%s1829_s1 + $0x118] sm:$0xff]  }
  0x10   :  { %150 = vmatprep.subr.bf16.mxu0 %v1481_v0  ;;  %338 = vmatprep.subr.bf16.mxu1 %v1481_v0  ;;  %v1471_v49 = vld [vmem:[%s1829_s1 + $0xd0] sm:$0xff]   ;;  %v411_v51 = vld [vmem:[%s1830_s0 + $0x20] sm:$0x33]  ;;  %v827_v59 = vld [vmem:[%s1832_s3 + $0x8] sm:$0xff] }
  0x11   :  { %809 = vperm.xlu0 %1427, %v799_v35   ;;  %v1182_v52 = vcombine.high %v411_v51, %v411_v51  ;;  %v599_v53 = vld [vmem:[%s1830_s0 + $0x20] sm:$0x33]  ;;  %v1181_v55 = vcombine.low %v411_v51, %v411_v51  ;;  %v828_v61 = vld [vmem:[%s1832_s3 + $0x10] sm:$0xff]  ;;  %v829_v62 = vld [vmem:[%s1832_s3 + $0x18] sm:$0xff] }
  0x12   :  { %v1218_v54 = vcombine.high %v599_v53, %v599_v53  ;;  %v1217_v56 = vcombine.low %v599_v53, %v599_v53  ;;  %v826_v58 = vld [vmem:[%s1832_s3] sm:$0xff]  ;;  %v1365_v63 = vpack.c.bf16 %v829_v62, %v828_v61  ;;  %v831_v1 = vld [vmem:[%s1832_s3 + $0x28] sm:$0xff]  ;;  %v832_v3 = vld [vmem:[%s1832_s3 + $0x30] sm:$0xff] }
  0x13   :  { %151 = vmatpush1.bf16.msra.mxu0 %v1435_v9  ;;  %339 = vmatpush1.bf16.msra.mxu1 %v1440_v10  ;;  %v1361_v60 = vpack.c.bf16 %v827_v59, %v826_v58  ;;  %v833_v4 = vld [vmem:[%s1832_s3 + $0x38] sm:$0xff]  ;;  %v834_v6 = vld [vmem:[%s1832_s3 + $0x40] sm:$0xff]  ;;  %v835_v7 = vld [vmem:[%s1832_s3 + $0x48] sm:$0xff] }
  0x14   :  { %152 = vmatprep.subr.bf16.mxu0 %v1481_v0  ;;  %340 = vmatprep.subr.bf16.mxu1 %v1481_v0  ;;  %v1373_v5 = vpack.c.bf16 %v833_v4, %v832_v3  ;;  %v1377_v8 = vpack.c.bf16 %v835_v7, %v834_v6  ;;  %v836_v9 = vld [vmem:[%s1832_s3 + $0x50] sm:$0xff]  ;;  %v837_v10 = vld [vmem:[%s1832_s3 + $0x58] sm:$0xff] }
  0x15   :  { %v204_v26 = vld [vmem:[#allocation3 + $0x8] sm:$0x7f] }
  0x17   :  { %153 = vmatpush1.bf16.msra.mxu0 %v1437_v12  ;;  %341 = vmatpush1.bf16.msra.mxu1 %v1442_v13  ;;  %v838_v12 = vld [vmem:[%s1832_s3 + $0x60] sm:$0xff]  ;;  %v839_v13 = vld [vmem:[%s1832_s3 + $0x68] sm:$0xff] }
  0x18   :  { %154 = vmatprep.subr.bf16.mxu0 %v1481_v0  ;;  %342 = vmatprep.subr.bf16.mxu1 %v1481_v0 }
  0x1b   :  { %155 = vmatpush1.bf16.msra.mxu0 %v1439_v14  ;;  %343 = vmatpush1.bf16.msra.mxu1 %v1444_v15  ;;  %v1385_v14 = vpack.c.bf16 %v839_v13, %v838_v12  ;;  %v840_v15 = vld [vmem:[%s1832_s3 + $0x70] sm:$0xff] }
  0x1c   :  { %156 = vmatprep.subr.bf16.mxu0 %v1481_v0  ;;  %344 = vmatprep.subr.bf16.mxu1 %v1481_v0 }
  0x1f   :  { %157 = vmatpush1.bf16.msra.mxu0 %v1441_v16  ;;  %345 = vmatpush1.bf16.msra.mxu1 %v1448_v17  ;;  %v841_v16 = vld [vmem:[%s1832_s3 + $0x78] sm:$0xff] }
  0x20   :  { %158 = vmatprep.subr.bf16.mxu0 %v1481_v0  ;;  %346 = vmatprep.subr.bf16.mxu1 %v1481_v0  ;;  %v1389_v17 = vpack.c.bf16 %v841_v16, %v840_v15 }
  0x23   :  { %159 = vmatpush1.bf16.msra.mxu0 %v1443_v18  ;;  %347 = vmatpush1.bf16.msra.mxu1 %v1450_v20 }
  0x24   :  { %518 = vmatprep.subr.bf16.mxu0 %v1481_v0  ;;  %706 = vmatprep.subr.bf16.mxu1 %v1481_v0 }
  0x26   :  { %175 = vmatmul.mubr.bf16.vlgmr.msra.gmra.mrb[0].mxu0 %v1605_v19  ;;  %363 = vmatmul.mubr.bf16.vlgmr.msra.gmra.mrb[0].mxu1 %v1605_v19 }
  0x27   :  { %519 = vmatpush1.bf16.msra.mxu0 %v1449_v21  ;;  %1121 = vmatprep.mubr.msk.bf16.mxu0 %vm132_vm0, %v1618_v22 }
  0x28   :  { %520 = vmatprep.subr.bf16.mxu0 %v1481_v0  ;;  %707 = vmatpush1.bf16.msra.mxu1 %v1453_v23 }
  0x29   :  { %1157 = vmatprep.mubr.msk.bf16.mxu1 %vm132_vm0, %v1618_v22  ;;  %708 = vmatprep.subr.bf16.mxu1 %v1481_v0 }
  0x2b   :  { %521 = vmatpush1.bf16.msra.mxu0 %v1451_v24 }
  0x2c   :  { %522 = vmatprep.subr.bf16.mxu0 %v1481_v0  ;;  %709 = vmatpush1.bf16.msra.mxu1 %v1458_v28 }
  0x2d   :  { %710 = vmatprep.subr.bf16.mxu1 %v1481_v0 }
  0x2e   :  { %183 = vmatmul.mubr.bf16.gmra.mrb[4].mxu0 %v1641_v27  ;;  %371 = vmatmul.mubr.bf16.gmra.mrb[4].mxu1 %v1641_v27 }
  0x2f   :  { %523 = vmatpush1.bf16.msra.mxu0 %v1452_v30  ;;  %1122 = vmatprep.mubr.msk.bf16.mxu0 %vm132_vm0, %v1110_v32 }
  0x30   :  { %524 = vmatprep.subr.bf16.mxu0 %v1481_v0  ;;  %711 = vmatpush1.bf16.msra.mxu1 %v1460_v33 }
  0x31   :  { %1158 = vmatprep.mubr.msk.bf16.mxu1 %vm132_vm0, %v1146_v34  ;;  %712 = vmatprep.subr.bf16.mxu1 %v1481_v0 }
  0x33   :  { %525 = vmatpush1.bf16.msra.mxu0 %v1457_v36 }
  0x34   :  { %526 = vmatprep.subr.bf16.mxu0 %v1481_v0  ;;  %713 = vmatpush1.bf16.msra.mxu1 %v1464_v39 }
  0x35   :  { %714 = vmatprep.subr.bf16.mxu1 %v1481_v0 }
  0x36   :  { %191 = vmatmul.mubr.bf16.gmra.mrb[8].mxu0 %v1109_v38  ;;  %379 = vmatmul.mubr.bf16.gmra.mrb[8].mxu1 %v1145_v41 }
  0x37   :  { %527 = vmatpush1.bf16.msra.mxu0 %v1459_v40  ;;  %1192 = vmatprep.mubr.msk.bf16.mxu0 %vm132_vm0, %v1567_v11 }
  0x38   :  { %528 = vmatprep.subr.bf16.mxu0 %v1481_v0  ;;  %715 = vmatpush1.bf16.msra.mxu1 %v1466_v42 }
  0x39   :  { %1228 = vmatprep.mubr.msk.bf16.mxu1 %vm132_vm0, %v1567_v11  ;;  %716 = vmatprep.subr.bf16.mxu1 %v1481_v0  ;;  %v1381_v11 = vpack.c.bf16 %v837_v10, %v836_v9 }
  0x3b   :  { %529 = vmatpush1.bf16.msra.mxu0 %v1463_v43 }
  0x3c   :  { %530 = vmatprep.subr.bf16.mxu0 %v1481_v0  ;;  %717 = vmatpush1.bf16.msra.mxu1 %v1469_v44 }
  0x3d   :  { %718 = vmatprep.subr.bf16.mxu1 %v1481_v0 }
  0x3f   :  { %531 = vmatpush1.bf16.msra.mxu0 %v1465_v45 }
  0x40   :  { %532 = vmatprep.subr.bf16.mxu0 %v1481_v0  ;;  %719 = vmatpush1.bf16.msra.mxu1 %v1472_v46 }
  0x41   :  { %720 = vmatprep.subr.bf16.mxu1 %v1481_v0 }
  0x43   :  { %533 = vmatpush1.bf16.msra.mxu0 %v1468_v47 }
  0x44   :  { %534 = vmatprep.subr.bf16.mxu0 %v1481_v0  ;;  %721 = vmatpush1.bf16.msra.mxu1 %v1473_v48  ;;  %v212_v48 = vld [vmem:[#allocation3 + $0x17] sm:$0x7f] }
  0x45   :  { %722 = vmatprep.subr.bf16.mxu1 %v1481_v0  ;;  %v830_v0 = vld [vmem:[%s1832_s3 + $0x20] sm:$0xff] }
  0x46   :  { %v1369_v2 = vpack.c.bf16 %v831_v1, %v830_v0 }
  0x47   :  { %535 = vmatpush1.bf16.msra.mxu0 %v1471_v49 }
  0x48   :  { %723 = vmatpush1.bf16.msra.mxu1 %v1474_v50  ;;  %1362 = vmatprep.subr.bf16.mxu0 %v1361_v60 }
  0x49   :  { %1394 = vmatprep.subr.bf16.mxu1 %v1361_v60 }
  0x4a   :  { %551 = vmatmul.mubr.bf16.vlgmr.msra.gmra.mrb[12].mxu0 %v1605_v19 }
  0x4b   :  { %1193 = vmatprep.mubr.msk.bf16.mxu0 %vm132_vm0, %v1618_v22  ;;  %739 = vmatmul.mubr.bf16.vlgmr.msra.gmra.mrb[12].mxu1 %v1605_v19 }
  0x4c   :  { %1229 = vmatprep.mubr.msk.bf16.mxu1 %vm132_vm0, %v1618_v22  ;;  %1364 = vmatpush3.bf16.msra.mxu0 %v1361_v60 }
  0x4d   :  { %1396 = vmatpush3.bf16.msra.mxu1 %v1361_v60  ;;  %1366 = vmatprep.subr.bf16.mxu0 %v1365_v63 }
  0x4e   :  { %1398 = vmatprep.subr.bf16.mxu1 %v1365_v63 }
  0x50   :  { %1368 = vmatpush3.bf16.msra.mxu0 %v1365_v63 }
  0x51   :  { %1400 = vmatpush3.bf16.msra.mxu1 %v1365_v63  ;;  %1370 = vmatprep.subr.bf16.mxu0 %v1369_v2 }
  0x52   :  { %559 = vmatmul.mubr.bf16.gmra.mrb[16].mxu0 %v1641_v27  ;;  %1402 = vmatprep.subr.bf16.mxu1 %v1369_v2 }
  0x53   :  { %1194 = vmatprep.mubr.msk.bf16.mxu0 %vm132_vm0, %v1182_v52  ;;  %747 = vmatmul.mubr.bf16.gmra.mrb[16].mxu1 %v1641_v27 }
  0x54   :  { %1230 = vmatprep.mubr.msk.bf16.mxu1 %vm132_vm0, %v1218_v54  ;;  %1372 = vmatpush3.bf16.msra.mxu0 %v1369_v2 }
  0x55   :  { %1404 = vmatpush3.bf16.msra.mxu1 %v1369_v2  ;;  %1374 = vmatprep.subr.bf16.mxu0 %v1373_v5 }
  0x56   :  { %1406 = vmatprep.subr.bf16.mxu1 %v1373_v5 }
  0x58   :  { %1376 = vmatpush3.bf16.msra.mxu0 %v1373_v5 }
  0x59   :  { %1408 = vmatpush3.bf16.msra.mxu1 %v1373_v5  ;;  %1378 = vmatprep.subr.bf16.mxu0 %v1377_v8 }
  0x5a   :  { %567 = vmatmul.mubr.bf16.gmra.mrb[20].mxu0 %v1181_v55  ;;  %1410 = vmatprep.subr.bf16.mxu1 %v1377_v8 }
  0x5b   :  { %755 = vmatmul.mubr.bf16.gmra.mrb[20].mxu1 %v1217_v56 }
  0x5c   :  { %1380 = vmatpush3.bf16.msra.mxu0 %v1377_v8 }
  0x5d   :  { %1412 = vmatpush3.bf16.msra.mxu1 %v1377_v8  ;;  %1382 = vmatprep.subr.bf16.mxu0 %v1381_v11 }
  0x5e   :  { %1414 = vmatprep.subr.bf16.mxu1 %v1381_v11 }
  0x60   :  { %1384 = vmatpush3.bf16.msra.mxu0 %v1381_v11 }
  0x61   :  { %1416 = vmatpush3.bf16.msra.mxu1 %v1381_v11  ;;  %1386 = vmatprep.subr.bf16.mxu0 %v1385_v14 }
  0x62   :  { %1418 = vmatprep.subr.bf16.mxu1 %v1385_v14 }
  0x64   :  { %1388 = vmatpush3.bf16.msra.mxu0 %v1385_v14 }
  0x65   :  { %1420 = vmatpush3.bf16.msra.mxu1 %v1385_v14  ;;  %1390 = vmatprep.subr.bf16.mxu0 %v1389_v17 }
  0x66   :  { %1422 = vmatprep.subr.bf16.mxu1 %v1389_v17 }
  0x68   :  { %1392 = vmatpush3.bf16.msra.mxu0 %v1389_v17 }
  0x69   :  { %1424 = vmatpush3.bf16.msra.mxu1 %v1389_v17 }
  0xf9   :  { %v1789_v18 = vpop.f32.mrb[0].mxu0  ;;  %v364_v22 = vpop.f32.mrb[0].mxu1 }
  0xfa   :  { %v178_v19 = vpop.f32.mrb[1].mxu0  ;;  %386 = vst [vmem:[#allocation2] sm:$0xff] %v364_v22  ;;  %v366_v23 = vpop.f32.mrb[1].mxu1 }
  0xfb   :  { %v179_v20 = vpop.f32.mrb[2].mxu0  ;;  %v367_v24 = vpop.f32.mrb[2].mxu1 }
  0xfc   :  { %199 = vst [vmem:[#allocation2 + $0x8] sm:$0xff] %v179_v20  ;;  %v181_v21 = vpop.f32.mrb[3].mxu0  ;;  %v369_v25 = vpop.f32.mrb[3].mxu1 }
 0x101   :  { %v184_v27 = vpop.f32.mrb[4].mxu0  ;;  %v372_v33 = vpop.f32.mrb[4].mxu1 }
 0x102   :  { %200 = vst [vmem:[#allocation2 + $0x10] sm:$0xff] %v184_v27  ;;  %v186_v28 = vpop.f32.mrb[5].mxu0  ;;  %v374_v34 = vpop.f32.mrb[5].mxu1 }
 0x103   :  { %v206_v29 = vld [vmem:[#allocation2 + $0x8] sm:$0x7f]  ;;  %v187_v30 = vpop.f32.mrb[6].mxu0  ;;  %v375_v35 = vpop.f32.mrb[6].mxu1 }
 0x104   :  { %v208_v31 = vadd.f32 %v206_v29, %v204_v26  ;;  %387 = vst [vmem:[#allocation2 + $0x8] sm:$0xff] %v367_v24  ;;  %201 = vst [vmem:[#allocation2 + $0x18] sm:$0xff] %v187_v30  ;;  %v189_v32 = vpop.f32.mrb[7].mxu0  ;;  %v377_v36 = vpop.f32.mrb[7].mxu1  ;;  %v211_v24 = vld [vmem:[#allocation3 + $0xf] sm:$0xff] }
 0x105   :  { %v1231_v26 = vld [vmem:[%s1833_s2] ss:$0 sm:$0xff]  ;;  %v805_v34 = vpop.permute.xlu0 %804 }
 0x106   :  { %210 = vst [vmem:[#allocation3 + $0x8] sm:$0x7f] %v208_v31 }
 0x109   :  { %v192_v37 = vpop.f32.mrb[8].mxu0  ;;  %v380_v43 = vpop.f32.mrb[8].mxu1 }
 0x10a   :  { %202 = vst [vmem:[#allocation2 + $0x20] sm:$0xf] %v192_v37  ;;  %v194_v38 = vpop.f32.mrb[9].mxu0  ;;  %v382_v44 = vpop.f32.mrb[9].mxu1 }
 0x10b   :  { %v1791_v39 = vld [vmem:[#allocation2 + $0x12] sm:$0xff]  ;;  %v195_v40 = vpop.f32.mrb[10].mxu0  ;;  %v394_v41 = vld [vmem:[#allocation2 + $0x9] sm:$0x7f]  ;;  %v383_v46 = vpop.f32.mrb[10].mxu1  ;;  %v393_v55 = vld [vmem:[#allocation2 + $0x1] sm:$0xff] }
 0x10c   :  { %388 = vst [vmem:[#allocation2 + $0x10] sm:$0xff] %v372_v33  ;;  %v196_v42 = vpop.f32.mrb[11].mxu0  ;;  %v384_v49 = vpop.f32.mrb[11].mxu1  ;;  %v395_v21 = vadd.f32 %v393_v55, %v1789_v18  ;;  %v215_v18 = vadd.f32 %v1791_v39, %v211_v24 }
 0x10d   :  { %v392_v45 = vld [vmem:[#allocation3 + $0x8] sm:$0x7f]  ;;  %v815_v39 = vpop.permute.xlu1 %814 }
 0x10e   :  { %v396_v47 = vadd.f32 %v394_v41, %v392_v45 }
 0x110   :  { %398 = vst [vmem:[#allocation3 + $0x8] sm:$0x7f] %v396_v47 }
 0x111   :  { %v214_v50 = vld [vmem:[#allocation2 + $0x1a] sm:$0x7f]  ;;  %v820_v55 = vpop.permute.xlu1 %819 }
 0x112   :  { %v216_v51 = vadd.f32 %v214_v50, %v212_v48  ;;  %389 = vst [vmem:[#allocation2 + $0x18] sm:$0xff] %v375_v35  ;;  %390 = vst [vmem:[#allocation2 + $0x20] sm:$0xf] %v380_v43  ;;  %v810_v50 = vpop.permute.xlu0 %809 }
 0x114   :  { %218 = vst [vmem:[#allocation3 + $0x17] sm:$0x7f] %v216_v51 }
 0x117   :  { %v580_v10 = vld [vmem:[#allocation3 + $0x8] sm:$0x7f] }
 0x119   :  { %v402_v52 = vld [vmem:[#allocation2 + $0x1b] sm:$0x7f]  ;;  %v401_v0 = vld [vmem:[#allocation2 + $0x13] sm:$0xff] }
 0x11a   :  { %v403_v37 = vadd.f32 %v401_v0, %v215_v18 }
 0x11b   :  { %v400_v53 = vld [vmem:[#allocation3 + $0x17] sm:$0x7f] }
 0x11c   :  { %v404_v54 = vadd.f32 %v402_v52, %v400_v53 }
 0x11d   :  { %v552_v56 = vpop.f32.mrb[12].mxu0 }
 0x11e   :  { %574 = vst [vmem:[#allocation2] sm:$0xff] %v552_v56  ;;  %v554_v57 = vpop.f32.mrb[13].mxu0  ;;  %406 = vst [vmem:[#allocation3 + $0x17] sm:$0x7f] %v404_v54  ;;  %v740_v60 = vpop.f32.mrb[12].mxu1 }
 0x11f   :  { %v555_v58 = vpop.f32.mrb[14].mxu0  ;;  %v742_v61 = vpop.f32.mrb[13].mxu1 }
 0x120   :  { %575 = vst [vmem:[#allocation2 + $0x8] sm:$0xff] %v555_v58  ;;  %v557_v59 = vpop.f32.mrb[15].mxu0  ;;  %v743_v62 = vpop.f32.mrb[14].mxu1 }
 0x121   :  { %v745_v63 = vpop.f32.mrb[15].mxu1 }
 0x125   :  { %v560_v1 = vpop.f32.mrb[16].mxu0  ;;  %v588_v27 = vld [vmem:[#allocation3 + $0x17] sm:$0x7f] }
 0x126   :  { %576 = vst [vmem:[#allocation2 + $0x10] sm:$0xff] %v560_v1  ;;  %v562_v2 = vpop.f32.mrb[17].mxu0  ;;  %v748_v6 = vpop.f32.mrb[16].mxu1 }
 0x127   :  { %v581_v3 = vld [vmem:[#allocation2 + $0x2] sm:$0xff]  ;;  %v563_v4 = vpop.f32.mrb[18].mxu0  ;;  %v750_v7 = vpop.f32.mrb[17].mxu1 }
 0x128   :  { %762 = vst [vmem:[#allocation2] sm:$0xff] %v740_v60  ;;  %577 = vst [vmem:[#allocation2 + $0x18] sm:$0xff] %v563_v4  ;;  %v565_v5 = vpop.f32.mrb[19].mxu0  ;;  %v751_v8 = vpop.f32.mrb[18].mxu1  ;;  %v583_v25 = vadd.f32 %v581_v3, %v395_v21 }
 0x129   :  { %v753_v9 = vpop.f32.mrb[19].mxu1 }
 0x12d   :  { %v582_v11 = vld [vmem:[#allocation2 + $0xa] sm:$0x7f]  ;;  %v568_v12 = vpop.f32.mrb[20].mxu0 }
 0x12e   :  { %v584_v13 = vadd.f32 %v582_v11, %v580_v10  ;;  %763 = vst [vmem:[#allocation2 + $0x8] sm:$0xff] %v743_v62  ;;  %578 = vst [vmem:[#allocation2 + $0x20] sm:$0xf] %v568_v12  ;;  %v570_v14 = vpop.f32.mrb[21].mxu0  ;;  %v756_v19 = vpop.f32.mrb[20].mxu1 }
 0x12f   :  { %v589_v15 = vld [vmem:[#allocation2 + $0x14] sm:$0xff]  ;;  %v571_v16 = vpop.f32.mrb[22].mxu0  ;;  %v758_v20 = vpop.f32.mrb[21].mxu1 }
 0x130   :  { %586 = vst [vmem:[#allocation3 + $0x8] sm:$0x7f] %v584_v13  ;;  %764 = vst [vmem:[#allocation2 + $0x10] sm:$0xff] %v748_v6  ;;  %v572_v17 = vpop.f32.mrb[23].mxu0  ;;  %v759_v22 = vpop.f32.mrb[22].mxu1  ;;  %v591_v40 = vadd.f32 %v589_v15, %v403_v37 }
 0x131   :  { %v760_v23 = vpop.f32.mrb[23].mxu1 }
 0x135   :  { %v590_v28 = vld [vmem:[#allocation2 + $0x1c] sm:$0x7f]  ;;  %v769_v29 = vld [vmem:[#allocation2 + $0x3] sm:$0xff] }
 0x136   :  { %v592_v30 = vadd.f32 %v590_v28, %v588_v27  ;;  %765 = vst [vmem:[#allocation2 + $0x18] sm:$0xff] %v751_v8  ;;  %766 = vst [vmem:[#allocation2 + $0x20] sm:$0xf] %v756_v19  ;;  %v771_v31 = vadd.f32 %v769_v29, %v583_v25 }
 0x137   :  { %v768_v32 = vld [vmem:[#allocation3 + $0x8] sm:$0x7f] }
 0x138   :  { %v770_v33 = vld [vmem:[#allocation2 + $0xb] sm:$0x7f]  ;;  %594 = vst [vmem:[#allocation3 + $0x17] sm:$0x7f] %v592_v30  ;;  %v1798_v36 = vadd.f32 %v1231_v26, %v771_v31 }
 0x139   :  { %v772_v35 = vadd.f32 %v770_v33, %v768_v32  ;;  %v1050_v32 = vlaneseq }
 0x13a   :  { %v822_v38 = vmul.f32 %v805_v34, %v1798_v36  ;;  %v1042_v34 = vld [vmem:[%s1834_s4] sm:$0x1] }
 0x13b   :  { %774 = vst [vmem:[#allocation3 + $0x8] sm:$0x7f] %v772_v35  ;;  %v1051_v33 = vshrl.u32 %v1050_v32, 7 }
 0x13c   :  { %v927_v41 = vmul.f32 %v822_v38, %v822_v38  ;;  %1317 = vmatprep.mubr.f32.mxu0 %v822_v38  ;;  %v1046_v38 = vld [vmem:[%s1835_s5] sm:$0x1] }
 0x13d   :  { %v777_v42 = vld [vmem:[#allocation2 + $0x15] sm:$0xff]  ;;  %v778_v45 = vld [vmem:[#allocation2 + $0x1d] sm:$0x7f]  ;;  %v1052_v18 = vsub.s32 0, %v1051_v33 }
 0x13e   :  { %v779_v43 = vadd.f32 %v777_v42, %v591_v40  ;;  %1355 = vmatprep.mubr.f32.mxu1 %v927_v41 }
 0x13f   :  { %v776_v44 = vld [vmem:[#allocation3 + $0x17] sm:$0x7f] }
 0x140   :  { %v780_v46 = vadd.f32 %v778_v45, %v776_v44  ;;  %781 = vst [vmem:[#allocation3 + $0xf] sm:$0xff] %v779_v43 }
 0x142   :  { %782 = vst [vmem:[#allocation3 + $0x17] sm:$0x7f] %v780_v46 }
 0x147   :  { %v784_v47 = vld [vmem:[#allocation3 + $0x8] sm:$0xff] }
 0x148   :  { %v1801_v48 = vadd.f32 %v1231_v26, %v784_v47 }
 0x149   :  { %v785_v49 = vld [vmem:[#allocation3 + $0x10] sm:$0xff]  ;;  %v786_v51 = vld [vmem:[#allocation3 + $0x18] sm:$0x3f] }
 0x14a   :  { %v1803_v52 = vadd.f32 %v1231_v26, %v785_v49  ;;  %v823_v53 = vmul.f32 %v810_v50, %v1801_v48  ;;  %v1806_v54 = vadd.f32 %v1231_v26, %v786_v51 }
 0x14c   :  { %v824_v56 = vmul.f32 %v815_v39, %v1803_v52  ;;  %v928_v57 = vmul.f32 %v823_v53, %v823_v53  ;;  %v825_v58 = vmul.f32 %v820_v55, %v1806_v54  ;;  %1318 = vmatmul.mubr.f32.vlgmr.msra.gmra.mrb[24].mxu0 %v823_v53 }
 0x14e   :  { %v929_v59 = vmul.f32 %v824_v56, %v824_v56  ;;  %1320 = vmatprep.mubr.f32.mxu0 %v824_v56  ;;  %1356 = vmatmul.mubr.f32.vlgmr.msra.gmra.mrb[24].mxu1 %v928_v57  ;;  %v930_v60 = vmul.f32 %v825_v58, %v825_v58 }
 0x150   :  { %1321 = vmatmul.mubr.f32.gmra.mrb[26].mxu0 %v825_v58  ;;  %1358 = vmatprep.mubr.f32.mxu1 %v929_v59 }
 0x152   :  { %1359 = vmatmul.mubr.f32.gmra.mrb[26].mxu1 %v930_v60 }
 0x21f   :  { %v1319_v61 = vpop.f32.mrb[24].mxu0 }
 0x220   :  { %v908_v62 = vpop.f32.mrb[25].mxu0 }
 0x221   :  { %v1016_v63 = vadd.f32 %v1319_v61, %v908_v62  ;;  %v1357_v0 = vpop.f32.mrb[24].mxu1 }
 0x222   :  { %v997_v1 = vpop.f32.mrb[25].mxu1 }
 0x223   :  { %v1028_v2 = vadd.f32 %v1357_v0, %v997_v1  ;;  %v1322_v3 = vpop.f32.mrb[26].mxu0 }
 0x224   :  { %v918_v4 = vpop.f32.mrb[27].mxu0  ;;  %v1019_v7 = vsel %vm1018_vm1, %v1322_v3, 0.0 }
 0x225   :  { %v1017_v5 = vadd.f32 %v1016_v63, %v918_v4  ;;  %v1360_v6 = vpop.f32.mrb[26].mxu1 }
 0x226   :  { %v1007_v8 = vpop.f32.mrb[27].mxu1  ;;  %v1030_v11 = vsel %vm1018_vm1, %v1360_v6, 0.0 }
 0x227   :  { %v1020_v9 = vadd.f32 %v1019_v7, %v1017_v5  ;;  %v1029_v10 = vadd.f32 %v1028_v2, %v1007_v8 }
 0x229   :  { %v1021_v12 = vrot.slane %v1020_v9, 4  ;;  %v1031_v13 = vadd.f32 %v1030_v11, %v1029_v10 }
 0x22b   :  { %v1022_v14 = vadd.f32 %v1021_v12, %v1020_v9  ;;  %v1032_v15 = vrot.slane %v1031_v13, 4 }
 0x22d   :  { %v1023_v16 = vrot.slane %v1022_v14, 2  ;;  %v1033_v17 = vadd.f32 %v1032_v15, %v1031_v13 }
 0x22f   :  { %v1024_v19 = vadd.f32 %v1023_v16, %v1022_v14  ;;  %v1034_v20 = vrot.slane %v1033_v17, 2 }
 0x231   :  { %v1025_v21 = vrot.slane %v1024_v19, 1  ;;  %v1035_v22 = vadd.f32 %v1034_v20, %v1033_v17 }
 0x233   :  { %v1026_v23 = vadd.f32 %v1025_v21, %v1024_v19  ;;  %v1036_v24 = vrot.slane %v1035_v22, 1 }
 0x235   :  { %v1027_v25 = vmul.f32 0.0078125, %v1026_v23  ;;  %v1037_v26 = vadd.f32 %v1036_v24, %v1035_v22 }
 0x237   :  { %v1039_v27 = vmul.f32 %v1027_v25, %v1027_v25  ;;  %v1038_v28 = vmul.f32 0.0078125, %v1037_v26 }
 0x239   :  { %v1040_v29 = vsub.f32 %v1038_v28, %v1039_v27 }
 0x23b   :  { %v1041_v30 = vmax.f32 %v1040_v29, 0.0 }
 0x23d   :  { %v1043_v31 = vadd.f32 1e-05, %v1041_v30 }
 0x23f   :  { %1479 = vrsqrt.f32 %v1043_v31 }
 0x249   :  { %v1480_v35 = vpop.eup %1479 }
 0x24a   :  { %v1045_v37 = vmul.f32 %v1480_v35, %v1042_v34 }
 0x24c   :  { %v1047_v40 = vmul.f32 %v1045_v37, %v1027_v25  ;;  %v1053_v41 = vrot.slane %v1045_v37, %v1052_v18 }
 0x24e   :  { %v1048_v42 = vsub.f32 %v1046_v38, %v1047_v40  ;;  %v1055_v43 = vmul.f32 %v1053_v41, %v1798_v36  ;;  %v1056_v44 = vmul.f32 %v1053_v41, %v1801_v48  ;;  %v1057_v45 = vmul.f32 %v1053_v41, %v1803_v52 }
 0x24f   :  { %v1058_v46 = vmul.f32 %v1053_v41, %v1806_v54 }
 0x250   :  { %v1063_v39 = vrot.slane %v1048_v42, %v1052_v18 }
 0x252   :  { %v1065_v47 = vadd.f32 %v1063_v39, %v1055_v43  ;;  %v1066_v49 = vadd.f32 %v1063_v39, %v1056_v44  ;;  %v1067_v50 = vadd.f32 %v1063_v39, %v1057_v45  ;;  %v1068_v51 = vadd.f32 %v1063_v39, %v1058_v46 }
 0x254   :  { %vm1069_vm2 = vcmp.ge.f32.partialorder %v1065_v47, 0.0  ;;  %vm1070_vm3 = vcmp.ge.f32.partialorder %v1066_v49, 0.0  ;;  %vm1071_vm4 = vcmp.ge.f32.partialorder %v1067_v50, 0.0  ;;  %vm1072_vm5 = vcmp.ge.f32.partialorder %v1068_v51, 0.0 }
 0x255   :  { %v1073_v53 = vmul.f32 0.2, %v1065_v47  ;;  %v1074_v55 = vmul.f32 0.2, %v1066_v49  ;;  %v1075_v56 = vmul.f32 0.2, %v1067_v50 }
 0x256   :  { %v1076_v57 = vmul.f32 0.2, %v1068_v51 }
 0x257   :  { %v1077_v36 = vsel %vm1069_vm2, %v1065_v47, %v1073_v53  ;;  %v1078_v58 = vsel %vm1070_vm3, %v1066_v49, %v1074_v55  ;;  %v1079_v48 = vsel %vm1071_vm4, %v1067_v50, %v1075_v56 }
 0x258   :  { %v1080_v59 = vsel %vm1072_vm5, %v1068_v51, %v1076_v57  ;;  %v1238_v52 = vpack.c.bf16 %v1079_v48, %v1079_v48  ;;  %v1243_v60 = vpack.c.bf16 %v1078_v58, %v1077_v36 }
 0x259   :  { %v1239_v54 = vpack.c.bf16 %v1080_v59, %v1080_v59 }
 0x25a   :  { %1244 = vst [vmem:[%s1836_s7] sm:$0xff] %v1243_v60   ;;  %1099 = vst [vmem:[%s1836_s7 + $0x8] sm:$0xf] %v1238_v52 }
 0x25b   :  { %1100 = vst [vmem:[%s1836_s7 + $0xc] sm:$0x7] %v1239_v54 }

// kernel: _lambda_.7
= control target key start
LH: loop header
LB: loop body
LE: loop exit
PB: predicated region body
PF: predicated region fallthrough
CT: control target
= control target key end

     0   :  { %v1298_v0 = vmov 0   ;;  %vm127_vm0 = vcmask 261120   ;;  %v1299_v57 = vmov 0.0   ;;  %vm878_vm1 = vcmask 1045504   ;;  %s1608_s1 = inlined_call_operand.vmem [shape: bf16[4,160,128], index: 1, kind: input, shape index: {}]   ;;  %s1609_s0 = inlined_call_operand.vmem [shape: bf16[20,160], index: 0, kind: input, shape index: {}]   ;;  %s1610_s6 = inlined_call_operand.vmem [shape: f32[14,1], index: 6, kind: input, shape index: {}]   ;;  %s1611_s3 = inlined_call_operand.vmem [shape: f32[128,128], index: 3, kind: input, shape index: {}]   ;;  %s1612_s2 = inlined_call_operand.vmem [shape: f32[1,128], index: 2, kind: input, shape index: {}]   ;;  %s1613_s4 = inlined_call_operand.vmem [shape: f32[1,128], index: 4, kind: input, shape index: {}]   ;;  %s1614_s5 = inlined_call_operand.vmem [shape: f32[1,128], index: 5, kind: input, shape index: {}]   ;;  %s1615_s7 = inlined_call_operand.vmem [shape: bf16[14,128], index: 7, kind: output, shape index: {}]  }
   0x1   :  { %134 = vmatprep.subr.bf16.mxu0 %v1298_v0  ;;  %v1245_v1 = vld [vmem:[%s1608_s1] sm:$0xff]   ;;  %298 = vmatprep.subr.bf16.mxu1 %v1298_v0  ;;  %v1246_v2 = vld [vmem:[%s1608_s1 + $0x8] sm:$0xff]   ;;  %v1247_v3 = vld [vmem:[%s1608_s1 + $0x50] sm:$0xff]   ;;  %27 = vst [vmem:[#allocation3] sm:$0xff] %v1299_v57 }
   0x2   :  { %1244 = vset.pattern.permute.xlu0 %v1298_v0  ;;  %135 = vmatpush1.bf16.msra.mxu0 %v1245_v1  ;;  %v1249_v4 = vld [vmem:[%s1608_s1 + $0x58] sm:$0xff]   ;;  %v1248_v5 = vld [vmem:[%s1608_s1 + $0x10] sm:$0xff]   ;;  %v1251_v6 = vld [vmem:[%s1608_s1 + $0x60] sm:$0xff]   ;;  %28 = vst [vmem:[#allocation3 + $0x8] sm:$0x3f] %v1299_v57 }
   0x3   :  { %136 = vmatprep.subr.bf16.mxu0 %v1298_v0  ;;  %299 = vmatpush1.bf16.msra.mxu1 %v1247_v3  ;;  %v1250_v7 = vld [vmem:[%s1608_s1 + $0x18] sm:$0xff]   ;;  %v1253_v8 = vld [vmem:[%s1608_s1 + $0x68] sm:$0xff]   ;;  %v1252_v9 = vld [vmem:[%s1608_s1 + $0x20] sm:$0xff]  }
   0x4   :  { %300 = vmatprep.subr.bf16.mxu1 %v1298_v0  ;;  %v1255_v10 = vld [vmem:[%s1608_s1 + $0x70] sm:$0xff]   ;;  %v1254_v11 = vld [vmem:[%s1608_s1 + $0x28] sm:$0xff]   ;;  %v1257_v13 = vld [vmem:[%s1608_s1 + $0x78] sm:$0xff]  }
   0x5   :  { %v1388_v12 = vld [vmem:[%s1609_s0 + $0x4] ss:$8 sps:$4 sm:$0xff]   ;;  %v1256_v14 = vld [vmem:[%s1608_s1 + $0x30] sm:$0xff]   ;;  %v1258_v16 = vld [vmem:[%s1608_s1 + $0x38] sm:$0xff]  }
   0x6   :  { %137 = vmatpush1.bf16.msra.mxu0 %v1246_v2  ;;  %957 = vmatprep.mubr.msk.bf16.mxu0 %vm127_vm0, %v1388_v12  ;;  %v1259_v15 = vld [vmem:[%s1608_s1 + $0x80] sm:$0xff]   ;;  %v1261_v17 = vld [vmem:[%s1608_s1 + $0x88] sm:$0xff]   ;;  %v1266_v19 = vld [vmem:[%s1608_s1 + $0x90] sm:$0xff]  }
   0x7   :  { %138 = vmatprep.subr.bf16.mxu0 %v1298_v0  ;;  %301 = vmatpush1.bf16.msra.mxu1 %v1249_v4  ;;  %v1260_v18 = vld [vmem:[%s1608_s1 + $0x40] sm:$0xff]   ;;  %v1262_v20 = vld [vmem:[%s1608_s1 + $0x48] sm:$0xff]   ;;  %v31_v22 = vld [vmem:[%s1609_s0 + $0x10] sm:$0x33] }
   0x8   :  { %302 = vmatprep.subr.bf16.mxu1 %v1298_v0  ;;  %993 = vmatprep.mubr.msk.bf16.mxu1 %vm127_vm0, %v1388_v12  ;;  %v1429_v21 = vld [vmem:[%s1609_s0] ss:$8 sps:$4 sm:$0xff]   ;;  %v1268_v23 = vld [vmem:[%s1608_s1 + $0x98] sm:$0xff]   ;;  %v195_v24 = vld [vmem:[%s1609_s0 + $0x10] sm:$0x33]  ;;  %v946_v26 = vcombine.high %v31_v22, %v31_v22  ;;  %v945_v32 = vcombine.low %v31_v22, %v31_v22 }
   0x9   :  { %v1267_v25 = vld [vmem:[%s1608_s1 + $0xa0] sm:$0xff]   ;;  %v1272_v27 = vld [vmem:[%s1608_s1 + $0xf0] sm:$0xff]   ;;  %v982_v28 = vcombine.high %v195_v24, %v195_v24  ;;  %v1269_v29 = vld [vmem:[%s1608_s1 + $0xa8] sm:$0xff]   ;;  %v981_v34 = vcombine.low %v195_v24, %v195_v24 }
   0xa   :  { %139 = vmatpush1.bf16.msra.mxu0 %v1248_v5  ;;  %v696_v30 = vld [vmem:[%s1610_s6] sm:$0xff]  ;;  %v1274_v31 = vld [vmem:[%s1608_s1 + $0xf8] sm:$0xff]   ;;  %v1273_v33 = vld [vmem:[%s1608_s1 + $0xb0] sm:$0xff]  }
   0xb   :  { %140 = vmatprep.subr.bf16.mxu0 %v1298_v0  ;;  %303 = vmatpush1.bf16.msra.mxu1 %v1251_v6  ;;  %v1278_v35 = vld [vmem:[%s1608_s1 + $0x100] sm:$0xff]   ;;  %v1275_v36 = vld [vmem:[%s1608_s1 + $0xb8] sm:$0xff]   ;;  %v697_v37 = vld [vmem:[%s1610_s6 + $0x8] sm:$0x3f] }
   0xc   :  { %304 = vmatprep.subr.bf16.mxu1 %v1298_v0  ;;  %700 = vperm.xlu0 %1244, %v696_v30   ;;  %v1280_v38 = vld [vmem:[%s1608_s1 + $0x108] sm:$0xff]   ;;  %v1279_v39 = vld [vmem:[%s1608_s1 + $0xc0] sm:$0xff]   ;;  %v1282_v40 = vld [vmem:[%s1608_s1 + $0x110] sm:$0xff]  }
   0xd   :  { %v1281_v41 = vld [vmem:[%s1608_s1 + $0xc8] sm:$0xff]   ;;  %v1284_v42 = vld [vmem:[%s1608_s1 + $0x118] sm:$0xff]   ;;  %v1283_v43 = vld [vmem:[%s1608_s1 + $0xd0] sm:$0xff]  }
   0xe   :  { %141 = vmatpush1.bf16.msra.mxu0 %v1250_v7  ;;  %v1286_v44 = vld [vmem:[%s1608_s1 + $0x120] sm:$0xff]   ;;  %v1285_v45 = vld [vmem:[%s1608_s1 + $0xd8] sm:$0xff]   ;;  %v1288_v46 = vld [vmem:[%s1608_s1 + $0x128] sm:$0xff]  }
   0xf   :  { %142 = vmatprep.subr.bf16.mxu0 %v1298_v0  ;;  %305 = vmatpush1.bf16.msra.mxu1 %v1253_v8  ;;  %v1287_v47 = vld [vmem:[%s1608_s1 + $0xe0] sm:$0xff]   ;;  %v1290_v48 = vld [vmem:[%s1608_s1 + $0x130] sm:$0xff]   ;;  %v1289_v49 = vld [vmem:[%s1608_s1 + $0xe8] sm:$0xff]  }
  0x10   :  { %306 = vmatprep.subr.bf16.mxu1 %v1298_v0  ;;  %705 = vperm.xlu0 %1244, %v697_v37   ;;  %v359_v50 = vld [vmem:[%s1609_s0 + $0x10] sm:$0x33]  ;;  %v1291_v51 = vld [vmem:[%s1608_s1 + $0x138] sm:$0xff]   ;;  %v710_v58 = vld [vmem:[%s1611_s3] sm:$0xff] }
  0x11   :  { %v523_v52 = vld [vmem:[%s1609_s0 + $0x10] sm:$0x33]  ;;  %v1018_v53 = vcombine.high %v359_v50, %v359_v50  ;;  %v1017_v55 = vcombine.low %v359_v50, %v359_v50  ;;  %v711_v59 = vld [vmem:[%s1611_s3 + $0x8] sm:$0xff]  ;;  %v713_v62 = vld [vmem:[%s1611_s3 + $0x18] sm:$0xff] }
  0x12   :  { %143 = vmatpush1.bf16.msra.mxu0 %v1252_v9  ;;  %v1054_v54 = vcombine.high %v523_v52, %v523_v52  ;;  %v1053_v56 = vcombine.low %v523_v52, %v523_v52  ;;  %v1178_v60 = vpack.c.bf16 %v711_v59, %v710_v58  ;;  %v712_v61 = vld [vmem:[%s1611_s3 + $0x10] sm:$0xff]  ;;  %v715_v1 = vld [vmem:[%s1611_s3 + $0x28] sm:$0xff]  ;;  %v717_v4 = vld [vmem:[%s1611_s3 + $0x38] sm:$0xff] }
  0x13   :  { %144 = vmatprep.subr.bf16.mxu0 %v1298_v0  ;;  %307 = vmatpush1.bf16.msra.mxu1 %v1255_v10  ;;  %v1182_v63 = vpack.c.bf16 %v713_v62, %v712_v61  ;;  %v716_v3 = vld [vmem:[%s1611_s3 + $0x30] sm:$0xff]  ;;  %v718_v6 = vld [vmem:[%s1611_s3 + $0x40] sm:$0xff]  ;;  %v719_v7 = vld [vmem:[%s1611_s3 + $0x48] sm:$0xff] }
  0x14   :  { %308 = vmatprep.subr.bf16.mxu1 %v1298_v0  ;;  %v1190_v5 = vpack.c.bf16 %v717_v4, %v716_v3  ;;  %v1194_v8 = vpack.c.bf16 %v719_v7, %v718_v6  ;;  %v720_v9 = vld [vmem:[%s1611_s3 + $0x50] sm:$0xff]  ;;  %v721_v10 = vld [vmem:[%s1611_s3 + $0x58] sm:$0xff] }
  0x15   :  { %v189_v37 = vld [vmem:[#allocation3 + $0x7] sm:$0x7f] }
  0x16   :  { %145 = vmatpush1.bf16.msra.mxu0 %v1254_v11  ;;  %v1198_v11 = vpack.c.bf16 %v721_v10, %v720_v9 }
  0x17   :  { %146 = vmatprep.subr.bf16.mxu0 %v1298_v0  ;;  %309 = vmatpush1.bf16.msra.mxu1 %v1257_v13  ;;  %v723_v13 = vld [vmem:[%s1611_s3 + $0x68] sm:$0xff] }
  0x18   :  { %310 = vmatprep.subr.bf16.mxu1 %v1298_v0 }
  0x1a   :  { %147 = vmatpush1.bf16.msra.mxu0 %v1256_v14 }
  0x1b   :  { %148 = vmatprep.subr.bf16.mxu0 %v1298_v0  ;;  %311 = vmatpush1.bf16.msra.mxu1 %v1259_v15  ;;  %v724_v15 = vld [vmem:[%s1611_s3 + $0x70] sm:$0xff] }
  0x1c   :  { %312 = vmatprep.subr.bf16.mxu1 %v1298_v0 }
  0x1e   :  { %149 = vmatpush1.bf16.msra.mxu0 %v1258_v16  ;;  %v725_v16 = vld [vmem:[%s1611_s3 + $0x78] sm:$0xff] }
  0x1f   :  { %150 = vmatprep.subr.bf16.mxu0 %v1298_v0  ;;  %313 = vmatpush1.bf16.msra.mxu1 %v1261_v17  ;;  %v1206_v17 = vpack.c.bf16 %v725_v16, %v724_v15 }
  0x20   :  { %314 = vmatprep.subr.bf16.mxu1 %v1298_v0 }
  0x22   :  { %151 = vmatpush1.bf16.msra.mxu0 %v1260_v18 }
  0x23   :  { %152 = vmatprep.subr.bf16.mxu0 %v1298_v0  ;;  %315 = vmatpush1.bf16.msra.mxu1 %v1266_v19 }
  0x24   :  { %316 = vmatprep.subr.bf16.mxu1 %v1298_v0 }
  0x26   :  { %153 = vmatpush1.bf16.msra.mxu0 %v1262_v20 }
  0x27   :  { %462 = vmatprep.subr.bf16.mxu0 %v1298_v0  ;;  %317 = vmatpush1.bf16.msra.mxu1 %v1268_v23 }
  0x28   :  { %626 = vmatprep.subr.bf16.mxu1 %v1298_v0 }
  0x29   :  { %167 = vmatmul.mubr.bf16.vlgmr.msra.gmra.mrb[0].mxu0 %v1429_v21 }
  0x2a   :  { %463 = vmatpush1.bf16.msra.mxu0 %v1267_v25  ;;  %958 = vmatprep.mubr.msk.bf16.mxu0 %vm127_vm0, %v946_v26  ;;  %v185_v26 = vld [vmem:[#allocation3] sm:$0x7f] }
  0x2b   :  { %464 = vmatprep.subr.bf16.mxu0 %v1298_v0  ;;  %331 = vmatmul.mubr.bf16.vlgmr.msra.gmra.mrb[0].mxu1 %v1429_v21 }
  0x2c   :  { %627 = vmatpush1.bf16.msra.mxu1 %v1272_v27  ;;  %994 = vmatprep.mubr.msk.bf16.mxu1 %vm127_vm0, %v982_v28 }
  0x2d   :  { %628 = vmatprep.subr.bf16.mxu1 %v1298_v0 }
  0x2e   :  { %465 = vmatpush1.bf16.msra.mxu0 %v1269_v29 }
  0x2f   :  { %466 = vmatprep.subr.bf16.mxu0 %v1298_v0 }
  0x30   :  { %629 = vmatpush1.bf16.msra.mxu1 %v1274_v31 }
  0x31   :  { %175 = vmatmul.mubr.bf16.gmra.mrb[4].mxu0 %v945_v32  ;;  %630 = vmatprep.subr.bf16.mxu1 %v1298_v0 }
  0x32   :  { %467 = vmatpush1.bf16.msra.mxu0 %v1273_v33  ;;  %1029 = vmatprep.mubr.msk.bf16.mxu0 %vm127_vm0, %v1388_v12 }
  0x33   :  { %468 = vmatprep.subr.bf16.mxu0 %v1298_v0  ;;  %339 = vmatmul.mubr.bf16.gmra.mrb[4].mxu1 %v981_v34 }
  0x34   :  { %631 = vmatpush1.bf16.msra.mxu1 %v1278_v35  ;;  %1065 = vmatprep.mubr.msk.bf16.mxu1 %vm127_vm0, %v1388_v12  ;;  %v722_v12 = vld [vmem:[%s1611_s3 + $0x60] sm:$0xff] }
  0x35   :  { %632 = vmatprep.subr.bf16.mxu1 %v1298_v0  ;;  %v1202_v14 = vpack.c.bf16 %v723_v13, %v722_v12 }
  0x36   :  { %469 = vmatpush1.bf16.msra.mxu0 %v1275_v36 }
  0x37   :  { %470 = vmatprep.subr.bf16.mxu0 %v1298_v0 }
  0x38   :  { %633 = vmatpush1.bf16.msra.mxu1 %v1280_v38 }
  0x39   :  { %634 = vmatprep.subr.bf16.mxu1 %v1298_v0 }
  0x3a   :  { %471 = vmatpush1.bf16.msra.mxu0 %v1279_v39 }
  0x3b   :  { %472 = vmatprep.subr.bf16.mxu0 %v1298_v0 }
  0x3c   :  { %635 = vmatpush1.bf16.msra.mxu1 %v1282_v40 }
  0x3d   :  { %636 = vmatprep.subr.bf16.mxu1 %v1298_v0 }
  0x3e   :  { %473 = vmatpush1.bf16.msra.mxu0 %v1281_v41 }
  0x3f   :  { %474 = vmatprep.subr.bf16.mxu0 %v1298_v0 }
  0x40   :  { %637 = vmatpush1.bf16.msra.mxu1 %v1284_v42 }
  0x41   :  { %638 = vmatprep.subr.bf16.mxu1 %v1298_v0 }
  0x42   :  { %475 = vmatpush1.bf16.msra.mxu0 %v1283_v43 }
  0x43   :  { %476 = vmatprep.subr.bf16.mxu0 %v1298_v0 }
  0x44   :  { %639 = vmatpush1.bf16.msra.mxu1 %v1286_v44 }
  0x45   :  { %640 = vmatprep.subr.bf16.mxu1 %v1298_v0 }
  0x46   :  { %477 = vmatpush1.bf16.msra.mxu0 %v1285_v45 }
  0x47   :  { %478 = vmatprep.subr.bf16.mxu0 %v1298_v0 }
  0x48   :  { %641 = vmatpush1.bf16.msra.mxu1 %v1288_v46 }
  0x49   :  { %642 = vmatprep.subr.bf16.mxu1 %v1298_v0 }
  0x4a   :  { %479 = vmatpush1.bf16.msra.mxu0 %v1287_v47 }
  0x4b   :  { %480 = vmatprep.subr.bf16.mxu0 %v1298_v0 }
  0x4c   :  { %643 = vmatpush1.bf16.msra.mxu1 %v1290_v48 }
  0x4d   :  { %644 = vmatprep.subr.bf16.mxu1 %v1298_v0  ;;  %v714_v0 = vld [vmem:[%s1611_s3 + $0x20] sm:$0xff] }
  0x4e   :  { %481 = vmatpush1.bf16.msra.mxu0 %v1289_v49  ;;  %v1186_v2 = vpack.c.bf16 %v715_v1, %v714_v0 }
  0x4f   :  { %1179 = vmatprep.subr.bf16.mxu0 %v1178_v60 }
  0x50   :  { %645 = vmatpush1.bf16.msra.mxu1 %v1291_v51 }
  0x51   :  { %495 = vmatmul.mubr.bf16.vlgmr.msra.gmra.mrb[8].mxu0 %v1429_v21  ;;  %1211 = vmatprep.subr.bf16.mxu1 %v1178_v60 }
  0x52   :  { %1030 = vmatprep.mubr.msk.bf16.mxu0 %vm127_vm0, %v1018_v53  ;;  %1181 = vmatpush3.bf16.msra.mxu0 %v1178_v60 }
  0x53   :  { %659 = vmatmul.mubr.bf16.vlgmr.msra.gmra.mrb[8].mxu1 %v1429_v21  ;;  %1183 = vmatprep.subr.bf16.mxu0 %v1182_v63 }
  0x54   :  { %1066 = vmatprep.mubr.msk.bf16.mxu1 %vm127_vm0, %v1054_v54  ;;  %1213 = vmatpush3.bf16.msra.mxu1 %v1178_v60 }
  0x55   :  { %1215 = vmatprep.subr.bf16.mxu1 %v1182_v63 }
  0x56   :  { %1185 = vmatpush3.bf16.msra.mxu0 %v1182_v63 }
  0x57   :  { %1187 = vmatprep.subr.bf16.mxu0 %v1186_v2 }
  0x58   :  { %1217 = vmatpush3.bf16.msra.mxu1 %v1182_v63 }
  0x59   :  { %503 = vmatmul.mubr.bf16.gmra.mrb[12].mxu0 %v1017_v55  ;;  %1219 = vmatprep.subr.bf16.mxu1 %v1186_v2 }
  0x5a   :  { %1189 = vmatpush3.bf16.msra.mxu0 %v1186_v2 }
  0x5b   :  { %667 = vmatmul.mubr.bf16.gmra.mrb[12].mxu1 %v1053_v56  ;;  %1191 = vmatprep.subr.bf16.mxu0 %v1190_v5 }
  0x5c   :  { %1221 = vmatpush3.bf16.msra.mxu1 %v1186_v2 }
  0x5d   :  { %1223 = vmatprep.subr.bf16.mxu1 %v1190_v5 }
  0x5e   :  { %1193 = vmatpush3.bf16.msra.mxu0 %v1190_v5 }
  0x5f   :  { %1195 = vmatprep.subr.bf16.mxu0 %v1194_v8 }
  0x60   :  { %1225 = vmatpush3.bf16.msra.mxu1 %v1190_v5 }
  0x61   :  { %1227 = vmatprep.subr.bf16.mxu1 %v1194_v8 }
  0x62   :  { %1197 = vmatpush3.bf16.msra.mxu0 %v1194_v8 }
  0x63   :  { %1199 = vmatprep.subr.bf16.mxu0 %v1198_v11 }
  0x64   :  { %1229 = vmatpush3.bf16.msra.mxu1 %v1194_v8 }
  0x65   :  { %1231 = vmatprep.subr.bf16.mxu1 %v1198_v11 }
  0x66   :  { %1201 = vmatpush3.bf16.msra.mxu0 %v1198_v11 }
  0x67   :  { %1203 = vmatprep.subr.bf16.mxu0 %v1202_v14 }
  0x68   :  { %1233 = vmatpush3.bf16.msra.mxu1 %v1198_v11  ;;  %v1067_v11 = vld [vmem:[%s1612_s2] ss:$0 sm:$0xff] }
  0x69   :  { %1235 = vmatprep.subr.bf16.mxu1 %v1202_v14 }
  0x6a   :  { %1205 = vmatpush3.bf16.msra.mxu0 %v1202_v14 }
  0x6b   :  { %1207 = vmatprep.subr.bf16.mxu0 %v1206_v17 }
  0x6c   :  { %1237 = vmatpush3.bf16.msra.mxu1 %v1202_v14 }
  0x6d   :  { %1239 = vmatprep.subr.bf16.mxu1 %v1206_v17 }
  0x6e   :  { %1209 = vmatpush3.bf16.msra.mxu0 %v1206_v17 }
  0x70   :  { %1241 = vmatpush3.bf16.msra.mxu1 %v1206_v17 }
  0x8b   :  { %v701_v10 = vpop.permute.xlu0 %700 }
  0x8f   :  { %v706_v16 = vpop.permute.xlu0 %705 }
  0xfc   :  { %v168_v18 = vpop.f32.mrb[0].mxu0 }
  0xfd   :  { %182 = vst [vmem:[#allocation2] sm:$0xff] %v168_v18  ;;  %v170_v19 = vpop.f32.mrb[1].mxu0 }
  0xfe   :  { %v171_v20 = vpop.f32.mrb[2].mxu0  ;;  %v332_v21 = vpop.f32.mrb[0].mxu1 }
  0xff   :  { %183 = vst [vmem:[#allocation2 + $0x8] sm:$0xff] %v171_v20  ;;  %v173_v22 = vpop.f32.mrb[3].mxu0  ;;  %v334_v23 = vpop.f32.mrb[1].mxu1 }
 0x100   :  { %v335_v24 = vpop.f32.mrb[2].mxu1 }
 0x101   :  { %v337_v25 = vpop.f32.mrb[3].mxu1 }
 0x104   :  { %v176_v27 = vpop.f32.mrb[4].mxu0  ;;  %v186_v28 = vld [vmem:[#allocation2] sm:$0x7f] }
 0x105   :  { %184 = vst [vmem:[#allocation2 + $0x10] sm:$0xf] %v176_v27  ;;  %v187_v29 = vadd.f32 %v186_v28, %v185_v26  ;;  %346 = vst [vmem:[#allocation2] sm:$0xff] %v332_v21  ;;  %v178_v30 = vpop.f32.mrb[5].mxu0 }
 0x106   :  { %v340_v31 = vpop.f32.mrb[4].mxu1  ;;  %v179_v32 = vpop.f32.mrb[6].mxu0 }
 0x107   :  { %188 = vst [vmem:[#allocation3] sm:$0x7f] %v187_v29  ;;  %v180_v33 = vpop.f32.mrb[7].mxu0  ;;  %v342_v34 = vpop.f32.mrb[5].mxu1 }
 0x108   :  { %v343_v35 = vpop.f32.mrb[6].mxu1 }
 0x109   :  { %v344_v36 = vpop.f32.mrb[7].mxu1 }
 0x10c   :  { %v190_v38 = vld [vmem:[#allocation2 + $0xa] sm:$0x7f]  ;;  %v350_v39 = vld [vmem:[#allocation2 + $0x1] sm:$0x7f] }
 0x10d   :  { %v191_v40 = vadd.f32 %v190_v38, %v189_v37  ;;  %347 = vst [vmem:[#allocation2 + $0x8] sm:$0xff] %v335_v24  ;;  %348 = vst [vmem:[#allocation2 + $0x10] sm:$0xf] %v340_v31 }
 0x10e   :  { %v349_v41 = vld [vmem:[#allocation3] sm:$0x7f] }
 0x10f   :  { %192 = vst [vmem:[#allocation3 + $0x7] sm:$0x7f] %v191_v40  ;;  %v351_v42 = vadd.f32 %v350_v39, %v349_v41 }
 0x111   :  { %352 = vst [vmem:[#allocation3] sm:$0x7f] %v351_v42 }
 0x114   :  { %v354_v44 = vld [vmem:[#allocation2 + $0xb] sm:$0x7f] }
 0x116   :  { %v353_v43 = vld [vmem:[#allocation3 + $0x7] sm:$0x7f] }
 0x117   :  { %v355_v45 = vadd.f32 %v354_v44, %v353_v43 }
 0x118   :  { %v513_v56 = vld [vmem:[#allocation3] sm:$0x7f] }
 0x119   :  { %356 = vst [vmem:[#allocation3 + $0x7] sm:$0x7f] %v355_v45 }
 0x120   :  { %v517_v1 = vld [vmem:[#allocation3 + $0x7] sm:$0x7f] }
 0x124   :  { %v496_v46 = vpop.f32.mrb[8].mxu0 }
 0x125   :  { %510 = vst [vmem:[#allocation2] sm:$0xff] %v496_v46  ;;  %v498_v47 = vpop.f32.mrb[9].mxu0 }
 0x126   :  { %v499_v48 = vpop.f32.mrb[10].mxu0  ;;  %v660_v49 = vpop.f32.mrb[8].mxu1  ;;  %v908_v47 = vlaneseq }
 0x127   :  { %511 = vst [vmem:[#allocation2 + $0x8] sm:$0xff] %v499_v48  ;;  %v501_v50 = vpop.f32.mrb[11].mxu0  ;;  %v662_v51 = vpop.f32.mrb[9].mxu1 }
 0x128   :  { %v663_v52 = vpop.f32.mrb[10].mxu1  ;;  %v909_v48 = vshrl.u32 %v908_v47, 7 }
 0x129   :  { %v665_v53 = vpop.f32.mrb[11].mxu1 }
 0x12a   :  { %v910_v50 = vsub.s32 0, %v909_v48  ;;  %v904_v53 = vld [vmem:[%s1614_s5] sm:$0x1] }
 0x12c   :  { %v504_v54 = vpop.f32.mrb[12].mxu0 }
 0x12d   :  { %512 = vst [vmem:[#allocation2 + $0x10] sm:$0xf] %v504_v54  ;;  %v506_v55 = vpop.f32.mrb[13].mxu0 }
 0x12e   :  { %v514_v57 = vld [vmem:[#allocation2 + $0x2] sm:$0x7f]  ;;  %v507_v58 = vpop.f32.mrb[14].mxu0  ;;  %v668_v59 = vpop.f32.mrb[12].mxu1 }
 0x12f   :  { %v515_v60 = vadd.f32 %v514_v57, %v513_v56  ;;  %674 = vst [vmem:[#allocation2] sm:$0xff] %v660_v49  ;;  %v508_v61 = vpop.f32.mrb[15].mxu0  ;;  %v670_v62 = vpop.f32.mrb[13].mxu1  ;;  %v900_v49 = vld [vmem:[%s1613_s4] sm:$0x1] }
 0x130   :  { %v671_v63 = vpop.f32.mrb[14].mxu1 }
 0x131   :  { %516 = vst [vmem:[#allocation3] sm:$0x7f] %v515_v60  ;;  %v672_v0 = vpop.f32.mrb[15].mxu1 }
 0x134   :  { %v518_v2 = vld [vmem:[#allocation2 + $0xc] sm:$0x7f] }
 0x135   :  { %v519_v3 = vadd.f32 %v518_v2, %v517_v1  ;;  %675 = vst [vmem:[#allocation2 + $0x8] sm:$0xff] %v663_v52  ;;  %676 = vst [vmem:[#allocation2 + $0x10] sm:$0xf] %v668_v59 }
 0x137   :  { %520 = vst [vmem:[#allocation3 + $0x7] sm:$0x7f] %v519_v3 }
 0x138   :  { %v677_v4 = vld [vmem:[#allocation3] sm:$0x7f] }
 0x13c   :  { %v678_v5 = vld [vmem:[#allocation2 + $0x3] sm:$0x7f]  ;;  %v682_v8 = vld [vmem:[#allocation2 + $0xd] sm:$0x7f] }
 0x13d   :  { %v679_v6 = vadd.f32 %v678_v5, %v677_v4 }
 0x13e   :  { %v681_v7 = vld [vmem:[#allocation3 + $0x7] sm:$0x7f] }
 0x13f   :  { %680 = vst [vmem:[#allocation3] sm:$0x7f] %v679_v6  ;;  %v683_v9 = vadd.f32 %v682_v8, %v681_v7 }
 0x141   :  { %684 = vst [vmem:[#allocation3 + $0x7] sm:$0x7f] %v683_v9 }
 0x148   :  { %v685_v12 = vld [vmem:[#allocation3] sm:$0xff]  ;;  %v686_v13 = vld [vmem:[#allocation3 + $0x8] sm:$0x3f] }
 0x149   :  { %v694_v14 = vadd.f32 %v1067_v11, %v685_v12  ;;  %v695_v15 = vadd.f32 %v1067_v11, %v686_v13 }
 0x14b   :  { %v708_v17 = vmul.f32 %v701_v10, %v694_v14  ;;  %v709_v18 = vmul.f32 %v706_v16, %v695_v15 }
 0x14d   :  { %v801_v19 = vmul.f32 %v708_v17, %v708_v17  ;;  %v802_v20 = vmul.f32 %v709_v18, %v709_v18  ;;  %1140 = vmatprep.mubr.f32.mxu0 %v708_v17 }
 0x14e   :  { %1141 = vmatmul.mubr.f32.vlgmr.msra.gmra.mrb[16].mxu0 %v709_v18 }
 0x14f   :  { %1175 = vmatprep.mubr.f32.mxu1 %v801_v19 }
 0x150   :  { %1176 = vmatmul.mubr.f32.vlgmr.msra.gmra.mrb[16].mxu1 %v802_v20 }
 0x221   :  { %v1142_v21 = vpop.f32.mrb[16].mxu0 }
 0x222   :  { %v879_v22 = vsel %vm878_vm1, %v1142_v21, 0.0  ;;  %v792_v23 = vpop.f32.mrb[17].mxu0 }
 0x223   :  { %v880_v24 = vadd.f32 %v879_v22, %v792_v23  ;;  %v1177_v25 = vpop.f32.mrb[16].mxu1 }
 0x224   :  { %v888_v26 = vsel %vm878_vm1, %v1177_v25, 0.0  ;;  %v869_v27 = vpop.f32.mrb[17].mxu1 }
 0x225   :  { %v881_v28 = vrot.slane %v880_v24, 4  ;;  %v889_v29 = vadd.f32 %v888_v26, %v869_v27 }
 0x227   :  { %v882_v30 = vadd.f32 %v881_v28, %v880_v24  ;;  %v890_v31 = vrot.slane %v889_v29, 4 }
 0x229   :  { %v883_v32 = vrot.slane %v882_v30, 2  ;;  %v891_v33 = vadd.f32 %v890_v31, %v889_v29 }
 0x22b   :  { %v884_v34 = vadd.f32 %v883_v32, %v882_v30  ;;  %v892_v35 = vrot.slane %v891_v33, 2 }
 0x22d   :  { %v885_v36 = vrot.slane %v884_v34, 1  ;;  %v893_v37 = vadd.f32 %v892_v35, %v891_v33 }
 0x22f   :  { %v886_v38 = vadd.f32 %v885_v36, %v884_v34  ;;  %v894_v39 = vrot.slane %v893_v37, 1 }
 0x231   :  { %v887_v40 = vmul.f32 0.03125, %v886_v38  ;;  %v895_v41 = vadd.f32 %v894_v39, %v893_v37 }
 0x233   :  { %v897_v42 = vmul.f32 %v887_v40, %v887_v40  ;;  %v896_v43 = vmul.f32 0.03125, %v895_v41 }
 0x235   :  { %v898_v44 = vsub.f32 %v896_v43, %v897_v42 }
 0x237   :  { %v899_v45 = vmax.f32 %v898_v44, 0.0 }
 0x239   :  { %v901_v46 = vadd.f32 1e-05, %v899_v45 }
 0x23b   :  { %1296 = vrsqrt.f32 %v901_v46 }
 0x245   :  { %v1297_v51 = vpop.eup %1296 }
 0x246   :  { %v903_v52 = vmul.f32 %v1297_v51, %v900_v49 }
 0x248   :  { %v905_v54 = vmul.f32 %v903_v52, %v887_v40  ;;  %v911_v55 = vrot.slane %v903_v52, %v910_v50 }
 0x24a   :  { %v906_v56 = vsub.f32 %v904_v53, %v905_v54  ;;  %v913_v57 = vmul.f32 %v911_v55, %v694_v14  ;;  %v914_v58 = vmul.f32 %v911_v55, %v695_v15 }
 0x24c   :  { %v919_v59 = vrot.slane %v906_v56, %v910_v50 }
 0x24e   :  { %v921_v60 = vadd.f32 %v919_v59, %v913_v57  ;;  %v922_v61 = vadd.f32 %v919_v59, %v914_v58 }
 0x250   :  { %vm923_vm2 = vcmp.ge.f32.partialorder %v921_v60, 0.0  ;;  %vm924_vm3 = vcmp.ge.f32.partialorder %v922_v61, 0.0  ;;  %v925_v62 = vmul.f32 0.2, %v921_v60  ;;  %v926_v63 = vmul.f32 0.2, %v922_v61 }
 0x252   :  { %v927_v0 = vsel %vm923_vm2, %v921_v60, %v925_v62  ;;  %v928_v1 = vsel %vm924_vm3, %v922_v61, %v926_v63 }
 0x253   :  { %v1070_v2 = vpack.c.bf16 %v927_v0, %v927_v0  ;;  %v1071_v3 = vpack.c.bf16 %v928_v1, %v928_v1 }
 0x255   :  { %937 = vst [vmem:[%s1615_s7] sm:$0xf] %v1070_v2  ;;  %938 = vst [vmem:[%s1615_s7 + $0x4] sm:$0x7] %v1071_v3 }

// kernel: _lambda_.8
= control target key start
LH: loop header
LB: loop body
LE: loop exit
PB: predicated region body
PF: predicated region fallthrough
CT: control target
= control target key end

     0   :  { %v1776_v1 = vmov 0   ;;  %vm185_vm0 = vcmask 523264   ;;  %vm28_vm1 = vcmask 521216   ;;  %vm235_vm2 = vcmask 519168   ;;  %s2347_s1 = inlined_call_operand.vmem [shape: bf16[4,192,192], index: 1, kind: input, shape index: {}]   ;;  %s2348_s0 = inlined_call_operand.vmem [shape: bf16[12,192], index: 0, kind: input, shape index: {}]   ;;  %s2349_s6 = inlined_call_operand.vmem [shape: f32[6,1], index: 6, kind: input, shape index: {}]   ;;  %s2350_s3 = inlined_call_operand.vmem [shape: f32[192,192], index: 3, kind: input, shape index: {}]   ;;  %s2351_s2 = inlined_call_operand.vmem [shape: f32[1,192], index: 2, kind: input, shape index: {}]   ;;  %s2352_s4 = inlined_call_operand.vmem [shape: f32[1,192], index: 4, kind: input, shape index: {}]   ;;  %s2353_s5 = inlined_call_operand.vmem [shape: f32[1,192], index: 5, kind: input, shape index: {}]   ;;  %s2354_s7 = inlined_call_operand.vmem [shape: bf16[6,192], index: 7, kind: output, shape index: {}]  }
   0x1   :  { %v1620_v0 = vld [vmem:[%s2347_s1 + $0x4] ss:$8 sps:$4 sm:$0xff]   ;;  %1619 = vset.pattern.permute.xlu0 %v1776_v1  ;;  %v1622_v2 = vld [vmem:[%s2347_s1] ss:$8 sps:$4 sm:$0xff]   ;;  %v1623_v3 = vld [vmem:[%s2347_s1 + $0x14] ss:$8 sps:$4 sm:$0xff]  }
   0x2   :  { %189 = vmatprep.subr.bf16.mxu0 %v1620_v0  ;;  %v1625_v4 = vld [vmem:[%s2347_s1 + $0x10] ss:$8 sps:$4 sm:$0xff]   ;;  %v1626_v5 = vld [vmem:[%s2347_s1 + $0xc4] ss:$8 sps:$4 sm:$0xff]   ;;  %v1630_v7 = vld [vmem:[%s2347_s1 + $0xc0] ss:$8 sps:$4 sm:$0xff]  }
   0x3   :  { %190 = vmatpush1.bf16.msra.mxu0 %v1622_v2  ;;  %v1628_v6 = vld [vmem:[%s2347_s1 + $0x24] ss:$8 sps:$4 sm:$0xff]   ;;  %429 = vmatprep.subr.bf16.mxu1 %v1626_v5  ;;  %v1632_v8 = vld [vmem:[%s2347_s1 + $0xd4] ss:$8 sps:$4 sm:$0xff]   ;;  %v1631_v9 = vld [vmem:[%s2347_s1 + $0x20] ss:$8 sps:$4 sm:$0xff]  }
   0x4   :  { %191 = vmatprep.subr.bf16.mxu0 %v1623_v3  ;;  %430 = vmatpush1.bf16.msra.mxu1 %v1630_v7  ;;  %v1634_v10 = vld [vmem:[%s2347_s1 + $0x34] ss:$8 sps:$4 sm:$0xff]   ;;  %v1636_v11 = vld [vmem:[%s2347_s1 + $0xd0] ss:$8 sps:$4 sm:$0xff]   ;;  %v1638_v12 = vld [vmem:[%s2347_s1 + $0xe4] ss:$8 sps:$4 sm:$0xff]  }
   0x5   :  { %431 = vmatprep.subr.bf16.mxu1 %v1632_v8  ;;  %v1637_v13 = vld [vmem:[%s2347_s1 + $0x30] ss:$8 sps:$4 sm:$0xff]   ;;  %v1642_v14 = vld [vmem:[%s2347_s1 + $0xe0] ss:$8 sps:$4 sm:$0xff]   ;;  %v1644_v15 = vld [vmem:[%s2347_s1 + $0xf4] ss:$8 sps:$4 sm:$0xff]  }
   0x6   :  { %v1640_v16 = vld [vmem:[%s2347_s1 + $0x44] ss:$8 sps:$4 sm:$0xff]   ;;  %v1648_v17 = vld [vmem:[%s2347_s1 + $0xf0] ss:$8 sps:$4 sm:$0xff]   ;;  %v1643_v18 = vld [vmem:[%s2347_s1 + $0x40] ss:$8 sps:$4 sm:$0xff]  }
   0x7   :  { %192 = vmatpush1.bf16.msra.mxu0 %v1625_v4  ;;  %v1650_v19 = vld [vmem:[%s2347_s1 + $0x104] ss:$8 sps:$4 sm:$0xff]   ;;  %v1646_v20 = vld [vmem:[%s2347_s1 + $0x54] ss:$8 sps:$4 sm:$0xff]   ;;  %v1649_v21 = vld [vmem:[%s2347_s1 + $0x50] ss:$8 sps:$4 sm:$0xff]  }
   0x8   :  { %193 = vmatprep.subr.bf16.mxu0 %v1628_v6  ;;  %432 = vmatpush1.bf16.msra.mxu1 %v1636_v11  ;;  %v1654_v22 = vld [vmem:[%s2347_s1 + $0x100] ss:$8 sps:$4 sm:$0xff]   ;;  %v1656_v23 = vld [vmem:[%s2347_s1 + $0x114] ss:$8 sps:$4 sm:$0xff]   ;;  %v1652_v24 = vld [vmem:[%s2347_s1 + $0x64] ss:$8 sps:$4 sm:$0xff]  }
   0x9   :  { %433 = vmatprep.subr.bf16.mxu1 %v1638_v12  ;;  %v1660_v25 = vld [vmem:[%s2347_s1 + $0x110] ss:$8 sps:$4 sm:$0xff]   ;;  %v1655_v26 = vld [vmem:[%s2347_s1 + $0x60] ss:$8 sps:$4 sm:$0xff]   ;;  %v1662_v27 = vld [vmem:[%s2347_s1 + $0x124] ss:$8 sps:$4 sm:$0xff]  }
   0xa   :  { %v1658_v28 = vld [vmem:[%s2347_s1 + $0x74] ss:$8 sps:$4 sm:$0xff]   ;;  %v1661_v29 = vld [vmem:[%s2347_s1 + $0x70] ss:$8 sps:$4 sm:$0xff]   ;;  %v1666_v30 = vld [vmem:[%s2347_s1 + $0x120] ss:$8 sps:$4 sm:$0xff]  }
   0xb   :  { %194 = vmatpush1.bf16.msra.mxu0 %v1631_v9  ;;  %v1668_v31 = vld [vmem:[%s2347_s1 + $0x134] ss:$8 sps:$4 sm:$0xff]   ;;  %v1664_v32 = vld [vmem:[%s2347_s1 + $0x84] ss:$8 sps:$4 sm:$0xff]   ;;  %v1667_v33 = vld [vmem:[%s2347_s1 + $0x80] ss:$8 sps:$4 sm:$0xff]  }
   0xc   :  { %195 = vmatprep.subr.bf16.mxu0 %v1634_v10  ;;  %434 = vmatpush1.bf16.msra.mxu1 %v1642_v14  ;;  %v1921_v34 = vld [vmem:[%s2348_s0] sm:$0xff]  ;;  %v31_v35 = vld [vmem:[%s2348_s0 + $0x8] sm:$0x33]  ;;  %v1672_v36 = vld [vmem:[%s2347_s1 + $0x130] ss:$8 sps:$4 sm:$0xff]   ;;  %vm244_vm3 = vcmask 518144  }
   0xd   :  { %435 = vmatprep.subr.bf16.mxu1 %v1644_v15  ;;  %v1337_v37 = vcombine.high %v1921_v34, %v31_v35  ;;  %v1674_v38 = vld [vmem:[%s2347_s1 + $0x144] ss:$8 sps:$4 sm:$0xff]   ;;  %v1670_v39 = vld [vmem:[%s2347_s1 + $0x94] ss:$8 sps:$4 sm:$0xff]   ;;  %v1673_v40 = vld [vmem:[%s2347_s1 + $0x90] ss:$8 sps:$4 sm:$0xff]   ;;  %v1336_v54 = vcombine.low %v1921_v34, %v31_v35 }
   0xe   :  { %v1678_v41 = vld [vmem:[%s2347_s1 + $0x140] ss:$8 sps:$4 sm:$0xff]   ;;  %v1680_v42 = vld [vmem:[%s2347_s1 + $0x154] ss:$8 sps:$4 sm:$0xff]   ;;  %v1676_v44 = vld [vmem:[%s2347_s1 + $0xa4] ss:$8 sps:$4 sm:$0xff]  }
   0xf   :  { %196 = vmatpush1.bf16.msra.mxu0 %v1637_v13  ;;  %1362 = vmatprep.mubr.msk.bf16.mxu0 %vm185_vm0, %v1337_v37  ;;  %v271_v43 = vld [vmem:[%s2348_s0 + $0x8] sm:$0x33]  ;;  %v1684_v46 = vld [vmem:[%s2347_s1 + $0x150] ss:$8 sps:$4 sm:$0xff]   ;;  %v1682_v49 = vld [vmem:[%s2347_s1 + $0xb4] ss:$8 sps:$4 sm:$0xff]  }
  0x10   :  { %197 = vmatprep.subr.bf16.mxu0 %v1640_v16  ;;  %436 = vmatpush1.bf16.msra.mxu1 %v1648_v17  ;;  %v1388_v45 = vcombine.high %v1921_v34, %v271_v43  ;;  %v1679_v47 = vld [vmem:[%s2347_s1 + $0xa0] ss:$8 sps:$4 sm:$0xff]   ;;  %v1688_v48 = vld [vmem:[%s2347_s1 + $0x164] ss:$8 sps:$4 sm:$0xff]   ;;  %v1685_v51 = vld [vmem:[%s2347_s1 + $0xb0] ss:$8 sps:$4 sm:$0xff]   ;;  %v1387_v59 = vcombine.low %v1921_v34, %v271_v43 }
  0x11   :  { %437 = vmatprep.subr.bf16.mxu1 %v1650_v19  ;;  %v1690_v50 = vld [vmem:[%s2347_s1 + $0x160] ss:$8 sps:$4 sm:$0xff]   ;;  %v1694_v52 = vld [vmem:[%s2347_s1 + $0x174] ss:$8 sps:$4 sm:$0xff]   ;;  %v1693_v53 = vld [vmem:[%s2347_s1 + $0x184] ss:$8 sps:$4 sm:$0xff]  }
  0x12   :  { %1413 = vmatprep.mubr.msk.bf16.mxu1 %vm185_vm0, %v1388_v45  ;;  %v1696_v55 = vld [vmem:[%s2347_s1 + $0x170] ss:$8 sps:$4 sm:$0xff]   ;;  %v1691_v56 = vld [vmem:[%s2347_s1 + $0x180] ss:$8 sps:$4 sm:$0xff]   ;;  %v1704_v57 = vld [vmem:[%s2347_s1 + $0x244] ss:$8 sps:$4 sm:$0xff]  }
  0x13   :  { %198 = vmatpush1.bf16.msra.mxu0 %v1643_v18  ;;  %v1699_v58 = vld [vmem:[%s2347_s1 + $0x194] ss:$8 sps:$4 sm:$0xff]   ;;  %v1702_v60 = vld [vmem:[%s2347_s1 + $0x240] ss:$8 sps:$4 sm:$0xff]   ;;  %v1697_v61 = vld [vmem:[%s2347_s1 + $0x190] ss:$8 sps:$4 sm:$0xff]  }
  0x14   :  { %199 = vmatprep.subr.bf16.mxu0 %v1646_v20  ;;  %438 = vmatpush1.bf16.msra.mxu1 %v1654_v22  ;;  %v1710_v62 = vld [vmem:[%s2347_s1 + $0x254] ss:$8 sps:$4 sm:$0xff]   ;;  %v1707_v63 = vld [vmem:[%s2347_s1 + $0x1a4] ss:$8 sps:$4 sm:$0xff]   ;;  %v1708_v0 = vld [vmem:[%s2347_s1 + $0x250] ss:$8 sps:$4 sm:$0xff]  }
  0x15   :  { %439 = vmatprep.subr.bf16.mxu1 %v1656_v23  ;;  %v1705_v1 = vld [vmem:[%s2347_s1 + $0x1a0] ss:$8 sps:$4 sm:$0xff]   ;;  %v1716_v2 = vld [vmem:[%s2347_s1 + $0x264] ss:$8 sps:$4 sm:$0xff]   ;;  %v1713_v3 = vld [vmem:[%s2347_s1 + $0x1b4] ss:$8 sps:$4 sm:$0xff]  }
  0x16   :  { %v1714_v4 = vld [vmem:[%s2347_s1 + $0x260] ss:$8 sps:$4 sm:$0xff]   ;;  %v1711_v5 = vld [vmem:[%s2347_s1 + $0x1b0] ss:$8 sps:$4 sm:$0xff]   ;;  %v1722_v6 = vld [vmem:[%s2347_s1 + $0x274] ss:$8 sps:$4 sm:$0xff]  }
  0x17   :  { %200 = vmatpush1.bf16.msra.mxu0 %v1649_v21  ;;  %v1719_v7 = vld [vmem:[%s2347_s1 + $0x1c4] ss:$8 sps:$4 sm:$0xff]   ;;  %v1720_v8 = vld [vmem:[%s2347_s1 + $0x270] ss:$8 sps:$4 sm:$0xff]   ;;  %v1717_v10 = vld [vmem:[%s2347_s1 + $0x1c0] ss:$8 sps:$4 sm:$0xff]  }
  0x18   :  { %201 = vmatprep.subr.bf16.mxu0 %v1652_v24  ;;  %440 = vmatpush1.bf16.msra.mxu1 %v1660_v25  ;;  %v2034_v9 = vld [vmem:[%s2348_s0 + $0x8] sm:$0x33]  ;;  %v1725_v13 = vld [vmem:[%s2347_s1 + $0x1d4] ss:$8 sps:$4 sm:$0xff]   ;;  %v997_v15 = vld [vmem:[%s2349_s6] sm:$0x3f] }
  0x19   :  { %441 = vmatprep.subr.bf16.mxu1 %v1662_v27  ;;  %v1728_v11 = vld [vmem:[%s2347_s1 + $0x284] ss:$8 sps:$4 sm:$0xff]   ;;  %v1439_v12 = vcombine.high %v1921_v34, %v2034_v9  ;;  %v1726_v16 = vld [vmem:[%s2347_s1 + $0x280] ss:$8 sps:$4 sm:$0xff]   ;;  %1000 = vperm.xlu0 %1619, %v997_v15   ;;  %v1723_v18 = vld [vmem:[%s2347_s1 + $0x1d0] ss:$8 sps:$4 sm:$0xff]   ;;  %v1438_v45 = vcombine.low %v1921_v34, %v2034_v9 }
  0x1a   :  { %v2051_v14 = vld [vmem:[%s2348_s0 + $0x8] sm:$0x33]  ;;  %v1734_v19 = vld [vmem:[%s2347_s1 + $0x294] ss:$8 sps:$4 sm:$0xff]   ;;  %v1732_v21 = vld [vmem:[%s2347_s1 + $0x290] ss:$8 sps:$4 sm:$0xff]  }
  0x1b   :  { %202 = vmatpush1.bf16.msra.mxu0 %v1655_v26  ;;  %v1490_v17 = vcombine.high %v1921_v34, %v2051_v14  ;;  %v1731_v20 = vld [vmem:[%s2347_s1 + $0x1e4] ss:$8 sps:$4 sm:$0xff]   ;;  %v1729_v22 = vld [vmem:[%s2347_s1 + $0x1e0] ss:$8 sps:$4 sm:$0xff]   ;;  %v1737_v24 = vld [vmem:[%s2347_s1 + $0x1f4] ss:$8 sps:$4 sm:$0xff]  }
  0x1c   :  { %203 = vmatprep.subr.bf16.mxu0 %v1658_v28  ;;  %442 = vmatpush1.bf16.msra.mxu1 %v1666_v30  ;;  %v1740_v23 = vld [vmem:[%s2347_s1 + $0x2a4] ss:$8 sps:$4 sm:$0xff]   ;;  %v1738_v25 = vld [vmem:[%s2347_s1 + $0x2a0] ss:$8 sps:$4 sm:$0xff]   ;;  %v1735_v26 = vld [vmem:[%s2347_s1 + $0x1f0] ss:$8 sps:$4 sm:$0xff]  }
  0x1d   :  { %443 = vmatprep.subr.bf16.mxu1 %v1668_v31  ;;  %v1746_v27 = vld [vmem:[%s2347_s1 + $0x2b4] ss:$8 sps:$4 sm:$0xff]   ;;  %v1743_v28 = vld [vmem:[%s2347_s1 + $0x204] ss:$8 sps:$4 sm:$0xff]   ;;  %v1741_v30 = vld [vmem:[%s2347_s1 + $0x200] ss:$8 sps:$4 sm:$0xff]  }
  0x1e   :  { %v1752_v31 = vld [vmem:[%s2347_s1 + $0x2c4] ss:$8 sps:$4 sm:$0xff]   ;;  %v1747_v35 = vld [vmem:[%s2347_s1 + $0x210] ss:$8 sps:$4 sm:$0xff]   ;;  %vm256_vm4 = vcmask 1044480   ;;  %vm268_vm5 = vcmask 521219  }
  0x1f   :  { %204 = vmatpush1.bf16.msra.mxu0 %v1661_v29  ;;  %v1744_v29 = vld [vmem:[%s2347_s1 + $0x2b0] ss:$8 sps:$4 sm:$0xff]   ;;  %v1755_v37 = vld [vmem:[%s2347_s1 + $0x224] ss:$8 sps:$4 sm:$0xff]   ;;  %vm500_vm6 = vcmask 1043456   ;;  %vm1203_vm7 = vcmask 1045504  }
  0x20   :  { %205 = vmatprep.subr.bf16.mxu0 %v1664_v32  ;;  %444 = vmatpush1.bf16.msra.mxu1 %v1672_v36  ;;  %v1749_v32 = vld [vmem:[%s2347_s1 + $0x214] ss:$8 sps:$4 sm:$0xff]   ;;  %v1759_v43 = vld [vmem:[%s2347_s1 + $0x230] ss:$8 sps:$4 sm:$0xff]   ;;  %vm1328_vm8 = vcmask 1042432   ;;  %vm1329_vm9 = vcmask 522244  }
  0x21   :  { %445 = vmatprep.subr.bf16.mxu1 %v1674_v38  ;;  %v1758_v36 = vld [vmem:[%s2347_s1 + $0x2d4] ss:$8 sps:$4 sm:$0xff]   ;;  %v1756_v38 = vld [vmem:[%s2347_s1 + $0x2d0] ss:$8 sps:$4 sm:$0xff]   ;;  %vm1330_vm12 = vmor %vm1329_vm9, %vm1328_vm8 }
  0x22   :  { %v1024_v9 = vld [vmem:[%s2350_s3 + $0x98] sm:$0xff] }
  0x23   :  { %206 = vmatpush1.bf16.msra.mxu0 %v1667_v33  ;;  %v1750_v33 = vld [vmem:[%s2347_s1 + $0x2c0] ss:$8 sps:$4 sm:$0xff]   ;;  %v1028_v15 = vld [vmem:[%s2350_s3 + $0xb8] sm:$0xff] }
  0x24   :  { %207 = vmatprep.subr.bf16.mxu0 %v1670_v39  ;;  %446 = vmatpush1.bf16.msra.mxu1 %v1678_v41  ;;  %v1753_v39 = vld [vmem:[%s2347_s1 + $0x220] ss:$8 sps:$4 sm:$0xff]   ;;  %v1761_v41 = vld [vmem:[%s2347_s1 + $0x234] ss:$8 sps:$4 sm:$0xff]  }
  0x25   :  { %447 = vmatprep.subr.bf16.mxu1 %v1680_v42  ;;  %v1763_v42 = vld [vmem:[%s2347_s1 + $0x2e0] ss:$8 sps:$4 sm:$0xff]  }
  0x27   :  { %208 = vmatpush1.bf16.msra.mxu0 %v1673_v40  ;;  %v1765_v40 = vld [vmem:[%s2347_s1 + $0x2e4] ss:$8 sps:$4 sm:$0xff]  }
  0x28   :  { %209 = vmatprep.subr.bf16.mxu0 %v1676_v44  ;;  %448 = vmatpush1.bf16.msra.mxu1 %v1684_v46  ;;  %v1769_v44 = vld [vmem:[%s2347_s1 + $0x2f4] ss:$8 sps:$4 sm:$0xff]   ;;  %v1767_v46 = vld [vmem:[%s2347_s1 + $0x2f0] ss:$8 sps:$4 sm:$0xff]  }
  0x29   :  { %449 = vmatprep.subr.bf16.mxu1 %v1688_v48  ;;  %v1777_v48 = vmov 0.0  }
  0x2a   :  { %27 = vst [vmem:[#allocation3] sm:$0x3f] %v1777_v48  ;;  %29 = vst.msk [vmem:[#allocation3 + $0x8] sm:$0x3f] %vm28_vm1, %v1777_v48 }
  0x2b   :  { %210 = vmatpush1.bf16.msra.mxu0 %v1679_v47  ;;  %v1489_v47 = vcombine.low %v1921_v34, %v2051_v14  ;;  %v1005_v34 = vld [vmem:[%s2350_s3] sm:$0xff]  ;;  %v1026_v14 = vld [vmem:[%s2350_s3 + $0xa8] sm:$0xff] }
  0x2c   :  { %211 = vmatprep.subr.bf16.mxu0 %v1682_v49  ;;  %450 = vmatpush1.bf16.msra.mxu1 %v1690_v50  ;;  %v1006_v49 = vld [vmem:[%s2350_s3 + $0x8] sm:$0xff]  ;;  %v1008_v50 = vld [vmem:[%s2350_s3 + $0x18] sm:$0xff] }
  0x2d   :  { %451 = vmatprep.subr.bf16.mxu1 %v1694_v52  ;;  %v1007_v52 = vld [vmem:[%s2350_s3 + $0x10] sm:$0xff] }
  0x2f   :  { %212 = vmatpush1.bf16.msra.mxu0 %v1685_v51  ;;  %v1520_v51 = vpack.c.bf16 %v1008_v50, %v1006_v49  ;;  %v1047_v49 = vld [vmem:[%s2350_s3 + $0x150] sm:$0xff] }
  0x30   :  { %672 = vmatprep.subr.bf16.mxu0 %v1693_v53  ;;  %452 = vmatpush1.bf16.msra.mxu1 %v1696_v55  ;;  %v1010_v53 = vld [vmem:[%s2350_s3 + $0x28] sm:$0xff]  ;;  %v1522_v55 = vpack.c.bf16 %v1007_v52, %v1005_v34 }
  0x31   :  { %906 = vmatprep.subr.bf16.mxu1 %v1704_v57  ;;  %v1009_v57 = vld [vmem:[%s2350_s3 + $0x20] sm:$0xff]  ;;  %v1050_v34 = vld [vmem:[%s2350_s3 + $0x168] sm:$0xff] }
  0x32   :  { %222 = vmatmul.mubr.bf16.vlgmr.msra.gmra.mrb[0].mxu0 %v1336_v54  ;;  %v1012_v54 = vld [vmem:[%s2350_s3 + $0x38] sm:$0xff] }
  0x33   :  { %673 = vmatpush1.bf16.msra.mxu0 %v1691_v56  ;;  %462 = vmatmul.mubr.bf16.vlgmr.msra.gmra.mrb[0].mxu1 %v1387_v59  ;;  %v1524_v56 = vpack.c.bf16 %v1012_v54, %v1010_v53  ;;  %v1014_v59 = vld [vmem:[%s2350_s3 + $0x48] sm:$0xff]  ;;  %v1049_v53 = vld [vmem:[%s2350_s3 + $0x160] sm:$0xff]  ;;  %v1051_v54 = vld [vmem:[%s2350_s3 + $0x170] sm:$0xff] }
  0x34   :  { %674 = vmatprep.subr.bf16.mxu0 %v1699_v58  ;;  %907 = vmatpush1.bf16.msra.mxu1 %v1702_v60  ;;  %v1011_v58 = vld [vmem:[%s2350_s3 + $0x30] sm:$0xff]  ;;  %v1016_v60 = vld [vmem:[%s2350_s3 + $0x58] sm:$0xff] }
  0x35   :  { %908 = vmatprep.subr.bf16.mxu1 %v1710_v62  ;;  %1464 = vmatprep.mubr.msk.bf16.mxu0 %vm185_vm0, %v1439_v12  ;;  %v1528_v62 = vpack.c.bf16 %v1016_v60, %v1014_v59  ;;  %v1023_v12 = vld [vmem:[%s2350_s3 + $0x90] sm:$0xff] }
  0x36   :  { %1515 = vmatprep.mubr.msk.bf16.mxu1 %vm185_vm0, %v1490_v17  ;;  %v1025_v17 = vld [vmem:[%s2350_s3 + $0xa0] sm:$0xff] }
  0x37   :  { %675 = vmatpush1.bf16.msra.mxu0 %v1697_v61  ;;  %v1526_v61 = vpack.c.bf16 %v1011_v58, %v1009_v57 }
  0x38   :  { %676 = vmatprep.subr.bf16.mxu0 %v1707_v63  ;;  %909 = vmatpush1.bf16.msra.mxu1 %v1708_v0  ;;  %v1013_v63 = vld [vmem:[%s2350_s3 + $0x40] sm:$0xff]  ;;  %v1015_v0 = vld [vmem:[%s2350_s3 + $0x50] sm:$0xff] }
  0x39   :  { %910 = vmatprep.subr.bf16.mxu1 %v1716_v2  ;;  %v1018_v2 = vld [vmem:[%s2350_s3 + $0x68] sm:$0xff] }
  0x3b   :  { %677 = vmatpush1.bf16.msra.mxu0 %v1705_v1  ;;  %v1530_v1 = vpack.c.bf16 %v1015_v0, %v1013_v63  ;;  %v237_v63 = vld [vmem:[#allocation3] sm:$0x7] }
  0x3c   :  { %678 = vmatprep.subr.bf16.mxu0 %v1713_v3  ;;  %911 = vmatpush1.bf16.msra.mxu1 %v1714_v4  ;;  %v1020_v3 = vld [vmem:[%s2350_s3 + $0x78] sm:$0xff] }
  0x3d   :  { %912 = vmatprep.subr.bf16.mxu1 %v1722_v6  ;;  %v1532_v4 = vpack.c.bf16 %v1020_v3, %v1018_v2  ;;  %v1019_v6 = vld [vmem:[%s2350_s3 + $0x70] sm:$0xff] }
  0x3f   :  { %679 = vmatpush1.bf16.msra.mxu0 %v1711_v5  ;;  %v1017_v5 = vld [vmem:[%s2350_s3 + $0x60] sm:$0xff] }
  0x40   :  { %680 = vmatprep.subr.bf16.mxu0 %v1719_v7  ;;  %913 = vmatpush1.bf16.msra.mxu1 %v1720_v8  ;;  %v1534_v7 = vpack.c.bf16 %v1019_v6, %v1017_v5  ;;  %v1022_v8 = vld [vmem:[%s2350_s3 + $0x88] sm:$0xff] }
  0x41   :  { %914 = vmatprep.subr.bf16.mxu1 %v1728_v11  ;;  %v1021_v11 = vld [vmem:[%s2350_s3 + $0x80] sm:$0xff] }
  0x43   :  { %681 = vmatpush1.bf16.msra.mxu0 %v1717_v10  ;;  %v1536_v10 = vpack.c.bf16 %v1024_v9, %v1022_v8 }
  0x44   :  { %682 = vmatprep.subr.bf16.mxu0 %v1725_v13  ;;  %915 = vmatpush1.bf16.msra.mxu1 %v1726_v16  ;;  %v1538_v13 = vpack.c.bf16 %v1023_v12, %v1021_v11  ;;  %v1540_v16 = vpack.c.bf16 %v1028_v15, %v1026_v14  ;;  %v247_v14 = vld [vmem:[#allocation3 + $0x8] sm:$0x38] }
  0x45   :  { %916 = vmatprep.subr.bf16.mxu1 %v1734_v19 }
  0x47   :  { %683 = vmatpush1.bf16.msra.mxu0 %v1723_v18  ;;  %v1027_v18 = vld [vmem:[%s2350_s3 + $0xb0] sm:$0xff] }
  0x48   :  { %684 = vmatprep.subr.bf16.mxu0 %v1731_v20  ;;  %917 = vmatpush1.bf16.msra.mxu1 %v1732_v21  ;;  %v1542_v19 = vpack.c.bf16 %v1027_v18, %v1025_v17  ;;  %v1030_v20 = vld [vmem:[%s2350_s3 + $0xc8] sm:$0xff]  ;;  %v1032_v21 = vld [vmem:[%s2350_s3 + $0xd8] sm:$0xff] }
  0x49   :  { %918 = vmatprep.subr.bf16.mxu1 %v1740_v23  ;;  %v1029_v23 = vld [vmem:[%s2350_s3 + $0xc0] sm:$0xff] }
  0x4b   :  { %685 = vmatpush1.bf16.msra.mxu0 %v1729_v22  ;;  %v1544_v22 = vpack.c.bf16 %v1032_v21, %v1030_v20 }
  0x4c   :  { %686 = vmatprep.subr.bf16.mxu0 %v1737_v24  ;;  %919 = vmatpush1.bf16.msra.mxu1 %v1738_v25  ;;  %v1031_v24 = vld [vmem:[%s2350_s3 + $0xd0] sm:$0xff] }
  0x4d   :  { %920 = vmatprep.subr.bf16.mxu1 %v1746_v27  ;;  %v1546_v25 = vpack.c.bf16 %v1031_v24, %v1029_v23  ;;  %v1036_v27 = vld [vmem:[%s2350_s3 + $0xf8] sm:$0xff] }
  0x4f   :  { %687 = vmatpush1.bf16.msra.mxu0 %v1735_v26  ;;  %v1034_v26 = vld [vmem:[%s2350_s3 + $0xe8] sm:$0xff] }
  0x50   :  { %688 = vmatprep.subr.bf16.mxu0 %v1743_v28  ;;  %921 = vmatpush1.bf16.msra.mxu1 %v1744_v29  ;;  %v1548_v28 = vpack.c.bf16 %v1036_v27, %v1034_v26  ;;  %v1033_v29 = vld [vmem:[%s2350_s3 + $0xe0] sm:$0xff] }
  0x51   :  { %922 = vmatprep.subr.bf16.mxu1 %v1752_v31 }
  0x53   :  { %689 = vmatpush1.bf16.msra.mxu0 %v1741_v30  ;;  %v1035_v30 = vld [vmem:[%s2350_s3 + $0xf0] sm:$0xff] }
  0x54   :  { %690 = vmatprep.subr.bf16.mxu0 %v1749_v32  ;;  %923 = vmatpush1.bf16.msra.mxu1 %v1750_v33  ;;  %v1550_v31 = vpack.c.bf16 %v1035_v30, %v1033_v29  ;;  %v1038_v32 = vld [vmem:[%s2350_s3 + $0x108] sm:$0xff]  ;;  %v1040_v33 = vld [vmem:[%s2350_s3 + $0x118] sm:$0xff] }
  0x55   :  { %924 = vmatprep.subr.bf16.mxu1 %v1758_v36  ;;  %v1037_v36 = vld [vmem:[%s2350_s3 + $0x100] sm:$0xff] }
  0x57   :  { %691 = vmatpush1.bf16.msra.mxu0 %v1747_v35  ;;  %v1552_v35 = vpack.c.bf16 %v1040_v33, %v1038_v32 }
  0x58   :  { %692 = vmatprep.subr.bf16.mxu0 %v1755_v37  ;;  %925 = vmatpush1.bf16.msra.mxu1 %v1756_v38  ;;  %v1039_v37 = vld [vmem:[%s2350_s3 + $0x110] sm:$0xff] }
  0x59   :  { %926 = vmatprep.subr.bf16.mxu1 %v1765_v40  ;;  %v1554_v38 = vpack.c.bf16 %v1039_v37, %v1037_v36  ;;  %v1044_v40 = vld [vmem:[%s2350_s3 + $0x138] sm:$0xff] }
  0x5b   :  { %693 = vmatpush1.bf16.msra.mxu0 %v1753_v39  ;;  %v1042_v39 = vld [vmem:[%s2350_s3 + $0x128] sm:$0xff] }
  0x5c   :  { %694 = vmatprep.subr.bf16.mxu0 %v1761_v41  ;;  %927 = vmatpush1.bf16.msra.mxu1 %v1763_v42  ;;  %v1556_v41 = vpack.c.bf16 %v1044_v40, %v1042_v39  ;;  %v1041_v42 = vld [vmem:[%s2350_s3 + $0x120] sm:$0xff] }
  0x5d   :  { %928 = vmatprep.subr.bf16.mxu1 %v1769_v44 }
  0x5f   :  { %695 = vmatpush1.bf16.msra.mxu0 %v1759_v43  ;;  %v1043_v43 = vld [vmem:[%s2350_s3 + $0x130] sm:$0xff] }
  0x60   :  { %929 = vmatpush1.bf16.msra.mxu1 %v1767_v46  ;;  %1521 = vmatprep.subr.bf16.mxu0 %v1520_v51  ;;  %v1558_v44 = vpack.c.bf16 %v1043_v43, %v1041_v42  ;;  %v1048_v46 = vld [vmem:[%s2350_s3 + $0x158] sm:$0xff] }
  0x61   :  { %1569 = vmatprep.subr.bf16.mxu1 %v1520_v51  ;;  %v1052_v51 = vld [vmem:[%s2350_s3 + $0x178] sm:$0xff] }
  0x62   :  { %705 = vmatmul.mubr.bf16.vlgmr.msra.gmra.mrb[4].mxu0 %v1438_v45  ;;  %v1046_v45 = vld [vmem:[%s2350_s3 + $0x148] sm:$0xff]  ;;  %v1564_v52 = vpack.c.bf16 %v1052_v51, %v1050_v34 }
  0x63   :  { %939 = vmatmul.mubr.bf16.vlgmr.msra.gmra.mrb[4].mxu1 %v1489_v47  ;;  %1523 = vmatpush1.bf16.msra.mxu0 %v1522_v55  ;;  %v1045_v47 = vld [vmem:[%s2350_s3 + $0x140] sm:$0xff]  ;;  %v1560_v48 = vpack.c.bf16 %v1048_v46, %v1046_v45 }
  0x64   :  { %1571 = vmatpush1.bf16.msra.mxu1 %v1522_v55  ;;  %1525 = vmatprep.subr.bf16.mxu0 %v1524_v56  ;;  %v1562_v50 = vpack.c.bf16 %v1047_v49, %v1045_v47  ;;  %v1566_v55 = vpack.c.bf16 %v1051_v54, %v1049_v53 }
  0x65   :  { %1573 = vmatprep.subr.bf16.mxu1 %v1524_v56 }
  0x67   :  { %1527 = vmatpush1.bf16.msra.mxu0 %v1526_v61 }
  0x68   :  { %1575 = vmatpush1.bf16.msra.mxu1 %v1526_v61  ;;  %1529 = vmatprep.subr.bf16.mxu0 %v1528_v62 }
  0x69   :  { %1577 = vmatprep.subr.bf16.mxu1 %v1528_v62 }
  0x6b   :  { %1531 = vmatpush1.bf16.msra.mxu0 %v1530_v1 }
  0x6c   :  { %1579 = vmatpush1.bf16.msra.mxu1 %v1530_v1  ;;  %1533 = vmatprep.subr.bf16.mxu0 %v1532_v4  ;;  %v238_v1 = vld [vmem:[#allocation3 + $0x8] sm:$0x7] }
  0x6d   :  { %1581 = vmatprep.subr.bf16.mxu1 %v1532_v4 }
  0x6f   :  { %1535 = vmatpush1.bf16.msra.mxu0 %v1534_v7 }
  0x70   :  { %1583 = vmatpush1.bf16.msra.mxu1 %v1534_v7  ;;  %1537 = vmatprep.subr.bf16.mxu0 %v1536_v10 }
  0x71   :  { %1585 = vmatprep.subr.bf16.mxu1 %v1536_v10  ;;  %v246_v10 = vld [vmem:[#allocation3] sm:$0x38] }
  0x73   :  { %1539 = vmatpush1.bf16.msra.mxu0 %v1538_v13 }
  0x74   :  { %1587 = vmatpush1.bf16.msra.mxu1 %v1538_v13  ;;  %1541 = vmatprep.subr.bf16.mxu0 %v1540_v16 }
  0x75   :  { %1589 = vmatprep.subr.bf16.mxu1 %v1540_v16 }
  0x77   :  { %1543 = vmatpush1.bf16.msra.mxu0 %v1542_v19 }
  0x78   :  { %1591 = vmatpush1.bf16.msra.mxu1 %v1542_v19  ;;  %1545 = vmatprep.subr.bf16.mxu0 %v1544_v22 }
  0x79   :  { %1593 = vmatprep.subr.bf16.mxu1 %v1544_v22 }
  0x7b   :  { %1547 = vmatpush1.bf16.msra.mxu0 %v1546_v25 }
  0x7c   :  { %1595 = vmatpush1.bf16.msra.mxu1 %v1546_v25  ;;  %1549 = vmatprep.subr.bf16.mxu0 %v1548_v28 }
  0x7d   :  { %1597 = vmatprep.subr.bf16.mxu1 %v1548_v28 }
  0x7f   :  { %1551 = vmatpush1.bf16.msra.mxu0 %v1550_v31 }
  0x80   :  { %1599 = vmatpush1.bf16.msra.mxu1 %v1550_v31  ;;  %1553 = vmatprep.subr.bf16.mxu0 %v1552_v35 }
  0x81   :  { %1601 = vmatprep.subr.bf16.mxu1 %v1552_v35 }
  0x83   :  { %1555 = vmatpush1.bf16.msra.mxu0 %v1554_v38 }
  0x84   :  { %1603 = vmatpush1.bf16.msra.mxu1 %v1554_v38  ;;  %1557 = vmatprep.subr.bf16.mxu0 %v1556_v41 }
  0x85   :  { %1605 = vmatprep.subr.bf16.mxu1 %v1556_v41 }
  0x87   :  { %1559 = vmatpush1.bf16.msra.mxu0 %v1558_v44 }
  0x88   :  { %1607 = vmatpush1.bf16.msra.mxu1 %v1558_v44  ;;  %1561 = vmatprep.subr.bf16.mxu0 %v1560_v48 }
  0x89   :  { %1609 = vmatprep.subr.bf16.mxu1 %v1560_v48 }
  0x8b   :  { %1563 = vmatpush1.bf16.msra.mxu0 %v1562_v50 }
  0x8c   :  { %1611 = vmatpush1.bf16.msra.mxu1 %v1562_v50  ;;  %1565 = vmatprep.subr.bf16.mxu0 %v1564_v52 }
  0x8d   :  { %1613 = vmatprep.subr.bf16.mxu1 %v1564_v52 }
  0x8f   :  { %1567 = vmatpush1.bf16.msra.mxu0 %v1566_v55 }
  0x90   :  { %1615 = vmatpush1.bf16.msra.mxu1 %v1566_v55 }
 0x105   :  { %v223_v56 = vpop.f32.mrb[0].mxu0 }
 0x106   :  { %232 = vst [vmem:[#allocation2] sm:$0xff] %v223_v56  ;;  %v225_v57 = vpop.f32.mrb[1].mxu0  ;;  %v463_v60 = vpop.f32.mrb[0].mxu1 }
 0x107   :  { %233 = vst.msk [vmem:[#allocation2 + $0x8] sm:$0xff] %vm185_vm0, %v225_v57  ;;  %v227_v58 = vpop.f32.mrb[2].mxu0  ;;  %v465_v61 = vpop.f32.mrb[1].mxu1 }
 0x108   :  { %234 = vst [vmem:[#allocation2 + $0x10] sm:$0xf] %v227_v58  ;;  %v229_v59 = vpop.f32.mrb[3].mxu0  ;;  %v467_v62 = vpop.f32.mrb[2].mxu1 }
 0x109   :  { %236 = vst.msk [vmem:[#allocation2 + $0x18] sm:$0xf] %vm235_vm2, %v229_v59  ;;  %v469_v0 = vpop.f32.mrb[3].mxu1 }
 0x10d   :  { %v239_v2 = vld [vmem:[#allocation2] sm:$0x7]  ;;  %v248_v3 = vld [vmem:[#allocation2] sm:$0xc0] }
 0x10e   :  { %v241_v4 = vadd.f32 %v239_v2, %v237_v63  ;;  %v257_v5 = vrot.slane %v248_v3, 3  ;;  %472 = vst [vmem:[#allocation2] sm:$0xff] %v463_v60  ;;  %v240_v6 = vld [vmem:[#allocation2 + $0x8] sm:$0x7]  ;;  %v249_v7 = vld [vmem:[#allocation2 + $0x8] sm:$0xc0] }
 0x10f   :  { %v242_v8 = vadd.f32 %v240_v6, %v238_v1  ;;  %473 = vst.msk [vmem:[#allocation2 + $0x8] sm:$0xff] %vm185_vm0, %v465_v61  ;;  %v250_v9 = vld [vmem:[#allocation2 + $0x10] sm:$0x1]  ;;  %v260_v13 = vrot.slane %v249_v7, 3 }
 0x110   :  { %243 = vst [vmem:[#allocation3] sm:$0x7] %v241_v4  ;;  %v258_v11 = vrot.slane %v250_v9, 3  ;;  %474 = vst [vmem:[#allocation2 + $0x10] sm:$0xf] %v467_v62 }
 0x111   :  { %v251_v12 = vld [vmem:[#allocation2 + $0x18] sm:$0x1]  ;;  %245 = vst.msk [vmem:[#allocation3 + $0x8] sm:$0x7] %vm244_vm3, %v242_v8 }
 0x112   :  { %v261_v15 = vrot.slane %v251_v12, 3  ;;  %475 = vst.msk [vmem:[#allocation2 + $0x18] sm:$0xf] %vm235_vm2, %v469_v0  ;;  %v259_v16 = vsel %vm256_vm4, %v257_v5, %v258_v11  ;;  %v985_v5 = vlaneseq }
 0x113   :  { %v265_v17 = vadd.f32 %v259_v16, %v246_v10 }
 0x114   :  { %v262_v18 = vsel %vm256_vm4, %v260_v13, %v261_v15  ;;  %v2306_v13 = vshrl.u32 %v985_v5, 7 }
 0x115   :  { %v266_v19 = vadd.f32 %v262_v18, %v247_v14  ;;  %267 = vst [vmem:[#allocation3] sm:$0x38] %v265_v17  ;;  %v478_v20 = vld [vmem:[#allocation2] sm:$0xe]  ;;  %v492_v21 = vld [vmem:[#allocation2] sm:$0x80] }
 0x116   :  { %v482_v22 = vrot.slane %v478_v20, 1  ;;  %v501_v23 = vrot.slane %v492_v21, 4  ;;  %v479_v24 = vld [vmem:[#allocation2 + $0x8] sm:$0xe]  ;;  %v493_v25 = vld [vmem:[#allocation2 + $0x8] sm:$0x80] }
 0x117   :  { %269 = vst.msk [vmem:[#allocation3 + $0x8] sm:$0x38] %vm268_vm5, %v266_v19  ;;  %v476_v26 = vld [vmem:[#allocation3] sm:$0x7]  ;;  %v483_v27 = vrot.slane %v479_v24, 1  ;;  %v504_v35 = vrot.slane %v493_v25, 4  ;;  %v1001_v25 = vpop.permute.xlu0 %1000 }
 0x118   :  { %v494_v28 = vld [vmem:[#allocation2 + $0x10] sm:$0x3]  ;;  %v486_v29 = vadd.f32 %v482_v22, %v476_v26  ;;  %v477_v30 = vld [vmem:[#allocation3 + $0x8] sm:$0x7]  ;;  %v2310_v20 = vsub.s32 0, %v2306_v13  ;;  %v2314_v21 = vsub.s32 1, %v2306_v13 }
 0x119   :  { %v502_v31 = vrot.slane %v494_v28, 4  ;;  %v495_v32 = vld [vmem:[#allocation2 + $0x18] sm:$0x3]  ;;  %v487_v33 = vadd.f32 %v483_v27, %v477_v30  ;;  %v983_v22 = vld [vmem:[%s2351_s2] sm:$0x3] }
 0x11a   :  { %v505_v36 = vrot.slane %v495_v32, 4  ;;  %488 = vst [vmem:[#allocation3] sm:$0x7] %v486_v29  ;;  %v992_v24 = vrot.slane %v983_v22, %v2314_v21 }
 0x11b   :  { %v503_v37 = vsel %vm500_vm6, %v501_v23, %v502_v31  ;;  %489 = vst.msk [vmem:[#allocation3 + $0x8] sm:$0x7] %vm244_vm3, %v487_v33  ;;  %v988_v23 = vrot.slane %v983_v22, %v2310_v20 }
 0x11c   :  { %v490_v38 = vld [vmem:[#allocation3] sm:$0x38]  ;;  %v506_v41 = vsel %vm500_vm6, %v504_v35, %v505_v36 }
 0x11d   :  { %v509_v39 = vadd.f32 %v503_v37, %v490_v38 }
 0x11e   :  { %v491_v40 = vld [vmem:[#allocation3 + $0x8] sm:$0x38] }
 0x11f   :  { %v510_v42 = vadd.f32 %v506_v41, %v491_v40  ;;  %511 = vst [vmem:[#allocation3] sm:$0x38] %v509_v39 }
 0x121   :  { %512 = vst.msk [vmem:[#allocation3 + $0x8] sm:$0x38] %vm268_vm5, %v510_v42  ;;  %v719_v53 = vld [vmem:[#allocation3] sm:$0x7] }
 0x122   :  { %v720_v57 = vld [vmem:[#allocation3 + $0x8] sm:$0x7] }
 0x126   :  { %v733_v61 = vld [vmem:[#allocation3] sm:$0x38] }
 0x128   :  { %v734_v0 = vld [vmem:[#allocation3 + $0x8] sm:$0x38] }
 0x135   :  { %v706_v43 = vpop.f32.mrb[4].mxu0 }
 0x136   :  { %715 = vst [vmem:[#allocation2] sm:$0xff] %v706_v43  ;;  %v708_v44 = vpop.f32.mrb[5].mxu0  ;;  %v940_v47 = vpop.f32.mrb[4].mxu1 }
 0x137   :  { %716 = vst.msk [vmem:[#allocation2 + $0x8] sm:$0xff] %vm185_vm0, %v708_v44  ;;  %v710_v45 = vpop.f32.mrb[6].mxu0  ;;  %v942_v48 = vpop.f32.mrb[5].mxu1 }
 0x138   :  { %717 = vst [vmem:[#allocation2 + $0x10] sm:$0xf] %v710_v45  ;;  %v712_v46 = vpop.f32.mrb[7].mxu0  ;;  %v944_v49 = vpop.f32.mrb[6].mxu1 }
 0x139   :  { %718 = vst.msk [vmem:[#allocation2 + $0x18] sm:$0xf] %vm235_vm2, %v712_v46  ;;  %v946_v50 = vpop.f32.mrb[7].mxu1 }
 0x13d   :  { %v721_v34 = vld [vmem:[#allocation2] sm:$0x1c] }
 0x13e   :  { %v725_v51 = vrot.slane %v721_v34, 2  ;;  %949 = vst [vmem:[#allocation2] sm:$0xff] %v940_v47  ;;  %v722_v52 = vld [vmem:[#allocation2 + $0x8] sm:$0x1c] }
 0x13f   :  { %v726_v54 = vrot.slane %v722_v52, 2  ;;  %950 = vst.msk [vmem:[#allocation2 + $0x8] sm:$0xff] %vm185_vm0, %v942_v48  ;;  %v735_v55 = vld [vmem:[#allocation2 + $0x10] sm:$0x7] }
 0x140   :  { %v729_v56 = vadd.f32 %v725_v51, %v719_v53  ;;  %v739_v58 = vrot.slane %v735_v55, 5  ;;  %951 = vst [vmem:[#allocation2 + $0x10] sm:$0xf] %v944_v49  ;;  %v736_v59 = vld [vmem:[#allocation2 + $0x18] sm:$0x7] }
 0x141   :  { %v730_v60 = vadd.f32 %v726_v54, %v720_v57  ;;  %v740_v62 = vrot.slane %v736_v59, 5  ;;  %952 = vst.msk [vmem:[#allocation2 + $0x18] sm:$0xf] %vm235_vm2, %v946_v50 }
 0x142   :  { %731 = vst [vmem:[#allocation3] sm:$0x7] %v729_v56  ;;  %v743_v63 = vadd.f32 %v739_v58, %v733_v61 }
 0x143   :  { %732 = vst.msk [vmem:[#allocation3 + $0x8] sm:$0x7] %vm244_vm3, %v730_v60  ;;  %v744_v1 = vadd.f32 %v740_v62, %v734_v0 }
 0x144   :  { %745 = vst [vmem:[#allocation3] sm:$0x38] %v743_v63 }
 0x145   :  { %v955_v2 = vld [vmem:[#allocation2] sm:$0x38]  ;;  %746 = vst.msk [vmem:[#allocation3 + $0x8] sm:$0x38] %vm268_vm5, %v744_v1 }
 0x146   :  { %v959_v3 = vrot.slane %v955_v2, 3  ;;  %v956_v4 = vld [vmem:[#allocation2 + $0x8] sm:$0x38] }
 0x147   :  { %v960_v6 = vrot.slane %v956_v4, 3  ;;  %v969_v7 = vld [vmem:[#allocation2 + $0x10] sm:$0xe] }
 0x148   :  { %v970_v8 = vld [vmem:[#allocation2 + $0x18] sm:$0xe]  ;;  %v973_v12 = vrot.slane %v969_v7, 6 }
 0x149   :  { %v953_v9 = vld [vmem:[#allocation3] sm:$0x7]  ;;  %v974_v16 = vrot.slane %v970_v8, 6 }
 0x14a   :  { %v963_v10 = vadd.f32 %v959_v3, %v953_v9  ;;  %v954_v11 = vld [vmem:[#allocation3 + $0x8] sm:$0x7] }
 0x14b   :  { %v964_v14 = vadd.f32 %v960_v6, %v954_v11  ;;  %v967_v15 = vld [vmem:[#allocation3] sm:$0x38] }
 0x14c   :  { %965 = vst [vmem:[#allocation3] sm:$0x7] %v963_v10  ;;  %v977_v17 = vadd.f32 %v973_v12, %v967_v15  ;;  %v968_v18 = vld [vmem:[#allocation3 + $0x8] sm:$0x38]  ;;  %v1778_v15 = vmov 1966171168  }
 0x14d   :  { %966 = vst.msk [vmem:[#allocation3 + $0x8] sm:$0x7] %vm244_vm3, %v964_v14  ;;  %v978_v19 = vadd.f32 %v974_v16, %v968_v18  ;;  %v1251_v16 = vunpack.c.l.s4 %v1778_v15 }
 0x14e   :  { %979 = vst [vmem:[#allocation3] sm:$0x38] %v977_v17 }
 0x14f   :  { %980 = vst.msk [vmem:[#allocation3 + $0x8] sm:$0x38] %vm268_vm5, %v978_v19  ;;  %v1252_v17 = vunpack.c.0.s8 %v1251_v16 }
 0x151   :  { %v1255_v19 = vsub.s32 %v1252_v17, %v2306_v13  ;;  %v1266_v13 = vld [vmem:[%s2353_s5] sm:$0x3] }
 0x155   :  { %v981_v26 = vld [vmem:[#allocation3] sm:$0x3f] }
 0x156   :  { %v982_v27 = vld [vmem:[#allocation3 + $0x8] sm:$0x3f]  ;;  %v2321_v28 = vadd.f32 %v988_v23, %v981_v26 }
 0x157   :  { %v2323_v29 = vadd.f32 %v992_v24, %v982_v27 }
 0x158   :  { %v1003_v30 = vmul.f32 %v1001_v25, %v2321_v28 }
 0x159   :  { %v1004_v31 = vmul.f32 %v1001_v25, %v2323_v29  ;;  %v1242_v25 = vld [vmem:[%s2352_s4] sm:$0x3] }
 0x15a   :  { %v1127_v33 = vmul.f32 %v1003_v30, %v1003_v30 }
 0x15b   :  { %v1128_v32 = vmul.f32 %v1004_v31, %v1004_v31  ;;  %1516 = vmatprep.mubr.msk.f32.mxu0 %vm185_vm0, %v1004_v31 }
 0x15c   :  { %1121 = vmatmul.mubr.f32.vlgmr.msra.gmra.mrb[8].mxu0 %v1003_v30 }
 0x15d   :  { %1517 = vmatprep.mubr.msk.f32.mxu1 %vm185_vm0, %v1128_v32 }
 0x15e   :  { %1197 = vmatmul.mubr.f32.vlgmr.msra.gmra.mrb[8].mxu1 %v1127_v33 }
 0x22f   :  { %v1122_v35 = vpop.f32.mrb[8].mxu0 }
 0x230   :  { %v1204_v36 = vsel %vm1203_vm7, %v1122_v35, 0.0  ;;  %v1124_v37 = vpop.f32.mrb[9].mxu0 }
 0x231   :  { %v1205_v38 = vrot.slane %v1204_v36, 4  ;;  %v1211_v39 = vsel %vm28_vm1, %v1124_v37, 0.0  ;;  %v1198_v40 = vpop.f32.mrb[8].mxu1 }
 0x232   :  { %v1212_v41 = vrot.slane %v1211_v39, 4  ;;  %v1220_v42 = vsel %vm1203_vm7, %v1198_v40, 0.0  ;;  %v1200_v43 = vpop.f32.mrb[9].mxu1 }
 0x233   :  { %v1206_v44 = vadd.f32 %v1205_v38, %v1204_v36  ;;  %v1221_v45 = vrot.slane %v1220_v42, 4  ;;  %v1227_v46 = vsel %vm28_vm1, %v1200_v43, 0.0 }
 0x234   :  { %v1213_v47 = vadd.f32 %v1212_v41, %v1211_v39  ;;  %v1228_v48 = vrot.slane %v1227_v46, 4 }
 0x235   :  { %v1207_v49 = vrot.slane %v1206_v44, 2  ;;  %v1222_v50 = vadd.f32 %v1221_v45, %v1220_v42 }
 0x236   :  { %v1214_v34 = vrot.slane %v1213_v47, 2  ;;  %v1229_v51 = vadd.f32 %v1228_v48, %v1227_v46 }
 0x237   :  { %v1208_v52 = vadd.f32 %v1207_v49, %v1206_v44  ;;  %v1223_v53 = vrot.slane %v1222_v50, 2 }
 0x238   :  { %v1215_v54 = vadd.f32 %v1214_v34, %v1213_v47  ;;  %v1230_v55 = vrot.slane %v1229_v51, 2 }
 0x239   :  { %v1209_v56 = vrot.slane %v1208_v52, 1  ;;  %v1224_v57 = vadd.f32 %v1223_v53, %v1222_v50 }
 0x23a   :  { %v1216_v58 = vrot.slane %v1215_v54, 1  ;;  %v1231_v59 = vadd.f32 %v1230_v55, %v1229_v51 }
 0x23b   :  { %v1210_v60 = vadd.f32 %v1209_v56, %v1208_v52  ;;  %v1225_v61 = vrot.slane %v1224_v57, 1 }
 0x23c   :  { %v1217_v62 = vadd.f32 %v1216_v58, %v1215_v54  ;;  %v1232_v63 = vrot.slane %v1231_v59, 1 }
 0x23d   :  { %v1218_v0 = vmul.f32 0.055555556, %v1210_v60  ;;  %v1226_v1 = vadd.f32 %v1225_v61, %v1224_v57 }
 0x23e   :  { %v1219_v2 = vmul.f32 0.055555556, %v1217_v62  ;;  %v1233_v3 = vadd.f32 %v1232_v63, %v1231_v59 }
 0x23f   :  { %v1236_v4 = vmul.f32 %v1218_v0, %v1218_v0  ;;  %v1234_v5 = vmul.f32 0.055555556, %v1226_v1 }
 0x240   :  { %v1237_v6 = vmul.f32 %v1219_v2, %v1219_v2  ;;  %v1235_v7 = vmul.f32 0.055555556, %v1233_v3 }
 0x241   :  { %v1238_v8 = vsub.f32 %v1234_v5, %v1236_v4 }
 0x242   :  { %v1239_v9 = vsub.f32 %v1235_v7, %v1237_v6 }
 0x243   :  { %v1240_v10 = vmax.f32 %v1238_v8, 0.0 }
 0x244   :  { %v1241_v11 = vmax.f32 %v1239_v9, 0.0 }
 0x245   :  { %v1243_v12 = vadd.f32 1e-05, %v1240_v10 }
 0x246   :  { %v1244_v14 = vadd.f32 1e-05, %v1241_v11 }
 0x247   :  { %1772 = vrsqrt.f32 %v1243_v12 }
 0x248   :  { %1774 = vrsqrt.f32 %v1244_v14 }
 0x251   :  { %v1773_v18 = vpop.eup %1772 }
 0x252   :  { %v1775_v22 = vpop.eup %1774 }
 0x253   :  { %v1249_v23 = vcombine.low %v1773_v18, %v1775_v22 }
 0x255   :  { %v1256_v24 = vrot.slane %v1249_v23, %v1255_v19 }
 0x257   :  { %v1263_v26 = vrot.slane %v1256_v24, %v1255_v19 }
 0x259   :  { %v1265_v27 = vmul.f32 %v1263_v26, %v1242_v25 }
 0x25b   :  { %v1271_v30 = vrot.slane %v1265_v27, %v2310_v20  ;;  %v1275_v31 = vrot.slane %v1265_v27, %v2314_v21 }
 0x25d   :  { %v1278_v32 = vmul.f32 %v1271_v30, %v1218_v0  ;;  %v1279_v33 = vmul.f32 %v1275_v31, %v1219_v2  ;;  %v1299_v39 = vmul.f32 %v1271_v30, %v2321_v28  ;;  %v1300_v40 = vmul.f32 %v1275_v31, %v2323_v29 }
 0x25f   :  { %v1282_v35 = vcombine.low %v1278_v32, %v1279_v33 }
 0x261   :  { %v1289_v36 = vrot.slane %v1282_v35, %v1255_v19 }
 0x263   :  { %v1296_v37 = vrot.slane %v1289_v36, %v1255_v19 }
 0x265   :  { %v1298_v38 = vsub.f32 %v1266_v13, %v1296_v37 }
 0x267   :  { %v1305_v41 = vrot.slane %v1298_v38, %v2310_v20  ;;  %v1309_v42 = vrot.slane %v1298_v38, %v2314_v21 }
 0x269   :  { %v1312_v43 = vadd.f32 %v1305_v41, %v1299_v39  ;;  %v1313_v44 = vadd.f32 %v1309_v42, %v1300_v40 }
 0x26b   :  { %vm1314_vm10 = vcmp.ge.f32.partialorder %v1312_v43, 0.0  ;;  %vm1315_vm11 = vcmp.ge.f32.partialorder %v1313_v44, 0.0  ;;  %v1316_v45 = vmul.f32 0.2, %v1312_v43  ;;  %v1317_v46 = vmul.f32 0.2, %v1313_v44 }
 0x26d   :  { %v1318_v47 = vsel %vm1314_vm10, %v1312_v43, %v1316_v45  ;;  %v1319_v48 = vsel %vm1315_vm11, %v1313_v44, %v1317_v46 }
 0x26e   :  { %v1519_v49 = vpack.c.bf16 %v1319_v48, %v1318_v47 }
 0x270   :  { %1331 = vst.msk [vmem:[%s2354_s7] sm:$0x77] %vm1330_vm12, %v1519_v49 }

// kernel: _lambda_.9
= control target key start
LH: loop header
LB: loop body
LE: loop exit
PB: predicated region body
PF: predicated region fallthrough
CT: control target
= control target key end

     0   :  { %v1648_v1 = vmov 0.0   ;;  %vm1649_vm0 = vmmov 0   ;;  %vm209_vm1 = vcmask 523264   ;;  %s2030_s0 = inlined_call_operand.vmem [shape: bf16[10,320], index: 0, kind: input, shape index: {}]   ;;  %s2031_s1 = inlined_call_operand.vmem [shape: bf16[4,320,2], index: 1, kind: input, shape index: {}]   ;;  %s2032_s2 = inlined_call_operand.vmem [shape: f32[1,2], index: 2, kind: input, shape index: {}]   ;;  %s2033_s3 = inlined_call_operand.vmem [shape: f32[2,2], index: 3, kind: input, shape index: {}]   ;;  %s2034_s4 = inlined_call_operand.vmem [shape: f32[1,2], index: 4, kind: input, shape index: {}]   ;;  %s2035_s5 = inlined_call_operand.vmem [shape: f32[1,2], index: 5, kind: input, shape index: {}]   ;;  %s2036_s6 = inlined_call_operand.vmem [shape: f32[4,1], index: 6, kind: input, shape index: {}]   ;;  %s2037_s7 = inlined_call_operand.hbm [shape: f32[4,2], index: 7, kind: output, shape index: {}]  }
   0x1   :  { %v1532_v0 = vld [vmem:[%s2031_s1 + $0x40] sm:$0xff]   ;;  %1481 = vmatprep.subr.bf16.mxu1 %v1648_v1  ;;  %1489 = vmatprep.mubr.msk.bf16.mxu1 %vm1649_vm0, %v1648_v1  ;;  %v1535_v4 = vld [vmem:[%s2031_s1 + $0x48] sm:$0xff]   ;;  %v1538_v7 = vld [vmem:[%s2031_s1 + $0x50] sm:$0xff]  }
   0x2   :  { %v1533_v2 = vld [vmem:[%s2031_s1 + $0x80] sm:$0xff]   ;;  %1373 = vmatprep.subr.bf16.mxu0 %v1532_v0  ;;  %v1536_v5 = vld [vmem:[%s2031_s1 + $0x88] sm:$0xff]   ;;  %v1539_v8 = vld [vmem:[%s2031_s1 + $0x90] sm:$0xff]  }
   0x3   :  { %v1534_v3 = vld [vmem:[%s2031_s1] sm:$0xff]   ;;  %1482 = vmatpush3.bf16.msra.mxu1 %v1533_v2  ;;  %v1537_v6 = vld [vmem:[%s2031_s1 + $0x8] sm:$0xff]   ;;  %v1540_v9 = vld [vmem:[%s2031_s1 + $0x10] sm:$0xff]  }
   0x4   :  { %1374 = vmatpush3.bf16.msra.mxu0 %v1534_v3  ;;  %1483 = vmatprep.subr.bf16.mxu1 %v1648_v1  ;;  %v1541_v10 = vld [vmem:[%s2031_s1 + $0x58] sm:$0xff]   ;;  %v1544_v13 = vld [vmem:[%s2030_s0 + $0x8] ss:$12 sps:$4 sm:$0x1f]   ;;  %v1545_v14 = vld [vmem:[%s2031_s1 + $0xe0] sm:$0xff]  }
   0x5   :  { %1375 = vmatprep.subr.bf16.mxu0 %v1535_v4  ;;  %v1542_v11 = vld [vmem:[%s2031_s1 + $0x98] sm:$0xff]   ;;  %v1546_v15 = vld [vmem:[%s2031_s1 + $0x60] sm:$0xff]   ;;  %v1549_v18 = vld [vmem:[%s2031_s1 + $0xe8] sm:$0xff]  }
   0x6   :  { %v1543_v12 = vld [vmem:[%s2031_s1 + $0x18] sm:$0xff]   ;;  %v1547_v16 = vld [vmem:[%s2031_s1 + $0xa0] sm:$0xff]   ;;  %v1550_v19 = vld [vmem:[%s2031_s1 + $0x68] sm:$0xff]  }
   0x7   :  { %1484 = vmatpush3.bf16.msra.mxu1 %v1536_v5  ;;  %v1548_v17 = vld [vmem:[%s2031_s1 + $0x20] sm:$0xff]   ;;  %v1551_v20 = vld [vmem:[%s2031_s1 + $0xa8] sm:$0xff]   ;;  %v1553_v22 = vld [vmem:[%s2031_s1 + $0xf0] sm:$0xff]  }
   0x8   :  { %1376 = vmatpush3.bf16.msra.mxu0 %v1537_v6  ;;  %1485 = vmatprep.subr.bf16.mxu1 %v1648_v1  ;;  %v1552_v21 = vld [vmem:[%s2031_s1 + $0x28] sm:$0xff]   ;;  %v1554_v23 = vld [vmem:[%s2031_s1 + $0x70] sm:$0xff]   ;;  %v1557_v26 = vld [vmem:[%s2031_s1 + $0xf8] sm:$0xff]  }
   0x9   :  { %1377 = vmatprep.subr.bf16.mxu0 %v1538_v7  ;;  %v1555_v24 = vld [vmem:[%s2031_s1 + $0xb0] sm:$0xff]   ;;  %v1558_v27 = vld [vmem:[%s2031_s1 + $0x78] sm:$0xff]   ;;  %v1788_v30 = vld [vmem:[%s2030_s0] sm:$0xff] }
   0xa   :  { %v1556_v25 = vld [vmem:[%s2031_s1 + $0x30] sm:$0xff]   ;;  %v1559_v28 = vld [vmem:[%s2031_s1 + $0xb8] sm:$0xff]   ;;  %v1563_v33 = vld [vmem:[%s2031_s1 + $0x100] sm:$0xff]  }
   0xb   :  { %1486 = vmatpush3.bf16.msra.mxu1 %v1539_v8  ;;  %v1560_v29 = vld [vmem:[%s2031_s1 + $0x38] sm:$0xff]   ;;  %v32_v31 = vld [vmem:[%s2030_s0 + $0xc] sm:$0x11]  ;;  %v1564_v35 = vld [vmem:[%s2031_s1 + $0xc0] sm:$0xff]  }
   0xc   :  { %1378 = vmatpush3.bf16.msra.mxu0 %v1540_v9  ;;  %1487 = vmatprep.subr.bf16.mxu1 %v1648_v1  ;;  %v1157_v32 = vcombine.high %v1788_v30, %v32_v31  ;;  %v1156_v34 = vcombine.low %v1788_v30, %v32_v31  ;;  %v1565_v36 = vld [vmem:[%s2031_s1 + $0x120] sm:$0xff]   ;;  %v1566_v37 = vld [vmem:[%s2031_s1 + $0x108] sm:$0xff]   ;;  %v1569_v40 = vld [vmem:[%s2031_s1 + $0x110] sm:$0xff]  }
   0xd   :  { %1379 = vmatprep.subr.bf16.mxu0 %v1541_v10  ;;  %v1567_v38 = vld [vmem:[%s2031_s1 + $0xc8] sm:$0xff]   ;;  %v1570_v41 = vld [vmem:[%s2031_s1 + $0xd0] sm:$0xff]   ;;  %v1572_v43 = vld [vmem:[%s2031_s1 + $0x118] sm:$0xff]  }
   0xe   :  { %245 = vmatprep.mubr.bf16.mxu0 %v1157_v32  ;;  %v1568_v39 = vld [vmem:[%s2031_s1 + $0x128] sm:$0xff]   ;;  %v1571_v42 = vld [vmem:[%s2031_s1 + $0x130] sm:$0xff]   ;;  %v1573_v46 = vld [vmem:[%s2031_s1 + $0xd8] sm:$0xff]  }
   0xf   :  { %1488 = vmatpush3.bf16.msra.mxu1 %v1542_v11  ;;  %v309_v44 = vld [vmem:[%s2030_s0 + $0xc] sm:$0x11]  ;;  %v1574_v47 = vld [vmem:[%s2031_s1 + $0x138] sm:$0xff]   ;;  %v1577_v48 = vld [vmem:[%s2030_s0 + $0x8] ss:$12 sps:$4 sm:$0x1f]  }
  0x10   :  { %1380 = vmatpush3.bf16.msra.mxu0 %v1543_v12  ;;  %1400 = vmatprep.subr.bf16.mxu1 %v1545_v14  ;;  %v1221_v45 = vcombine.high %v1788_v30, %v309_v44  ;;  %v1578_v49 = vld [vmem:[%s2031_s1 + $0x180] sm:$0xff]   ;;  %v1220_v50 = vcombine.low %v1788_v30, %v309_v44  ;;  %v1581_v53 = vld [vmem:[%s2031_s1 + $0x188] sm:$0xff]   ;;  %v1584_v56 = vld [vmem:[%s2031_s1 + $0x190] sm:$0xff]  }
  0x11   :  { %1381 = vmatprep.subr.bf16.mxu0 %v1546_v15  ;;  %v1579_v51 = vld [vmem:[%s2031_s1 + $0x1c0] sm:$0xff]   ;;  %v1582_v54 = vld [vmem:[%s2031_s1 + $0x1c8] sm:$0xff]   ;;  %v1585_v57 = vld [vmem:[%s2031_s1 + $0x1d0] sm:$0xff]  }
  0x12   :  { %1490 = vmatmul.mubr.msk.bf16.vlgmr.msra.gmra.mrb[0].mxu1 %vm209_vm1, %v1544_v13  ;;  %v1580_v52 = vld [vmem:[%s2031_s1 + $0x140] sm:$0xff]   ;;  %v1583_v55 = vld [vmem:[%s2031_s1 + $0x148] sm:$0xff]   ;;  %v1586_v58 = vld [vmem:[%s2031_s1 + $0x150] sm:$0xff]  }
  0x13   :  { %1401 = vmatpush3.bf16.msra.mxu1 %v1547_v16  ;;  %522 = vmatprep.mubr.bf16.mxu1 %v1221_v45  ;;  %v1587_v59 = vld [vmem:[%s2031_s1 + $0x198] sm:$0xff]   ;;  %v1591_v62 = vld [vmem:[%s2031_s1 + $0x220] sm:$0xff]   ;;  %v1590_v63 = vld [vmem:[%s2030_s0 + $0x8] ss:$12 sps:$4 sm:$0x1f]  }
  0x14   :  { %1382 = vmatpush3.bf16.msra.mxu0 %v1548_v17  ;;  %1402 = vmatprep.subr.bf16.mxu1 %v1549_v18  ;;  %v1588_v60 = vld [vmem:[%s2031_s1 + $0x1d8] sm:$0xff]   ;;  %v1592_v0 = vld [vmem:[%s2031_s1 + $0x1a0] sm:$0xff]   ;;  %v1595_v4 = vld [vmem:[%s2031_s1 + $0x228] sm:$0xff]  }
  0x15   :  { %1383 = vmatprep.subr.bf16.mxu0 %v1550_v19  ;;  %v1589_v61 = vld [vmem:[%s2031_s1 + $0x158] sm:$0xff]   ;;  %v1593_v2 = vld [vmem:[%s2031_s1 + $0x1e0] sm:$0xff]   ;;  %v1596_v5 = vld [vmem:[%s2031_s1 + $0x1a8] sm:$0xff]  }
  0x16   :  { %v1594_v3 = vld [vmem:[%s2031_s1 + $0x160] sm:$0xff]   ;;  %v1597_v6 = vld [vmem:[%s2031_s1 + $0x1e8] sm:$0xff]   ;;  %v1599_v8 = vld [vmem:[%s2031_s1 + $0x230] sm:$0xff]  }
  0x17   :  { %1403 = vmatpush3.bf16.msra.mxu1 %v1551_v20  ;;  %v1598_v7 = vld [vmem:[%s2031_s1 + $0x168] sm:$0xff]   ;;  %v1600_v9 = vld [vmem:[%s2031_s1 + $0x1b0] sm:$0xff]   ;;  %v1603_v12 = vld [vmem:[%s2031_s1 + $0x238] sm:$0xff]  }
  0x18   :  { %1384 = vmatpush3.bf16.msra.mxu0 %v1552_v21  ;;  %1404 = vmatprep.subr.bf16.mxu1 %v1553_v22  ;;  %v1601_v10 = vld [vmem:[%s2031_s1 + $0x1f0] sm:$0xff]   ;;  %v1604_v14 = vld [vmem:[%s2031_s1 + $0x1b8] sm:$0xff]   ;;  %v1609_v18 = vld [vmem:[%s2031_s1 + $0x240] sm:$0xff]  }
  0x19   :  { %1385 = vmatprep.subr.bf16.mxu0 %v1554_v23  ;;  %v1602_v11 = vld [vmem:[%s2031_s1 + $0x170] sm:$0xff]   ;;  %v1605_v16 = vld [vmem:[%s2031_s1 + $0x1f8] sm:$0xff]   ;;  %v1610_v19 = vld [vmem:[%s2031_s1 + $0x200] sm:$0xff]  }
  0x1a   :  { %v584_v13 = vld [vmem:[%s2030_s0 + $0xc] sm:$0x11]  ;;  %v1606_v17 = vld [vmem:[%s2031_s1 + $0x178] sm:$0xff]   ;;  %v1611_v21 = vld [vmem:[%s2031_s1 + $0x260] sm:$0xff]  }
  0x1b   :  { %1405 = vmatpush3.bf16.msra.mxu1 %v1555_v24  ;;  %v1285_v15 = vcombine.high %v1788_v30, %v584_v13  ;;  %v1284_v20 = vcombine.low %v1788_v30, %v584_v13  ;;  %v1612_v22 = vld [vmem:[%s2031_s1 + $0x248] sm:$0xff]  }
  0x1c   :  { %1386 = vmatpush3.bf16.msra.mxu0 %v1556_v25  ;;  %1406 = vmatprep.subr.bf16.mxu1 %v1557_v26  ;;  %v1613_v23 = vld [vmem:[%s2031_s1 + $0x208] sm:$0xff]   ;;  %v1615_v25 = vld [vmem:[%s2031_s1 + $0x250] sm:$0xff]  }
  0x1d   :  { %1387 = vmatprep.subr.bf16.mxu0 %v1558_v27  ;;  %v1614_v24 = vld [vmem:[%s2031_s1 + $0x268] sm:$0xff]  }
  0x1e   :  { %v859_v26 = vld [vmem:[%s2030_s0 + $0xc] sm:$0x11] }
  0x1f   :  { %1407 = vmatpush3.bf16.msra.mxu1 %v1559_v28  ;;  %v1349_v27 = vcombine.high %v1788_v30, %v859_v26 }
  0x20   :  { %1388 = vmatpush3.bf16.msra.mxu0 %v1560_v29  ;;  %1408 = vmatprep.subr.bf16.mxu1 %v1563_v33 }
  0x21   :  { %1493 = vmatprep.subr.bf16.mxu0 %v1648_v1 }
  0x23   :  { %246 = vmatmul.mubr.bf16.vlgmr.msra.gmra.mrb[0].mxu0 %v1156_v34  ;;  %1409 = vmatpush3.bf16.msra.mxu1 %v1564_v35 }
  0x24   :  { %1494 = vmatpush3.bf16.msra.mxu0 %v1565_v36  ;;  %1410 = vmatprep.subr.bf16.mxu1 %v1566_v37 }
  0x25   :  { %1495 = vmatprep.subr.bf16.mxu0 %v1648_v1  ;;  %1501 = vmatprep.mubr.msk.bf16.mxu0 %vm1649_vm0, %v1648_v1 }
  0x27   :  { %1411 = vmatpush3.bf16.msra.mxu1 %v1567_v38 }
  0x28   :  { %1496 = vmatpush3.bf16.msra.mxu0 %v1568_v39  ;;  %1412 = vmatprep.subr.bf16.mxu1 %v1569_v40 }
  0x29   :  { %1497 = vmatprep.subr.bf16.mxu0 %v1648_v1 }
  0x2b   :  { %1413 = vmatpush3.bf16.msra.mxu1 %v1570_v41 }
  0x2c   :  { %1498 = vmatpush3.bf16.msra.mxu0 %v1571_v42  ;;  %1414 = vmatprep.subr.bf16.mxu1 %v1572_v43 }
  0x2d   :  { %1499 = vmatprep.subr.bf16.mxu0 %v1648_v1 }
  0x2f   :  { %1415 = vmatpush3.bf16.msra.mxu1 %v1573_v46 }
  0x30   :  { %1500 = vmatpush3.bf16.msra.mxu0 %v1574_v47  ;;  %1505 = vmatprep.subr.bf16.mxu1 %v1648_v1 }
  0x31   :  { %1427 = vmatprep.subr.bf16.mxu0 %v1578_v49 }
  0x32   :  { %523 = vmatmul.mubr.bf16.vlgmr.msra.gmra.mrb[4].mxu1 %v1220_v50 }
  0x33   :  { %1502 = vmatmul.mubr.msk.bf16.vlgmr.msra.gmra.mrb[4].mxu0 %vm209_vm1, %v1577_v48  ;;  %1506 = vmatpush3.bf16.msra.mxu1 %v1579_v51 }
  0x34   :  { %1428 = vmatpush3.bf16.msra.mxu0 %v1580_v52  ;;  %1507 = vmatprep.subr.bf16.mxu1 %v1648_v1 }
  0x35   :  { %1429 = vmatprep.subr.bf16.mxu0 %v1581_v53  ;;  %1513 = vmatprep.mubr.msk.bf16.mxu1 %vm1649_vm0, %v1648_v1 }
  0x36   :  { %797 = vmatprep.mubr.bf16.mxu0 %v1285_v15 }
  0x37   :  { %1508 = vmatpush3.bf16.msra.mxu1 %v1582_v54 }
  0x38   :  { %1430 = vmatpush3.bf16.msra.mxu0 %v1583_v55  ;;  %1509 = vmatprep.subr.bf16.mxu1 %v1648_v1 }
  0x39   :  { %1431 = vmatprep.subr.bf16.mxu0 %v1584_v56 }
  0x3b   :  { %1510 = vmatpush3.bf16.msra.mxu1 %v1585_v57 }
  0x3c   :  { %1432 = vmatpush3.bf16.msra.mxu0 %v1586_v58  ;;  %1511 = vmatprep.subr.bf16.mxu1 %v1648_v1 }
  0x3d   :  { %1433 = vmatprep.subr.bf16.mxu0 %v1587_v59 }
  0x3f   :  { %1512 = vmatpush3.bf16.msra.mxu1 %v1588_v60 }
  0x40   :  { %1434 = vmatpush3.bf16.msra.mxu0 %v1589_v61  ;;  %1454 = vmatprep.subr.bf16.mxu1 %v1591_v62 }
  0x41   :  { %1435 = vmatprep.subr.bf16.mxu0 %v1592_v0 }
  0x42   :  { %1514 = vmatmul.mubr.msk.bf16.vlgmr.msra.gmra.mrb[8].mxu1 %vm209_vm1, %v1590_v63 }
  0x43   :  { %1455 = vmatpush3.bf16.msra.mxu1 %v1593_v2 }
  0x44   :  { %1436 = vmatpush3.bf16.msra.mxu0 %v1594_v3  ;;  %1456 = vmatprep.subr.bf16.mxu1 %v1595_v4 }
  0x45   :  { %1437 = vmatprep.subr.bf16.mxu0 %v1596_v5 }
  0x47   :  { %1457 = vmatpush3.bf16.msra.mxu1 %v1597_v6 }
  0x48   :  { %1438 = vmatpush3.bf16.msra.mxu0 %v1598_v7  ;;  %1458 = vmatprep.subr.bf16.mxu1 %v1599_v8 }
  0x49   :  { %1439 = vmatprep.subr.bf16.mxu0 %v1600_v9 }
  0x4b   :  { %1459 = vmatpush3.bf16.msra.mxu1 %v1601_v10 }
  0x4c   :  { %1440 = vmatpush3.bf16.msra.mxu0 %v1602_v11  ;;  %1460 = vmatprep.subr.bf16.mxu1 %v1603_v12 }
  0x4d   :  { %1441 = vmatprep.subr.bf16.mxu0 %v1604_v14 }
  0x4f   :  { %1461 = vmatpush3.bf16.msra.mxu1 %v1605_v16 }
  0x50   :  { %1442 = vmatpush3.bf16.msra.mxu0 %v1606_v17  ;;  %1462 = vmatprep.subr.bf16.mxu1 %v1609_v18 }
  0x51   :  { %1517 = vmatprep.subr.bf16.mxu0 %v1648_v1 }
  0x53   :  { %798 = vmatmul.mubr.bf16.vlgmr.msra.gmra.mrb[8].mxu0 %v1284_v20  ;;  %1463 = vmatpush3.bf16.msra.mxu1 %v1610_v19 }
  0x54   :  { %1518 = vmatpush3.bf16.msra.mxu0 %v1611_v21  ;;  %1464 = vmatprep.subr.bf16.mxu1 %v1612_v22 }
  0x55   :  { %1519 = vmatprep.subr.bf16.mxu0 %v1648_v1  ;;  %1525 = vmatprep.mubr.msk.bf16.mxu0 %vm1649_vm0, %v1648_v1 }
  0x56   :  { %12 = vsyncpa [#allocation5], 0  ;;  %v1616_v28 = vld [vmem:[%s2031_s1 + $0x210] sm:$0xff]   ;;  %1072 = vmatprep.mubr.bf16.mxu1 %v1349_v27  ;;  %v1618_v31 = vld [vmem:[%s2031_s1 + $0x258] sm:$0xff]   ;;  %v1348_v34 = vcombine.low %v1788_v30, %v859_v26  ;;  %vm28_vm2 = vcmask 11264   ;;  %vm295_vm3 = vcmask 15360  }
  0x57   :  { %1465 = vmatpush3.bf16.msra.mxu1 %v1613_v23  ;;  %v1617_v29 = vld [vmem:[%s2031_s1 + $0x270] sm:$0xff]   ;;  %v1619_v32 = vld [vmem:[%s2031_s1 + $0x218] sm:$0xff]   ;;  %29 = vst.msk [vmem:[#allocation3] sm:$0xf] %vm28_vm2, %v1648_v1  ;;  %vm297_vm4 = vcmask 9216   ;;  %s1650_s13 = smov [#allocation4]  }
  0x58   :  { %1520 = vmatpush3.bf16.msra.mxu0 %v1614_v24  ;;  %1466 = vmatprep.subr.bf16.mxu1 %v1615_v25  ;;  %v1620_v33 = vld [vmem:[%s2031_s1 + $0x278] sm:$0xff]   ;;  %v1623_v35 = vld [vmem:[%s2030_s0 + $0x8] ss:$12 sps:$4 sm:$0x1f]   ;;  %s1148_s14 = sshll.u32 %s1650_s13, 4  ;;  %s1149_s14 = int_to_ptr.vmem [resolvable:$true] %s1148_s14 }
  0x59   :  { %1521 = vmatprep.subr.bf16.mxu0 %v1648_v1  ;;  %s1624_s15 = scalar_lea.vmem %s1149_s14, 64  ;;  %p1629_p1 = scmp.lt.s32.totalorder %s1149_s14, %s1149_s14 }
  0x5a   :  { %p1625_p0 = scmp.ne.s32.totalorder %s1149_s14, %s1624_s15  ;;  %p1630_p2 = scmp.lt.s32.totalorder %s1624_s15, %s1624_s15 }
  0x5b   :  { %1467 = vmatpush3.bf16.msra.mxu1 %v1616_v28 }
  0x5c   :  { %1522 = vmatpush3.bf16.msra.mxu0 %v1617_v29  ;;  %1468 = vmatprep.subr.bf16.mxu1 %v1618_v31  ;;  %p1631_p3 = por %p1630_p2, %p1629_p1 }
  0x5d   :  { %1523 = vmatprep.subr.bf16.mxu0 %v1648_v1 }
  0x5e   :  { %v299_v47 = vld [vmem:[#allocation3] sm:$0x3]  ;;  %v303_v1 = vld [vmem:[#allocation3 + $0x2] sm:$0x3]  ;;  %p1632_p4 = pnand %p1631_p3, %p1625_p0 }
  0x5f   :  { %1469 = vmatpush3.bf16.msra.mxu1 %v1619_v32 }
  0x60   :  { %1524 = vmatpush3.bf16.msra.mxu0 %v1620_v33 }
  0x62   :  { %1073 = vmatmul.mubr.bf16.vlgmr.msra.gmra.mrb[12].mxu1 %v1348_v34 }
  0x63   :  { %1526 = vmatmul.mubr.msk.bf16.vlgmr.msra.gmra.mrb[12].mxu0 %vm209_vm1, %v1623_v35 }
  0xe5   :  { %v288_v36 = vpop.f32.mrb[0].mxu1 }
  0xe6   :  { %v1491_v37 = vpop.f32.mrb[1].mxu1 }
  0xe7   :  { %v291_v38 = vpop.f32.mrb[2].mxu1 }
  0xe8   :  { %v1492_v39 = vpop.f32.mrb[3].mxu1 }
  0xf6   :  { %v1389_v40 = vpop.f32.mrb[0].mxu0 }
  0xf7   :  { %v1390_v41 = vpop.f32.mrb[1].mxu0 }
  0xf8   :  { %v1391_v30 = vadd.f32 %v1390_v41, %v1389_v40  ;;  %v1392_v42 = vpop.f32.mrb[2].mxu0 }
  0xf9   :  { %v1393_v43 = vpop.f32.mrb[3].mxu0 }
  0xfa   :  { %v289_v44 = vadd.f32 %v1391_v30, %v288_v36  ;;  %v1394_v45 = vadd.f32 %v1393_v43, %v1392_v42  ;;  %v1372_v43 = vld [vmem:[%s2032_s2] ss:$0 sm:$0xff] }
  0xfc   :  { %296 = vst.msk [vmem:[#allocation2] sm:$0xff] %vm295_vm3, %v289_v44  ;;  %v292_v46 = vadd.f32 %v1394_v45, %v291_v38 }
  0xfe   :  { %298 = vst.msk [vmem:[#allocation2 + $0x8] sm:$0x3] %vm297_vm4, %v292_v46 }
 0x103   :  { %v300_v48 = vld [vmem:[#allocation2] sm:$0x3]  ;;  %v304_v49 = vld [vmem:[#allocation2 + $0x5] sm:$0x3] }
 0x104   :  { %v301_v50 = vadd.f32 %v300_v48, %v299_v47  ;;  %v305_v51 = vadd.f32 %v304_v49, %v303_v1 }
 0x105   :  { %v1416_v52 = vpop.f32.mrb[4].mxu1 }
 0x106   :  { %v1417_v53 = vpop.f32.mrb[5].mxu1  ;;  %v565_v54 = vpop.f32.mrb[4].mxu0  ;;  %302 = vst.msk [vmem:[#allocation3] sm:$0x3] %vm297_vm4, %v301_v50  ;;  %306 = vst.msk [vmem:[#allocation3 + $0x2] sm:$0x3] %vm297_vm4, %v305_v51 }
 0x107   :  { %v1418_v55 = vadd.f32 %v1417_v53, %v1416_v52  ;;  %v1419_v56 = vpop.f32.mrb[6].mxu1  ;;  %v1503_v57 = vpop.f32.mrb[5].mxu0 }
 0x108   :  { %v1420_v58 = vpop.f32.mrb[7].mxu1  ;;  %v568_v59 = vpop.f32.mrb[6].mxu0 }
 0x109   :  { %v566_v60 = vadd.f32 %v1418_v55, %v565_v54  ;;  %v1421_v61 = vadd.f32 %v1420_v58, %v1419_v56  ;;  %v1504_v62 = vpop.f32.mrb[7].mxu0 }
 0x10b   :  { %572 = vst.msk [vmem:[#allocation2] sm:$0xff] %vm295_vm3, %v566_v60  ;;  %v569_v63 = vadd.f32 %v1421_v61, %v568_v59 }
 0x10d   :  { %573 = vst.msk [vmem:[#allocation2 + $0x8] sm:$0x3] %vm297_vm4, %v569_v63  ;;  %v574_v0 = vld [vmem:[#allocation3] sm:$0x3]  ;;  %v578_v4 = vld [vmem:[#allocation3 + $0x2] sm:$0x3] }
 0x112   :  { %v575_v2 = vld [vmem:[#allocation2 + $0x1] sm:$0x3]  ;;  %v579_v3 = vld [vmem:[#allocation2 + $0x6] sm:$0x3] }
 0x113   :  { %v576_v5 = vadd.f32 %v575_v2, %v574_v0  ;;  %v580_v6 = vadd.f32 %v579_v3, %v578_v4 }
 0x115   :  { %v840_v7 = vpop.f32.mrb[8].mxu1  ;;  %577 = vst.msk [vmem:[#allocation3] sm:$0x3] %vm297_vm4, %v576_v5  ;;  %581 = vst.msk [vmem:[#allocation3 + $0x2] sm:$0x3] %vm297_vm4, %v580_v6 }
 0x116   :  { %v1515_v8 = vpop.f32.mrb[9].mxu1 }
 0x117   :  { %v843_v9 = vpop.f32.mrb[10].mxu1 }
 0x118   :  { %v1516_v10 = vpop.f32.mrb[11].mxu1 }
 0x11c   :  { %v849_v20 = vld [vmem:[#allocation3] sm:$0x3]  ;;  %v853_v24 = vld [vmem:[#allocation3 + $0x2] sm:$0x3] }
 0x126   :  { %v1443_v11 = vpop.f32.mrb[8].mxu0 }
 0x127   :  { %v1444_v12 = vpop.f32.mrb[9].mxu0 }
 0x128   :  { %v1445_v13 = vadd.f32 %v1444_v12, %v1443_v11  ;;  %v1446_v14 = vpop.f32.mrb[10].mxu0 }
 0x129   :  { %v1447_v15 = vpop.f32.mrb[11].mxu0 }
 0x12a   :  { %v841_v16 = vadd.f32 %v1445_v13, %v840_v7  ;;  %v1448_v17 = vadd.f32 %v1447_v15, %v1446_v14 }
 0x12c   :  { %847 = vst.msk [vmem:[#allocation2] sm:$0xff] %vm295_vm3, %v841_v16  ;;  %v844_v18 = vadd.f32 %v1448_v17, %v843_v9 }
 0x12e   :  { %848 = vst.msk [vmem:[#allocation2 + $0x8] sm:$0x3] %vm297_vm4, %v844_v18 }
 0x133   :  { %v850_v19 = vld [vmem:[#allocation2 + $0x2] sm:$0x3] }
 0x134   :  { %v851_v21 = vadd.f32 %v850_v19, %v849_v20 }
 0x135   :  { %v1470_v22 = vpop.f32.mrb[12].mxu1  ;;  %v854_v23 = vld [vmem:[#allocation2 + $0x7] sm:$0x3] }
 0x136   :  { %v1471_v25 = vpop.f32.mrb[13].mxu1  ;;  %v1115_v26 = vpop.f32.mrb[12].mxu0  ;;  %852 = vst.msk [vmem:[#allocation3] sm:$0x3] %vm297_vm4, %v851_v21  ;;  %v855_v27 = vadd.f32 %v854_v23, %v853_v24 }
 0x137   :  { %v1472_v28 = vadd.f32 %v1471_v25, %v1470_v22  ;;  %v1473_v29 = vpop.f32.mrb[14].mxu1  ;;  %v1527_v31 = vpop.f32.mrb[13].mxu0 }
 0x138   :  { %v1474_v32 = vpop.f32.mrb[15].mxu1  ;;  %v1118_v33 = vpop.f32.mrb[14].mxu0  ;;  %856 = vst.msk [vmem:[#allocation3 + $0x2] sm:$0x3] %vm297_vm4, %v855_v27 }
 0x139   :  { %v1116_v34 = vadd.f32 %v1472_v28, %v1115_v26  ;;  %v1475_v35 = vadd.f32 %v1474_v32, %v1473_v29  ;;  %v1528_v36 = vpop.f32.mrb[15].mxu0 }
 0x13b   :  { %v1119_v37 = vadd.f32 %v1475_v35, %v1118_v33  ;;  %1122 = vst.msk [vmem:[#allocation2] sm:$0xff] %vm295_vm3, %v1116_v34 }
 0x13d   :  { %1123 = vst.msk [vmem:[#allocation2 + $0x8] sm:$0x3] %vm297_vm4, %v1119_v37  ;;  %v1124_v38 = vld [vmem:[#allocation3] sm:$0x3] }
 0x13f   :  { %v1128_v41 = vld [vmem:[#allocation3 + $0x2] sm:$0x3] }
 0x142   :  { %v1125_v39 = vld [vmem:[#allocation2 + $0x3] sm:$0x3] }
 0x143   :  { %v1126_v40 = vadd.f32 %v1125_v39, %v1124_v38 }
 0x144   :  { %v1129_v30 = vld [vmem:[#allocation2 + $0x8] sm:$0x3] }
 0x145   :  { %1127 = vst.msk [vmem:[#allocation3] sm:$0x3] %vm297_vm4, %v1126_v40  ;;  %v1130_v42 = vadd.f32 %v1129_v30, %v1128_v41 }
 0x147   :  { %1131 = vst.msk [vmem:[#allocation3 + $0x2] sm:$0x3] %vm297_vm4, %v1130_v42 }
 0x14e   :  { %v1132_v44 = vld [vmem:[#allocation3] sm:$0xf] }
 0x14f   :  { %v1140_v45 = vadd.f32 %v1372_v43, %v1132_v44 }
 0x151   :  { %1141 = vst.msk [vmem:[#allocation4] sm:$0xf] %vm28_vm2, %v1140_v45 }
 0x152   :  { %1635 = shalt.err (!%p1632_p4)
}
 0x153   :  { %s1636_s18 = scalar_lea.hbm %s2037_s7, 64 }
 0x154   :  { %p1637_p5 = scmp.ne.s32.totalorder %s2037_s7, %s1636_s18  ;;  %p1640_p6 = scmp.lt.u32.totalorder %s1636_s18, %s2037_s7 }
 0x156   :  { %p1642_p7 = pnand %p1640_p6, %p1637_p5 }
 0x158   :  { %1645 = shalt.err (!%p1642_p7)
}
 0x159   :  { %1151 = dma.vmem_to_hbm [thread:$0]  %s1149_s14, 64, %s2037_s7, [#allocation5]  }
 0x15a   :  { %1646 = dma.done.wait [#allocation5], 64  }
 0x15b   :  { %1647 = vsyncadd [#allocation5], 4294967232 }
 0x15c   :  { %1155 = vsyncpa [#allocation5], 1 }

</bundles_post_ra>
